<compile_context>
chip_gen: v7x
topology: tpu7x:2x2x1
jax: 0.10.0
libtpu: 0.0.40
codegen_flags: <defaults>
</compile_context>

<pallas_src>
import jax
import jax.numpy as jnp
from jax import lax
from jax.experimental import pallas as pl
from jax.experimental.pallas import tpu as pltpu


# ----------------------------------------------------------------------------
# Pallas kernel: fused-gate 2-layer LSTM + sigmoid attention pooling + MLP head
# ----------------------------------------------------------------------------
def mlinknet_kernel(seq_ref,             # [T, Bp, HP]   embedded sequence (time-major, padded)
                    targ_ref,            # [Bp, HP]      target-vertex embedding (padded)
                    w0_ref, b0_ref,      # layer-0 LSTM: [2*HP, 4*HP], [1, 4*HP]
                    w1_ref, b1_ref,      # layer-1 LSTM: [2*HP, 4*HP], [1, 4*HP]
                    watt_ref, batt_ref,  # attention:    [1, HP], [1, 1]
                    w1f_ref, b1f_ref,    # MLP linear1 (BN folded): [2*HP, 256], [1, 256]
                    w2_ref,              # MLP linear2 padded lane-dense: [256, 128]
                    out_ref):            # [Bp, 128]  (column 0 is the real output)
    T = seq_ref.shape[0]
    Bp = seq_ref.shape[1]
    HP = seq_ref.shape[2]

    # Hoist all weight loads out of the recurrence (loaded once, reused T times).
    w0 = w0_ref[...]
    b0 = b0_ref[...]
    w1 = w1_ref[...]
    b1 = b1_ref[...]
    watt = watt_ref[...]       # [1, HP]
    batt = batt_ref[...]       # [1, 1]

    def lstm_cell(x, h, c, w, b):
        # One fused matmul per cell: [Bp, 2*HP] @ [2*HP, 4*HP].
        xh = jnp.concatenate([x, h], axis=-1)                         # lane-aligned concat
        g = jnp.dot(xh, w, preferred_element_type=jnp.float32) + b    # [Bp, 4*HP]
        # PyTorch gate order: input, forget, cell(g), output.  Slices are
        # exact vreg widths (HP = 128).
        i_g = jax.nn.sigmoid(g[:, 0 * HP:1 * HP])
        f_g = jax.nn.sigmoid(g[:, 1 * HP:2 * HP])
        c_g = jnp.tanh(g[:, 2 * HP:3 * HP])
        o_g = jax.nn.sigmoid(g[:, 3 * HP:4 * HP])
        c_new = f_g * c + i_g * c_g
        h_new = o_g * jnp.tanh(c_new)
        return h_new, c_new

    zeros = jnp.zeros((Bp, HP), jnp.float32)

    def step(t, carry):
        h0, c0, h1, c1, pooled = carry
        x_t = seq_ref[t]                                              # [Bp, HP]
        h0, c0 = lstm_cell(x_t, h0, c0, w0, b0)
        h1, c1 = lstm_cell(h0, h1, c1, w1, b1)
        # Attention score on VPU + XLU (no width-1 MXU matmul).
        score = jnp.sum(h1 * watt, axis=-1, keepdims=True) + batt     # [Bp, 1]
        mask = jax.nn.sigmoid(score)
        pooled = pooled + mask * h1
        return h0, c0, h1, c1, pooled

    # T is static (8): fully unroll so adjacent steps' MXU/EUP/VPU work can
    # interleave (also overlaps layer-0[t+1] with layer-1[t]).
    _, _, _, _, pooled = lax.fori_loop(
        0, T, step, (zeros, zeros, zeros, zeros, zeros), unroll=True)

    # MLP head.  concat([pooled, targ]) @ W1_folded + folded-BN bias, then W2.
    mlp_in = jnp.concatenate([pooled, targ_ref[...]], axis=-1)        # [Bp, 2*HP]
    y = jnp.dot(mlp_in, w1f_ref[...], preferred_element_type=jnp.float32) + b1f_ref[...]
    y = jnp.dot(y, w2_ref[...], preferred_element_type=jnp.float32)   # [Bp, 128]
    out_ref[...] = jax.nn.sigmoid(y)                                  # lane-dense store


# ----------------------------------------------------------------------------
# Parameter construction (deterministic, synthetic, PyTorch-like shapes)
# ----------------------------------------------------------------------------
def init_params(key, hidden_size, v_size):
    H = hidden_size
    H1 = H + 1
    ks = jax.random.split(key, 14)
    s = 0.1
    return dict(
        emb=jax.random.normal(ks[0], (v_size, H), jnp.float32),
        # LSTM layer 0 (input H1 -> hidden H1), per-gate weights, two biases
        wih0=s * jax.random.normal(ks[1], (4, H1, H1), jnp.float32),
        whh0=s * jax.random.normal(ks[2], (4, H1, H1), jnp.float32),
        bih0=s * jax.random.normal(ks[3], (4, H1), jnp.float32),
        bhh0=s * jax.random.normal(ks[4], (4, H1), jnp.float32),
        # LSTM layer 1
        wih1=s * jax.random.normal(ks[5], (4, H1, H1), jnp.float32),
        whh1=s * jax.random.normal(ks[6], (4, H1, H1), jnp.float32),
        bih1=s * jax.random.normal(ks[7], (4, H1), jnp.float32),
        bhh1=s * jax.random.normal(ks[8], (4, H1), jnp.float32),
        # attention mask scorer
        watt=s * jax.random.normal(ks[9], (H1,), jnp.float32),
        batt=s * jax.random.normal(ks[10], (1,), jnp.float32),
        # MLP: Linear(2H+1 -> 256, bias=False) stored [in, out]
        w1=s * jax.random.normal(ks[11], (2 * H + 1, 256), jnp.float32),
        # BatchNorm1d(256) running stats / affine (fresh init)
        gamma=jnp.ones((256,), jnp.float32),
        beta=jnp.zeros((256,), jnp.float32),
        mean=jnp.zeros((256,), jnp.float32),
        var=jnp.ones((256,), jnp.float32),
        # Linear(256 -> 1, bias=False)
        w2=s * jax.random.normal(ks[12], (256, 1), jnp.float32),
    )


# ----------------------------------------------------------------------------
# Pack / fuse / pad parameters into the kernel layout
# ----------------------------------------------------------------------------
def pack_kernel_params(p, eps=1e-5, HP=128):
    """Fuse per-gate LSTM weights, fold BatchNorm, zero-pad to lane-aligned HP."""
    H = p["emb"].shape[1]
    H1 = H + 1
    assert H1 <= HP

    def fuse_lstm(wih, whh, bih, bhh):
        # Rows 0..H1-1  <- input weights   (x occupies lanes 0..H1-1 of xh)
        # Rows HP..HP+H1-1 <- hidden weights (h occupies lanes HP..HP+H1-1)
        # Gate k occupies columns [k*HP, k*HP+H1); padded columns keep bias 0
        # so padded hidden entries remain exactly zero through the recurrence.
        W = jnp.zeros((2 * HP, 4 * HP), jnp.float32)
        b = jnp.zeros((1, 4 * HP), jnp.float32)
        for k in range(4):
            W = W.at[:H1, k * HP:k * HP + H1].set(wih[k])
            W = W.at[HP:HP + H1, k * HP:k * HP + H1].set(whh[k])
            b = b.at[0, k * HP:k * HP + H1].set(bih[k] + bhh[k])  # b_ih + b_hh
        return W, b

    w0, b0 = fuse_lstm(p["wih0"], p["whh0"], p["bih0"], p["bhh0"])
    w1, b1 = fuse_lstm(p["wih1"], p["whh1"], p["bih1"], p["bhh1"])

    watt = jnp.zeros((1, HP), jnp.float32).at[0, :H1].set(p["watt"])
    batt = p["batt"].reshape(1, 1)

    # Fold eval-mode BatchNorm into linear1: y_bn = x @ (W1*scale) + (beta - mean*scale)
    scale = p["gamma"] * lax.rsqrt(p["var"] + eps)                 # [256]
    w1_scaled = p["w1"] * scale[None, :]                           # [2H+1, 256]
    b1f = (p["beta"] - p["mean"] * scale).reshape(1, 256)

    w1f = jnp.zeros((2 * HP, 256), jnp.float32)
    w1f = w1f.at[:H1, :].set(w1_scaled[:H1, :])                    # pooled part
    w1f = w1f.at[HP:HP + H, :].set(w1_scaled[H1:, :])              # target-emb part

    # Pad final linear to 128 output lanes (lane-dense matmul + unmasked store).
    w2 = jnp.zeros((256, 128), jnp.float32).at[:, :1].set(p["w2"])

    return dict(w0=w0, b0=b0, w1=w1, b1=b1, watt=watt, batt=batt,
                w1f=w1f, b1f=b1f, w2=w2)


# ----------------------------------------------------------------------------
# Wrapper: gather/pad/transpose glue in plain JAX, hot path in the Pallas kernel
# ----------------------------------------------------------------------------
def mlinknet_forward(emb, kp, seq, targ_v):
    """emb: [V, H] embedding table
       kp : packed kernel params (pack_kernel_params)
       seq: [B, 2, T] float32 (channel 0: vertex ids, channel 1: scalar feature)
       targ_v: [B, 1] int32 target vertex ids."""
    H = emb.shape[1]
    H1 = H + 1
    HP = kp["w0"].shape[0] // 2
    B = seq.shape[0]
    T = seq.shape[2]
    Bp = max(8, ((B + 7) // 8) * 8)                       # sublane-aligned batch

    # Round before the int cast so IDs that travelled through float stay exact.
    ids = jnp.round(seq[:, 0]).astype(jnp.int32)          # [B, T]
    vals = seq[:, 1].astype(jnp.float32)[..., None]       # [B, T, 1]
    seq_vec = jnp.concatenate([jnp.take(emb, ids, axis=0), vals], axis=-1)  # [B,T,H1]

    seq_p = jnp.zeros((Bp, T, HP), jnp.float32).at[:B, :, :H1].set(seq_vec)
    seq_tm = jnp.transpose(seq_p, (1, 0, 2))              # time-major [T, Bp, HP]

    targ_emb = jnp.take(emb, targ_v.astype(jnp.int32)[:, 0], axis=0)        # [B, H]
    targ_p = jnp.zeros((Bp, HP), jnp.float32).at[:B, :H].set(targ_emb)

    # Advisory cost estimate (helps XLA schedule the surrounding glue).
    flops = 2 * T * 2 * Bp * (2 * HP) * (4 * HP) + 2 * (2 * Bp * (2 * HP) * 256 + 2 * Bp * 256 * 128)
    trans = T * (10 * Bp * HP + Bp) + Bp * 128
    byts = 4 * (T * Bp * HP + Bp * HP
                + 2 * (2 * HP) * (4 * HP) + 2 * 4 * HP + HP + 1
                + (2 * HP) * 256 + 256 + 256 * 128 + Bp * 128)

    vmem = pl.BlockSpec(memory_space=pltpu.MemorySpace.VMEM)
    out = pl.pallas_call(
        mlinknet_kernel,
        out_shape=jax.ShapeDtypeStruct((Bp, 128), jnp.float32),
        in_specs=[vmem] * 11,
        out_specs=vmem,
        cost_estimate=pl.CostEstimate(flops=flops, transcendentals=trans,
                                      bytes_accessed=byts),
    )(seq_tm, targ_p,
      kp["w0"], kp["b0"], kp["w1"], kp["b1"],
      kp["watt"], kp["batt"],
      kp["w1f"], kp["b1f"], kp["w2"])
    return out[:B, :1]


# ----------------------------------------------------------------------------
# Pure-JAX reference (unfused / unpadded) for a correctness check
# ----------------------------------------------------------------------------
def mlinknet_reference(params, seq, targ_v, eps=1e-5):
    emb = params["emb"]
    H = emb.shape[1]
    H1 = H + 1
    ids = jnp.round(seq[:, 0]).astype(jnp.int32)
    vals = seq[:, 1].astype(jnp.float32)[..., None]
    seq_vec = jnp.concatenate([jnp.take(emb, ids, axis=0), vals], axis=-1)
    B, T = ids.shape

    def cell(x, h, c, wih, whh, bih, bhh):
        g = [x @ wih[k] + h @ whh[k] + bih[k] + bhh[k] for k in range(4)]
        i = jax.nn.sigmoid(g[0]); f = jax.nn.sigmoid(g[1])
        cg = jnp.tanh(g[2]); o = jax.nn.sigmoid(g[3])
        c = f * c + i * cg
        return o * jnp.tanh(c), c

    h0 = c0 = h1 = c1 = jnp.zeros((B, H1), jnp.float32)
    pooled = jnp.zeros((B, H1), jnp.float32)
    for t in range(T):
        x = seq_vec[:, t]
        h0, c0 = cell(x, h0, c0, params["wih0"], params["whh0"], params["bih0"], params["bhh0"])
        h1, c1 = cell(h0, h1, c1, params["wih1"], params["whh1"], params["bih1"], params["bhh1"])
        score = h1 @ params["watt"][:, None] + params["batt"]
        pooled = pooled + jax.nn.sigmoid(score) * h1

    targ_emb = jnp.take(emb, targ_v.astype(jnp.int32)[:, 0], axis=0)
    x = jnp.concatenate([pooled, targ_emb], axis=-1)
    y = x @ params["w1"]
    scale = params["gamma"] * lax.rsqrt(params["var"] + eps)
    y = y * scale + (params["beta"] - params["mean"] * scale)
    y = y @ params["w2"]
    return jax.nn.sigmoid(y)


if __name__ == "__main__":
    hidden_size = 32
    v_size = 64
    B, T = 2, 8

    key = jax.random.PRNGKey(0)
    k_par, k_ids, k_val, k_tgt = jax.random.split(key, 4)
    params = init_params(k_par, hidden_size, v_size)
    kp = pack_kernel_params(params)

    seq_ids = jax.random.randint(k_ids, (B, T), 0, v_size).astype(jnp.float32)
    seq_vals = jax.random.normal(k_val, (B, T), jnp.float32)
    seq = jnp.stack([seq_ids, seq_vals], axis=1)          # [B, 2, T]
    targ_v = jax.random.randint(k_tgt, (B, 1), 0, v_size).astype(jnp.int32)

    out = jax.jit(mlinknet_forward)(params["emb"], kp, seq, targ_v)
    out = jax.block_until_ready(out)
    assert out.shape == (B, 1)
    assert bool(jnp.all(jnp.isfinite(out)))

    ref = jax.jit(mlinknet_reference)(params, seq, targ_v)
    ref = jax.block_until_ready(ref)
    assert bool(jnp.max(jnp.abs(out - ref)) < 5e-3), "kernel/reference mismatch"

    print("KERNEL_OK")
</pallas_src>

<mosaic_0001>
module attributes {stable_mosaic.version = 11 : i64} {
  func.func @mlinknet_kernel(%arg0: memref<8x8x128xf32, #tpu.memory_space<vmem>>, %arg1: memref<8x128xf32, #tpu.memory_space<vmem>>, %arg2: memref<256x512xf32, #tpu.memory_space<vmem>>, %arg3: memref<1x512xf32, #tpu.memory_space<vmem>>, %arg4: memref<256x512xf32, #tpu.memory_space<vmem>>, %arg5: memref<1x512xf32, #tpu.memory_space<vmem>>, %arg6: memref<1x128xf32, #tpu.memory_space<vmem>>, %arg7: memref<1x1xf32, #tpu.memory_space<vmem>>, %arg8: memref<256x256xf32, #tpu.memory_space<vmem>>, %arg9: memref<1x256xf32, #tpu.memory_space<vmem>>, %arg10: memref<256x128xf32, #tpu.memory_space<vmem>>, %arg11: memref<8x128xf32, #tpu.memory_space<vmem>>) attributes {dimension_semantics = [], scalar_prefetch = 0 : i64, scratch_operands = 0 : i64, tpu.core_type = #tpu.core_type<tc>} {
    %c0 = arith.constant 0 : index
    %c0_0 = arith.constant 0 : index
    %0 = vector.load %arg2[%c0, %c0_0] : memref<256x512xf32, #tpu.memory_space<vmem>>, vector<256x512xf32>
    %c0_1 = arith.constant 0 : index
    %c0_2 = arith.constant 0 : index
    %1 = vector.load %arg3[%c0_1, %c0_2] : memref<1x512xf32, #tpu.memory_space<vmem>>, vector<1x512xf32>
    %c0_3 = arith.constant 0 : index
    %c0_4 = arith.constant 0 : index
    %2 = vector.load %arg4[%c0_3, %c0_4] : memref<256x512xf32, #tpu.memory_space<vmem>>, vector<256x512xf32>
    %c0_5 = arith.constant 0 : index
    %c0_6 = arith.constant 0 : index
    %3 = vector.load %arg5[%c0_5, %c0_6] : memref<1x512xf32, #tpu.memory_space<vmem>>, vector<1x512xf32>
    %c0_7 = arith.constant 0 : index
    %c0_8 = arith.constant 0 : index
    %4 = vector.load %arg6[%c0_7, %c0_8] : memref<1x128xf32, #tpu.memory_space<vmem>>, vector<1x128xf32>
    %c0_9 = arith.constant 0 : index
    %c0_10 = arith.constant 0 : index
    %5 = vector.load %arg7[%c0_9, %c0_10] : memref<1x1xf32, #tpu.memory_space<vmem>>, vector<1x1xf32>
    %cst = arith.constant 0.000000e+00 : f32
    %6 = vector.broadcast %cst : f32 to vector<8x128xf32>
    %c0_i32 = arith.constant 0 : i32
    %7 = arith.index_cast %c0_i32 : i32 to index
    %c0_11 = arith.constant 0 : index
    %c0_12 = arith.constant 0 : index
    %8 = vector.load %arg0[%7, %c0_11, %c0_12] : memref<8x8x128xf32, #tpu.memory_space<vmem>>, vector<1x8x128xf32>
    %9 = vector.shape_cast %8 : vector<1x8x128xf32> to vector<8x128xf32>
    %10 = tpu.concatenate %9, %6 in 1 : vector<8x128xf32>, vector<8x128xf32> -> vector<8x256xf32>
    %cst_13 = arith.constant dense<0.000000e+00> : vector<8x512xf32>
    %11 = tpu.matmul %10, %0, %cst_13 {dimension_numbers = #tpu.dot_dimension_numbers<[1], [0], [0], [1], [0, 0, 1, 1], [], []>} : vector<8x256xf32>, vector<256x512xf32>, vector<8x512xf32> -> vector<8x512xf32>
    %12 = vector.broadcast %1 : vector<1x512xf32> to vector<8x512xf32>
    %13 = arith.addf %11, %12 : vector<8x512xf32>
    %14 = vector.extract_strided_slice %13 {offsets = [0, 0], sizes = [8, 128], strides = [1, 1]} : vector<8x512xf32> to vector<8x128xf32>
    %15 = arith.negf %14 : vector<8x128xf32>
    %16 = math.exp %15 : vector<8x128xf32>
    %cst_14 = arith.constant 1.000000e+00 : f32
    %17 = vector.broadcast %cst_14 : f32 to vector<8x128xf32>
    %18 = arith.addf %17, %16 : vector<8x128xf32>
    %19 = arith.divf %17, %18 : vector<8x128xf32>
    %20 = vector.extract_strided_slice %13 {offsets = [0, 128], sizes = [8, 128], strides = [1, 1]} : vector<8x512xf32> to vector<8x128xf32>
    %21 = arith.negf %20 : vector<8x128xf32>
    %22 = math.exp %21 : vector<8x128xf32>
    %cst_15 = arith.constant 1.000000e+00 : f32
    %23 = vector.broadcast %cst_15 : f32 to vector<8x128xf32>
    %24 = arith.addf %23, %22 : vector<8x128xf32>
    %25 = arith.divf %23, %24 : vector<8x128xf32>
    %26 = vector.extract_strided_slice %13 {offsets = [0, 256], sizes = [8, 128], strides = [1, 1]} : vector<8x512xf32> to vector<8x128xf32>
    %27 = math.tanh %26 : vector<8x128xf32>
    %28 = vector.extract_strided_slice %13 {offsets = [0, 384], sizes = [8, 128], strides = [1, 1]} : vector<8x512xf32> to vector<8x128xf32>
    %29 = arith.negf %28 : vector<8x128xf32>
    %30 = math.exp %29 : vector<8x128xf32>
    %cst_16 = arith.constant 1.000000e+00 : f32
    %31 = vector.broadcast %cst_16 : f32 to vector<8x128xf32>
    %32 = arith.addf %31, %30 : vector<8x128xf32>
    %33 = arith.divf %31, %32 : vector<8x128xf32>
    %34 = arith.mulf %25, %6 : vector<8x128xf32>
    %35 = arith.mulf %19, %27 : vector<8x128xf32>
    %36 = arith.addf %34, %35 : vector<8x128xf32>
    %37 = math.tanh %36 : vector<8x128xf32>
    %38 = arith.mulf %33, %37 : vector<8x128xf32>
    %39 = tpu.concatenate %38, %6 in 1 : vector<8x128xf32>, vector<8x128xf32> -> vector<8x256xf32>
    %cst_17 = arith.constant dense<0.000000e+00> : vector<8x512xf32>
    %40 = tpu.matmul %39, %2, %cst_17 {dimension_numbers = #tpu.dot_dimension_numbers<[1], [0], [0], [1], [0, 0, 1, 1], [], []>} : vector<8x256xf32>, vector<256x512xf32>, vector<8x512xf32> -> vector<8x512xf32>
    %41 = vector.broadcast %3 : vector<1x512xf32> to vector<8x512xf32>
    %42 = arith.addf %40, %41 : vector<8x512xf32>
    %43 = vector.extract_strided_slice %42 {offsets = [0, 0], sizes = [8, 128], strides = [1, 1]} : vector<8x512xf32> to vector<8x128xf32>
    %44 = arith.negf %43 : vector<8x128xf32>
    %45 = math.exp %44 : vector<8x128xf32>
    %cst_18 = arith.constant 1.000000e+00 : f32
    %46 = vector.broadcast %cst_18 : f32 to vector<8x128xf32>
    %47 = arith.addf %46, %45 : vector<8x128xf32>
    %48 = arith.divf %46, %47 : vector<8x128xf32>
    %49 = vector.extract_strided_slice %42 {offsets = [0, 128], sizes = [8, 128], strides = [1, 1]} : vector<8x512xf32> to vector<8x128xf32>
    %50 = arith.negf %49 : vector<8x128xf32>
    %51 = math.exp %50 : vector<8x128xf32>
    %cst_19 = arith.constant 1.000000e+00 : f32
    %52 = vector.broadcast %cst_19 : f32 to vector<8x128xf32>
    %53 = arith.addf %52, %51 : vector<8x128xf32>
    %54 = arith.divf %52, %53 : vector<8x128xf32>
    %55 = vector.extract_strided_slice %42 {offsets = [0, 256], sizes = [8, 128], strides = [1, 1]} : vector<8x512xf32> to vector<8x128xf32>
    %56 = math.tanh %55 : vector<8x128xf32>
    %57 = vector.extract_strided_slice %42 {offsets = [0, 384], sizes = [8, 128], strides = [1, 1]} : vector<8x512xf32> to vector<8x128xf32>
    %58 = arith.negf %57 : vector<8x128xf32>
    %59 = math.exp %58 : vector<8x128xf32>
    %cst_20 = arith.constant 1.000000e+00 : f32
    %60 = vector.broadcast %cst_20 : f32 to vector<8x128xf32>
    %61 = arith.addf %60, %59 : vector<8x128xf32>
    %62 = arith.divf %60, %61 : vector<8x128xf32>
    %63 = arith.mulf %54, %6 : vector<8x128xf32>
    %64 = arith.mulf %48, %56 : vector<8x128xf32>
    %65 = arith.addf %63, %64 : vector<8x128xf32>
    %66 = math.tanh %65 : vector<8x128xf32>
    %67 = arith.mulf %62, %66 : vector<8x128xf32>
    %68 = vector.broadcast %4 : vector<1x128xf32> to vector<8x128xf32>
    %69 = arith.mulf %67, %68 : vector<8x128xf32>
    %cst_21 = arith.constant dense<0.000000e+00> : vector<8xf32>
    %70 = vector.multi_reduction <add>, %69, %cst_21 [1] : vector<8x128xf32> to vector<8xf32>
    %71 = vector.shape_cast %70 : vector<8xf32> to vector<8x1xf32>
    %72 = vector.broadcast %5 : vector<1x1xf32> to vector<8x1xf32>
    %73 = arith.addf %71, %72 : vector<8x1xf32>
    %74 = arith.negf %73 : vector<8x1xf32>
    %75 = math.exp %74 : vector<8x1xf32>
    %cst_22 = arith.constant 1.000000e+00 : f32
    %76 = vector.broadcast %cst_22 : f32 to vector<8x1xf32>
    %77 = arith.addf %76, %75 : vector<8x1xf32>
    %78 = arith.divf %76, %77 : vector<8x1xf32>
    %79 = vector.broadcast %78 : vector<8x1xf32> to vector<8x128xf32>
    %80 = arith.mulf %79, %67 : vector<8x128xf32>
    %81 = arith.addf %6, %80 : vector<8x128xf32>
    %c1_i32 = arith.constant 1 : i32
    %82 = arith.index_cast %c1_i32 : i32 to index
    %c0_23 = arith.constant 0 : index
    %c0_24 = arith.constant 0 : index
    %83 = vector.load %arg0[%82, %c0_23, %c0_24] : memref<8x8x128xf32, #tpu.memory_space<vmem>>, vector<1x8x128xf32>
    %84 = vector.shape_cast %83 : vector<1x8x128xf32> to vector<8x128xf32>
    %85 = tpu.concatenate %84, %38 in 1 : vector<8x128xf32>, vector<8x128xf32> -> vector<8x256xf32>
    %cst_25 = arith.constant dense<0.000000e+00> : vector<8x512xf32>
    %86 = tpu.matmul %85, %0, %cst_25 {dimension_numbers = #tpu.dot_dimension_numbers<[1], [0], [0], [1], [0, 0, 1, 1], [], []>} : vector<8x256xf32>, vector<256x512xf32>, vector<8x512xf32> -> vector<8x512xf32>
    %87 = vector.broadcast %1 : vector<1x512xf32> to vector<8x512xf32>
    %88 = arith.addf %86, %87 : vector<8x512xf32>
    %89 = vector.extract_strided_slice %88 {offsets = [0, 0], sizes = [8, 128], strides = [1, 1]} : vector<8x512xf32> to vector<8x128xf32>
    %90 = arith.negf %89 : vector<8x128xf32>
    %91 = math.exp %90 : vector<8x128xf32>
    %cst_26 = arith.constant 1.000000e+00 : f32
    %92 = vector.broadcast %cst_26 : f32 to vector<8x128xf32>
    %93 = arith.addf %92, %91 : vector<8x128xf32>
    %94 = arith.divf %92, %93 : vector<8x128xf32>
    %95 = vector.extract_strided_slice %88 {offsets = [0, 128], sizes = [8, 128], strides = [1, 1]} : vector<8x512xf32> to vector<8x128xf32>
    %96 = arith.negf %95 : vector<8x128xf32>
    %97 = math.exp %96 : vector<8x128xf32>
    %cst_27 = arith.constant 1.000000e+00 : f32
    %98 = vector.broadcast %cst_27 : f32 to vector<8x128xf32>
    %99 = arith.addf %98, %97 : vector<8x128xf32>
    %100 = arith.divf %98, %99 : vector<8x128xf32>
    %101 = vector.extract_strided_slice %88 {offsets = [0, 256], sizes = [8, 128], strides = [1, 1]} : vector<8x512xf32> to vector<8x128xf32>
    %102 = math.tanh %101 : vector<8x128xf32>
    %103 = vector.extract_strided_slice %88 {offsets = [0, 384], sizes = [8, 128], strides = [1, 1]} : vector<8x512xf32> to vector<8x128xf32>
    %104 = arith.negf %103 : vector<8x128xf32>
    %105 = math.exp %104 : vector<8x128xf32>
    %cst_28 = arith.constant 1.000000e+00 : f32
    %106 = vector.broadcast %cst_28 : f32 to vector<8x128xf32>
    %107 = arith.addf %106, %105 : vector<8x128xf32>
    %108 = arith.divf %106, %107 : vector<8x128xf32>
    %109 = arith.mulf %100, %36 : vector<8x128xf32>
    %110 = arith.mulf %94, %102 : vector<8x128xf32>
    %111 = arith.addf %109, %110 : vector<8x128xf32>
    %112 = math.tanh %111 : vector<8x128xf32>
    %113 = arith.mulf %108, %112 : vector<8x128xf32>
    %114 = tpu.concatenate %113, %67 in 1 : vector<8x128xf32>, vector<8x128xf32> -> vector<8x256xf32>
    %cst_29 = arith.constant dense<0.000000e+00> : vector<8x512xf32>
    %115 = tpu.matmul %114, %2, %cst_29 {dimension_numbers = #tpu.dot_dimension_numbers<[1], [0], [0], [1], [0, 0, 1, 1], [], []>} : vector<8x256xf32>, vector<256x512xf32>, vector<8x512xf32> -> vector<8x512xf32>
    %116 = vector.broadcast %3 : vector<1x512xf32> to vector<8x512xf32>
    %117 = arith.addf %115, %116 : vector<8x512xf32>
    %118 = vector.extract_strided_slice %117 {offsets = [0, 0], sizes = [8, 128], strides = [1, 1]} : vector<8x512xf32> to vector<8x128xf32>
    %119 = arith.negf %118 : vector<8x128xf32>
    %120 = math.exp %119 : vector<8x128xf32>
    %cst_30 = arith.constant 1.000000e+00 : f32
    %121 = vector.broadcast %cst_30 : f32 to vector<8x128xf32>
    %122 = arith.addf %121, %120 : vector<8x128xf32>
    %123 = arith.divf %121, %122 : vector<8x128xf32>
    %124 = vector.extract_strided_slice %117 {offsets = [0, 128], sizes = [8, 128], strides = [1, 1]} : vector<8x512xf32> to vector<8x128xf32>
    %125 = arith.negf %124 : vector<8x128xf32>
    %126 = math.exp %125 : vector<8x128xf32>
    %cst_31 = arith.constant 1.000000e+00 : f32
    %127 = vector.broadcast %cst_31 : f32 to vector<8x128xf32>
    %128 = arith.addf %127, %126 : vector<8x128xf32>
    %129 = arith.divf %127, %128 : vector<8x128xf32>
    %130 = vector.extract_strided_slice %117 {offsets = [0, 256], sizes = [8, 128], strides = [1, 1]} : vector<8x512xf32> to vector<8x128xf32>
    %131 = math.tanh %130 : vector<8x128xf32>
    %132 = vector.extract_strided_slice %117 {offsets = [0, 384], sizes = [8, 128], strides = [1, 1]} : vector<8x512xf32> to vector<8x128xf32>
    %133 = arith.negf %132 : vector<8x128xf32>
    %134 = math.exp %133 : vector<8x128xf32>
    %cst_32 = arith.constant 1.000000e+00 : f32
    %135 = vector.broadcast %cst_32 : f32 to vector<8x128xf32>
    %136 = arith.addf %135, %134 : vector<8x128xf32>
    %137 = arith.divf %135, %136 : vector<8x128xf32>
    %138 = arith.mulf %129, %65 : vector<8x128xf32>
    %139 = arith.mulf %123, %131 : vector<8x128xf32>
    %140 = arith.addf %138, %139 : vector<8x128xf32>
    %141 = math.tanh %140 : vector<8x128xf32>
    %142 = arith.mulf %137, %141 : vector<8x128xf32>
    %143 = vector.broadcast %4 : vector<1x128xf32> to vector<8x128xf32>
    %144 = arith.mulf %142, %143 : vector<8x128xf32>
    %cst_33 = arith.constant dense<0.000000e+00> : vector<8xf32>
    %145 = vector.multi_reduction <add>, %144, %cst_33 [1] : vector<8x128xf32> to vector<8xf32>
    %146 = vector.shape_cast %145 : vector<8xf32> to vector<8x1xf32>
    %147 = vector.broadcast %5 : vector<1x1xf32> to vector<8x1xf32>
    %148 = arith.addf %146, %147 : vector<8x1xf32>
    %149 = arith.negf %148 : vector<8x1xf32>
    %150 = math.exp %149 : vector<8x1xf32>
    %cst_34 = arith.constant 1.000000e+00 : f32
    %151 = vector.broadcast %cst_34 : f32 to vector<8x1xf32>
    %152 = arith.addf %151, %150 : vector<8x1xf32>
    %153 = arith.divf %151, %152 : vector<8x1xf32>
    %154 = vector.broadcast %153 : vector<8x1xf32> to vector<8x128xf32>
    %155 = arith.mulf %154, %142 : vector<8x128xf32>
    %156 = arith.addf %81, %155 : vector<8x128xf32>
    %c2_i32 = arith.constant 2 : i32
    %157 = arith.index_cast %c2_i32 : i32 to index
    %c0_35 = arith.constant 0 : index
    %c0_36 = arith.constant 0 : index
    %158 = vector.load %arg0[%157, %c0_35, %c0_36] : memref<8x8x128xf32, #tpu.memory_space<vmem>>, vector<1x8x128xf32>
    %159 = vector.shape_cast %158 : vector<1x8x128xf32> to vector<8x128xf32>
    %160 = tpu.concatenate %159, %113 in 1 : vector<8x128xf32>, vector<8x128xf32> -> vector<8x256xf32>
    %cst_37 = arith.constant dense<0.000000e+00> : vector<8x512xf32>
    %161 = tpu.matmul %160, %0, %cst_37 {dimension_numbers = #tpu.dot_dimension_numbers<[1], [0], [0], [1], [0, 0, 1, 1], [], []>} : vector<8x256xf32>, vector<256x512xf32>, vector<8x512xf32> -> vector<8x512xf32>
    %162 = vector.broadcast %1 : vector<1x512xf32> to vector<8x512xf32>
    %163 = arith.addf %161, %162 : vector<8x512xf32>
    %164 = vector.extract_strided_slice %163 {offsets = [0, 0], sizes = [8, 128], strides = [1, 1]} : vector<8x512xf32> to vector<8x128xf32>
    %165 = arith.negf %164 : vector<8x128xf32>
    %166 = math.exp %165 : vector<8x128xf32>
    %cst_38 = arith.constant 1.000000e+00 : f32
    %167 = vector.broadcast %cst_38 : f32 to vector<8x128xf32>
    %168 = arith.addf %167, %166 : vector<8x128xf32>
    %169 = arith.divf %167, %168 : vector<8x128xf32>
    %170 = vector.extract_strided_slice %163 {offsets = [0, 128], sizes = [8, 128], strides = [1, 1]} : vector<8x512xf32> to vector<8x128xf32>
    %171 = arith.negf %170 : vector<8x128xf32>
    %172 = math.exp %171 : vector<8x128xf32>
    %cst_39 = arith.constant 1.000000e+00 : f32
    %173 = vector.broadcast %cst_39 : f32 to vector<8x128xf32>
    %174 = arith.addf %173, %172 : vector<8x128xf32>
    %175 = arith.divf %173, %174 : vector<8x128xf32>
    %176 = vector.extract_strided_slice %163 {offsets = [0, 256], sizes = [8, 128], strides = [1, 1]} : vector<8x512xf32> to vector<8x128xf32>
    %177 = math.tanh %176 : vector<8x128xf32>
    %178 = vector.extract_strided_slice %163 {offsets = [0, 384], sizes = [8, 128], strides = [1, 1]} : vector<8x512xf32> to vector<8x128xf32>
    %179 = arith.negf %178 : vector<8x128xf32>
    %180 = math.exp %179 : vector<8x128xf32>
    %cst_40 = arith.constant 1.000000e+00 : f32
    %181 = vector.broadcast %cst_40 : f32 to vector<8x128xf32>
    %182 = arith.addf %181, %180 : vector<8x128xf32>
    %183 = arith.divf %181, %182 : vector<8x128xf32>
    %184 = arith.mulf %175, %111 : vector<8x128xf32>
    %185 = arith.mulf %169, %177 : vector<8x128xf32>
    %186 = arith.addf %184, %185 : vector<8x128xf32>
    %187 = math.tanh %186 : vector<8x128xf32>
    %188 = arith.mulf %183, %187 : vector<8x128xf32>
    %189 = tpu.concatenate %188, %142 in 1 : vector<8x128xf32>, vector<8x128xf32> -> vector<8x256xf32>
    %cst_41 = arith.constant dense<0.000000e+00> : vector<8x512xf32>
    %190 = tpu.matmul %189, %2, %cst_41 {dimension_numbers = #tpu.dot_dimension_numbers<[1], [0], [0], [1], [0, 0, 1, 1], [], []>} : vector<8x256xf32>, vector<256x512xf32>, vector<8x512xf32> -> vector<8x512xf32>
    %191 = vector.broadcast %3 : vector<1x512xf32> to vector<8x512xf32>
    %192 = arith.addf %190, %191 : vector<8x512xf32>
    %193 = vector.extract_strided_slice %192 {offsets = [0, 0], sizes = [8, 128], strides = [1, 1]} : vector<8x512xf32> to vector<8x128xf32>
    %194 = arith.negf %193 : vector<8x128xf32>
    %195 = math.exp %194 : vector<8x128xf32>
    %cst_42 = arith.constant 1.000000e+00 : f32
    %196 = vector.broadcast %cst_42 : f32 to vector<8x128xf32>
    %197 = arith.addf %196, %195 : vector<8x128xf32>
    %198 = arith.divf %196, %197 : vector<8x128xf32>
    %199 = vector.extract_strided_slice %192 {offsets = [0, 128], sizes = [8, 128], strides = [1, 1]} : vector<8x512xf32> to vector<8x128xf32>
    %200 = arith.negf %199 : vector<8x128xf32>
    %201 = math.exp %200 : vector<8x128xf32>
    %cst_43 = arith.constant 1.000000e+00 : f32
    %202 = vector.broadcast %cst_43 : f32 to vector<8x128xf32>
    %203 = arith.addf %202, %201 : vector<8x128xf32>
    %204 = arith.divf %202, %203 : vector<8x128xf32>
    %205 = vector.extract_strided_slice %192 {offsets = [0, 256], sizes = [8, 128], strides = [1, 1]} : vector<8x512xf32> to vector<8x128xf32>
    %206 = math.tanh %205 : vector<8x128xf32>
    %207 = vector.extract_strided_slice %192 {offsets = [0, 384], sizes = [8, 128], strides = [1, 1]} : vector<8x512xf32> to vector<8x128xf32>
    %208 = arith.negf %207 : vector<8x128xf32>
    %209 = math.exp %208 : vector<8x128xf32>
    %cst_44 = arith.constant 1.000000e+00 : f32
    %210 = vector.broadcast %cst_44 : f32 to vector<8x128xf32>
    %211 = arith.addf %210, %209 : vector<8x128xf32>
    %212 = arith.divf %210, %211 : vector<8x128xf32>
    %213 = arith.mulf %204, %140 : vector<8x128xf32>
    %214 = arith.mulf %198, %206 : vector<8x128xf32>
    %215 = arith.addf %213, %214 : vector<8x128xf32>
    %216 = math.tanh %215 : vector<8x128xf32>
    %217 = arith.mulf %212, %216 : vector<8x128xf32>
    %218 = vector.broadcast %4 : vector<1x128xf32> to vector<8x128xf32>
    %219 = arith.mulf %217, %218 : vector<8x128xf32>
    %cst_45 = arith.constant dense<0.000000e+00> : vector<8xf32>
    %220 = vector.multi_reduction <add>, %219, %cst_45 [1] : vector<8x128xf32> to vector<8xf32>
    %221 = vector.shape_cast %220 : vector<8xf32> to vector<8x1xf32>
    %222 = vector.broadcast %5 : vector<1x1xf32> to vector<8x1xf32>
    %223 = arith.addf %221, %222 : vector<8x1xf32>
    %224 = arith.negf %223 : vector<8x1xf32>
    %225 = math.exp %224 : vector<8x1xf32>
    %cst_46 = arith.constant 1.000000e+00 : f32
    %226 = vector.broadcast %cst_46 : f32 to vector<8x1xf32>
    %227 = arith.addf %226, %225 : vector<8x1xf32>
    %228 = arith.divf %226, %227 : vector<8x1xf32>
    %229 = vector.broadcast %228 : vector<8x1xf32> to vector<8x128xf32>
    %230 = arith.mulf %229, %217 : vector<8x128xf32>
    %231 = arith.addf %156, %230 : vector<8x128xf32>
    %c3_i32 = arith.constant 3 : i32
    %232 = arith.index_cast %c3_i32 : i32 to index
    %c0_47 = arith.constant 0 : index
    %c0_48 = arith.constant 0 : index
    %233 = vector.load %arg0[%232, %c0_47, %c0_48] : memref<8x8x128xf32, #tpu.memory_space<vmem>>, vector<1x8x128xf32>
    %234 = vector.shape_cast %233 : vector<1x8x128xf32> to vector<8x128xf32>
    %235 = tpu.concatenate %234, %188 in 1 : vector<8x128xf32>, vector<8x128xf32> -> vector<8x256xf32>
    %cst_49 = arith.constant dense<0.000000e+00> : vector<8x512xf32>
    %236 = tpu.matmul %235, %0, %cst_49 {dimension_numbers = #tpu.dot_dimension_numbers<[1], [0], [0], [1], [0, 0, 1, 1], [], []>} : vector<8x256xf32>, vector<256x512xf32>, vector<8x512xf32> -> vector<8x512xf32>
    %237 = vector.broadcast %1 : vector<1x512xf32> to vector<8x512xf32>
    %238 = arith.addf %236, %237 : vector<8x512xf32>
    %239 = vector.extract_strided_slice %238 {offsets = [0, 0], sizes = [8, 128], strides = [1, 1]} : vector<8x512xf32> to vector<8x128xf32>
    %240 = arith.negf %239 : vector<8x128xf32>
    %241 = math.exp %240 : vector<8x128xf32>
    %cst_50 = arith.constant 1.000000e+00 : f32
    %242 = vector.broadcast %cst_50 : f32 to vector<8x128xf32>
    %243 = arith.addf %242, %241 : vector<8x128xf32>
    %244 = arith.divf %242, %243 : vector<8x128xf32>
    %245 = vector.extract_strided_slice %238 {offsets = [0, 128], sizes = [8, 128], strides = [1, 1]} : vector<8x512xf32> to vector<8x128xf32>
    %246 = arith.negf %245 : vector<8x128xf32>
    %247 = math.exp %246 : vector<8x128xf32>
    %cst_51 = arith.constant 1.000000e+00 : f32
    %248 = vector.broadcast %cst_51 : f32 to vector<8x128xf32>
    %249 = arith.addf %248, %247 : vector<8x128xf32>
    %250 = arith.divf %248, %249 : vector<8x128xf32>
    %251 = vector.extract_strided_slice %238 {offsets = [0, 256], sizes = [8, 128], strides = [1, 1]} : vector<8x512xf32> to vector<8x128xf32>
    %252 = math.tanh %251 : vector<8x128xf32>
    %253 = vector.extract_strided_slice %238 {offsets = [0, 384], sizes = [8, 128], strides = [1, 1]} : vector<8x512xf32> to vector<8x128xf32>
    %254 = arith.negf %253 : vector<8x128xf32>
    %255 = math.exp %254 : vector<8x128xf32>
    %cst_52 = arith.constant 1.000000e+00 : f32
    %256 = vector.broadcast %cst_52 : f32 to vector<8x128xf32>
    %257 = arith.addf %256, %255 : vector<8x128xf32>
    %258 = arith.divf %256, %257 : vector<8x128xf32>
    %259 = arith.mulf %250, %186 : vector<8x128xf32>
    %260 = arith.mulf %244, %252 : vector<8x128xf32>
    %261 = arith.addf %259, %260 : vector<8x128xf32>
    %262 = math.tanh %261 : vector<8x128xf32>
    %263 = arith.mulf %258, %262 : vector<8x128xf32>
    %264 = tpu.concatenate %263, %217 in 1 : vector<8x128xf32>, vector<8x128xf32> -> vector<8x256xf32>
    %cst_53 = arith.constant dense<0.000000e+00> : vector<8x512xf32>
    %265 = tpu.matmul %264, %2, %cst_53 {dimension_numbers = #tpu.dot_dimension_numbers<[1], [0], [0], [1], [0, 0, 1, 1], [], []>} : vector<8x256xf32>, vector<256x512xf32>, vector<8x512xf32> -> vector<8x512xf32>
    %266 = vector.broadcast %3 : vector<1x512xf32> to vector<8x512xf32>
    %267 = arith.addf %265, %266 : vector<8x512xf32>
    %268 = vector.extract_strided_slice %267 {offsets = [0, 0], sizes = [8, 128], strides = [1, 1]} : vector<8x512xf32> to vector<8x128xf32>
    %269 = arith.negf %268 : vector<8x128xf32>
    %270 = math.exp %269 : vector<8x128xf32>
    %cst_54 = arith.constant 1.000000e+00 : f32
    %271 = vector.broadcast %cst_54 : f32 to vector<8x128xf32>
    %272 = arith.addf %271, %270 : vector<8x128xf32>
    %273 = arith.divf %271, %272 : vector<8x128xf32>
    %274 = vector.extract_strided_slice %267 {offsets = [0, 128], sizes = [8, 128], strides = [1, 1]} : vector<8x512xf32> to vector<8x128xf32>
    %275 = arith.negf %274 : vector<8x128xf32>
    %276 = math.exp %275 : vector<8x128xf32>
    %cst_55 = arith.constant 1.000000e+00 : f32
    %277 = vector.broadcast %cst_55 : f32 to vector<8x128xf32>
    %278 = arith.addf %277, %276 : vector<8x128xf32>
    %279 = arith.divf %277, %278 : vector<8x128xf32>
    %280 = vector.extract_strided_slice %267 {offsets = [0, 256], sizes = [8, 128], strides = [1, 1]} : vector<8x512xf32> to vector<8x128xf32>
    %281 = math.tanh %280 : vector<8x128xf32>
    %282 = vector.extract_strided_slice %267 {offsets = [0, 384], sizes = [8, 128], strides = [1, 1]} : vector<8x512xf32> to vector<8x128xf32>
    %283 = arith.negf %282 : vector<8x128xf32>
    %284 = math.exp %283 : vector<8x128xf32>
    %cst_56 = arith.constant 1.000000e+00 : f32
    %285 = vector.broadcast %cst_56 : f32 to vector<8x128xf32>
    %286 = arith.addf %285, %284 : vector<8x128xf32>
    %287 = arith.divf %285, %286 : vector<8x128xf32>
    %288 = arith.mulf %279, %215 : vector<8x128xf32>
    %289 = arith.mulf %273, %281 : vector<8x128xf32>
    %290 = arith.addf %288, %289 : vector<8x128xf32>
    %291 = math.tanh %290 : vector<8x128xf32>
    %292 = arith.mulf %287, %291 : vector<8x128xf32>
    %293 = vector.broadcast %4 : vector<1x128xf32> to vector<8x128xf32>
    %294 = arith.mulf %292, %293 : vector<8x128xf32>
    %cst_57 = arith.constant dense<0.000000e+00> : vector<8xf32>
    %295 = vector.multi_reduction <add>, %294, %cst_57 [1] : vector<8x128xf32> to vector<8xf32>
    %296 = vector.shape_cast %295 : vector<8xf32> to vector<8x1xf32>
    %297 = vector.broadcast %5 : vector<1x1xf32> to vector<8x1xf32>
    %298 = arith.addf %296, %297 : vector<8x1xf32>
    %299 = arith.negf %298 : vector<8x1xf32>
    %300 = math.exp %299 : vector<8x1xf32>
    %cst_58 = arith.constant 1.000000e+00 : f32
    %301 = vector.broadcast %cst_58 : f32 to vector<8x1xf32>
    %302 = arith.addf %301, %300 : vector<8x1xf32>
    %303 = arith.divf %301, %302 : vector<8x1xf32>
    %304 = vector.broadcast %303 : vector<8x1xf32> to vector<8x128xf32>
    %305 = arith.mulf %304, %292 : vector<8x128xf32>
    %306 = arith.addf %231, %305 : vector<8x128xf32>
    %c4_i32 = arith.constant 4 : i32
    %307 = arith.index_cast %c4_i32 : i32 to index
    %c0_59 = arith.constant 0 : index
    %c0_60 = arith.constant 0 : index
    %308 = vector.load %arg0[%307, %c0_59, %c0_60] : memref<8x8x128xf32, #tpu.memory_space<vmem>>, vector<1x8x128xf32>
    %309 = vector.shape_cast %308 : vector<1x8x128xf32> to vector<8x128xf32>
    %310 = tpu.concatenate %309, %263 in 1 : vector<8x128xf32>, vector<8x128xf32> -> vector<8x256xf32>
    %cst_61 = arith.constant dense<0.000000e+00> : vector<8x512xf32>
    %311 = tpu.matmul %310, %0, %cst_61 {dimension_numbers = #tpu.dot_dimension_numbers<[1], [0], [0], [1], [0, 0, 1, 1], [], []>} : vector<8x256xf32>, vector<256x512xf32>, vector<8x512xf32> -> vector<8x512xf32>
    %312 = vector.broadcast %1 : vector<1x512xf32> to vector<8x512xf32>
    %313 = arith.addf %311, %312 : vector<8x512xf32>
    %314 = vector.extract_strided_slice %313 {offsets = [0, 0], sizes = [8, 128], strides = [1, 1]} : vector<8x512xf32> to vector<8x128xf32>
    %315 = arith.negf %314 : vector<8x128xf32>
    %316 = math.exp %315 : vector<8x128xf32>
    %cst_62 = arith.constant 1.000000e+00 : f32
    %317 = vector.broadcast %cst_62 : f32 to vector<8x128xf32>
    %318 = arith.addf %317, %316 : vector<8x128xf32>
    %319 = arith.divf %317, %318 : vector<8x128xf32>
    %320 = vector.extract_strided_slice %313 {offsets = [0, 128], sizes = [8, 128], strides = [1, 1]} : vector<8x512xf32> to vector<8x128xf32>
    %321 = arith.negf %320 : vector<8x128xf32>
    %322 = math.exp %321 : vector<8x128xf32>
    %cst_63 = arith.constant 1.000000e+00 : f32
    %323 = vector.broadcast %cst_63 : f32 to vector<8x128xf32>
    %324 = arith.addf %323, %322 : vector<8x128xf32>
    %325 = arith.divf %323, %324 : vector<8x128xf32>
    %326 = vector.extract_strided_slice %313 {offsets = [0, 256], sizes = [8, 128], strides = [1, 1]} : vector<8x512xf32> to vector<8x128xf32>
    %327 = math.tanh %326 : vector<8x128xf32>
    %328 = vector.extract_strided_slice %313 {offsets = [0, 384], sizes = [8, 128], strides = [1, 1]} : vector<8x512xf32> to vector<8x128xf32>
    %329 = arith.negf %328 : vector<8x128xf32>
    %330 = math.exp %329 : vector<8x128xf32>
    %cst_64 = arith.constant 1.000000e+00 : f32
    %331 = vector.broadcast %cst_64 : f32 to vector<8x128xf32>
    %332 = arith.addf %331, %330 : vector<8x128xf32>
    %333 = arith.divf %331, %332 : vector<8x128xf32>
    %334 = arith.mulf %325, %261 : vector<8x128xf32>
    %335 = arith.mulf %319, %327 : vector<8x128xf32>
    %336 = arith.addf %334, %335 : vector<8x128xf32>
    %337 = math.tanh %336 : vector<8x128xf32>
    %338 = arith.mulf %333, %337 : vector<8x128xf32>
    %339 = tpu.concatenate %338, %292 in 1 : vector<8x128xf32>, vector<8x128xf32> -> vector<8x256xf32>
    %cst_65 = arith.constant dense<0.000000e+00> : vector<8x512xf32>
    %340 = tpu.matmul %339, %2, %cst_65 {dimension_numbers = #tpu.dot_dimension_numbers<[1], [0], [0], [1], [0, 0, 1, 1], [], []>} : vector<8x256xf32>, vector<256x512xf32>, vector<8x512xf32> -> vector<8x512xf32>
    %341 = vector.broadcast %3 : vector<1x512xf32> to vector<8x512xf32>
    %342 = arith.addf %340, %341 : vector<8x512xf32>
    %343 = vector.extract_strided_slice %342 {offsets = [0, 0], sizes = [8, 128], strides = [1, 1]} : vector<8x512xf32> to vector<8x128xf32>
    %344 = arith.negf %343 : vector<8x128xf32>
    %345 = math.exp %344 : vector<8x128xf32>
    %cst_66 = arith.constant 1.000000e+00 : f32
    %346 = vector.broadcast %cst_66 : f32 to vector<8x128xf32>
    %347 = arith.addf %346, %345 : vector<8x128xf32>
    %348 = arith.divf %346, %347 : vector<8x128xf32>
    %349 = vector.extract_strided_slice %342 {offsets = [0, 128], sizes = [8, 128], strides = [1, 1]} : vector<8x512xf32> to vector<8x128xf32>
    %350 = arith.negf %349 : vector<8x128xf32>
    %351 = math.exp %350 : vector<8x128xf32>
    %cst_67 = arith.constant 1.000000e+00 : f32
    %352 = vector.broadcast %cst_67 : f32 to vector<8x128xf32>
    %353 = arith.addf %352, %351 : vector<8x128xf32>
    %354 = arith.divf %352, %353 : vector<8x128xf32>
    %355 = vector.extract_strided_slice %342 {offsets = [0, 256], sizes = [8, 128], strides = [1, 1]} : vector<8x512xf32> to vector<8x128xf32>
    %356 = math.tanh %355 : vector<8x128xf32>
    %357 = vector.extract_strided_slice %342 {offsets = [0, 384], sizes = [8, 128], strides = [1, 1]} : vector<8x512xf32> to vector<8x128xf32>
    %358 = arith.negf %357 : vector<8x128xf32>
    %359 = math.exp %358 : vector<8x128xf32>
    %cst_68 = arith.constant 1.000000e+00 : f32
    %360 = vector.broadcast %cst_68 : f32 to vector<8x128xf32>
    %361 = arith.addf %360, %359 : vector<8x128xf32>
    %362 = arith.divf %360, %361 : vector<8x128xf32>
    %363 = arith.mulf %354, %290 : vector<8x128xf32>
    %364 = arith.mulf %348, %356 : vector<8x128xf32>
    %365 = arith.addf %363, %364 : vector<8x128xf32>
    %366 = math.tanh %365 : vector<8x128xf32>
    %367 = arith.mulf %362, %366 : vector<8x128xf32>
    %368 = vector.broadcast %4 : vector<1x128xf32> to vector<8x128xf32>
    %369 = arith.mulf %367, %368 : vector<8x128xf32>
    %cst_69 = arith.constant dense<0.000000e+00> : vector<8xf32>
    %370 = vector.multi_reduction <add>, %369, %cst_69 [1] : vector<8x128xf32> to vector<8xf32>
    %371 = vector.shape_cast %370 : vector<8xf32> to vector<8x1xf32>
    %372 = vector.broadcast %5 : vector<1x1xf32> to vector<8x1xf32>
    %373 = arith.addf %371, %372 : vector<8x1xf32>
    %374 = arith.negf %373 : vector<8x1xf32>
    %375 = math.exp %374 : vector<8x1xf32>
    %cst_70 = arith.constant 1.000000e+00 : f32
    %376 = vector.broadcast %cst_70 : f32 to vector<8x1xf32>
    %377 = arith.addf %376, %375 : vector<8x1xf32>
    %378 = arith.divf %376, %377 : vector<8x1xf32>
    %379 = vector.broadcast %378 : vector<8x1xf32> to vector<8x128xf32>
    %380 = arith.mulf %379, %367 : vector<8x128xf32>
    %381 = arith.addf %306, %380 : vector<8x128xf32>
    %c5_i32 = arith.constant 5 : i32
    %382 = arith.index_cast %c5_i32 : i32 to index
    %c0_71 = arith.constant 0 : index
    %c0_72 = arith.constant 0 : index
    %383 = vector.load %arg0[%382, %c0_71, %c0_72] : memref<8x8x128xf32, #tpu.memory_space<vmem>>, vector<1x8x128xf32>
    %384 = vector.shape_cast %383 : vector<1x8x128xf32> to vector<8x128xf32>
    %385 = tpu.concatenate %384, %338 in 1 : vector<8x128xf32>, vector<8x128xf32> -> vector<8x256xf32>
    %cst_73 = arith.constant dense<0.000000e+00> : vector<8x512xf32>
    %386 = tpu.matmul %385, %0, %cst_73 {dimension_numbers = #tpu.dot_dimension_numbers<[1], [0], [0], [1], [0, 0, 1, 1], [], []>} : vector<8x256xf32>, vector<256x512xf32>, vector<8x512xf32> -> vector<8x512xf32>
    %387 = vector.broadcast %1 : vector<1x512xf32> to vector<8x512xf32>
    %388 = arith.addf %386, %387 : vector<8x512xf32>
    %389 = vector.extract_strided_slice %388 {offsets = [0, 0], sizes = [8, 128], strides = [1, 1]} : vector<8x512xf32> to vector<8x128xf32>
    %390 = arith.negf %389 : vector<8x128xf32>
    %391 = math.exp %390 : vector<8x128xf32>
    %cst_74 = arith.constant 1.000000e+00 : f32
    %392 = vector.broadcast %cst_74 : f32 to vector<8x128xf32>
    %393 = arith.addf %392, %391 : vector<8x128xf32>
    %394 = arith.divf %392, %393 : vector<8x128xf32>
    %395 = vector.extract_strided_slice %388 {offsets = [0, 128], sizes = [8, 128], strides = [1, 1]} : vector<8x512xf32> to vector<8x128xf32>
    %396 = arith.negf %395 : vector<8x128xf32>
    %397 = math.exp %396 : vector<8x128xf32>
    %cst_75 = arith.constant 1.000000e+00 : f32
    %398 = vector.broadcast %cst_75 : f32 to vector<8x128xf32>
    %399 = arith.addf %398, %397 : vector<8x128xf32>
    %400 = arith.divf %398, %399 : vector<8x128xf32>
    %401 = vector.extract_strided_slice %388 {offsets = [0, 256], sizes = [8, 128], strides = [1, 1]} : vector<8x512xf32> to vector<8x128xf32>
    %402 = math.tanh %401 : vector<8x128xf32>
    %403 = vector.extract_strided_slice %388 {offsets = [0, 384], sizes = [8, 128], strides = [1, 1]} : vector<8x512xf32> to vector<8x128xf32>
    %404 = arith.negf %403 : vector<8x128xf32>
    %405 = math.exp %404 : vector<8x128xf32>
    %cst_76 = arith.constant 1.000000e+00 : f32
    %406 = vector.broadcast %cst_76 : f32 to vector<8x128xf32>
    %407 = arith.addf %406, %405 : vector<8x128xf32>
    %408 = arith.divf %406, %407 : vector<8x128xf32>
    %409 = arith.mulf %400, %336 : vector<8x128xf32>
    %410 = arith.mulf %394, %402 : vector<8x128xf32>
    %411 = arith.addf %409, %410 : vector<8x128xf32>
    %412 = math.tanh %411 : vector<8x128xf32>
    %413 = arith.mulf %408, %412 : vector<8x128xf32>
    %414 = tpu.concatenate %413, %367 in 1 : vector<8x128xf32>, vector<8x128xf32> -> vector<8x256xf32>
    %cst_77 = arith.constant dense<0.000000e+00> : vector<8x512xf32>
    %415 = tpu.matmul %414, %2, %cst_77 {dimension_numbers = #tpu.dot_dimension_numbers<[1], [0], [0], [1], [0, 0, 1, 1], [], []>} : vector<8x256xf32>, vector<256x512xf32>, vector<8x512xf32> -> vector<8x512xf32>
    %416 = vector.broadcast %3 : vector<1x512xf32> to vector<8x512xf32>
    %417 = arith.addf %415, %416 : vector<8x512xf32>
    %418 = vector.extract_strided_slice %417 {offsets = [0, 0], sizes = [8, 128], strides = [1, 1]} : vector<8x512xf32> to vector<8x128xf32>
    %419 = arith.negf %418 : vector<8x128xf32>
    %420 = math.exp %419 : vector<8x128xf32>
    %cst_78 = arith.constant 1.000000e+00 : f32
    %421 = vector.broadcast %cst_78 : f32 to vector<8x128xf32>
    %422 = arith.addf %421, %420 : vector<8x128xf32>
    %423 = arith.divf %421, %422 : vector<8x128xf32>
    %424 = vector.extract_strided_slice %417 {offsets = [0, 128], sizes = [8, 128], strides = [1, 1]} : vector<8x512xf32> to vector<8x128xf32>
    %425 = arith.negf %424 : vector<8x128xf32>
    %426 = math.exp %425 : vector<8x128xf32>
    %cst_79 = arith.constant 1.000000e+00 : f32
    %427 = vector.broadcast %cst_79 : f32 to vector<8x128xf32>
    %428 = arith.addf %427, %426 : vector<8x128xf32>
    %429 = arith.divf %427, %428 : vector<8x128xf32>
    %430 = vector.extract_strided_slice %417 {offsets = [0, 256], sizes = [8, 128], strides = [1, 1]} : vector<8x512xf32> to vector<8x128xf32>
    %431 = math.tanh %430 : vector<8x128xf32>
    %432 = vector.extract_strided_slice %417 {offsets = [0, 384], sizes = [8, 128], strides = [1, 1]} : vector<8x512xf32> to vector<8x128xf32>
    %433 = arith.negf %432 : vector<8x128xf32>
    %434 = math.exp %433 : vector<8x128xf32>
    %cst_80 = arith.constant 1.000000e+00 : f32
    %435 = vector.broadcast %cst_80 : f32 to vector<8x128xf32>
    %436 = arith.addf %435, %434 : vector<8x128xf32>
    %437 = arith.divf %435, %436 : vector<8x128xf32>
    %438 = arith.mulf %429, %365 : vector<8x128xf32>
    %439 = arith.mulf %423, %431 : vector<8x128xf32>
    %440 = arith.addf %438, %439 : vector<8x128xf32>
    %441 = math.tanh %440 : vector<8x128xf32>
    %442 = arith.mulf %437, %441 : vector<8x128xf32>
    %443 = vector.broadcast %4 : vector<1x128xf32> to vector<8x128xf32>
    %444 = arith.mulf %442, %443 : vector<8x128xf32>
    %cst_81 = arith.constant dense<0.000000e+00> : vector<8xf32>
    %445 = vector.multi_reduction <add>, %444, %cst_81 [1] : vector<8x128xf32> to vector<8xf32>
    %446 = vector.shape_cast %445 : vector<8xf32> to vector<8x1xf32>
    %447 = vector.broadcast %5 : vector<1x1xf32> to vector<8x1xf32>
    %448 = arith.addf %446, %447 : vector<8x1xf32>
    %449 = arith.negf %448 : vector<8x1xf32>
    %450 = math.exp %449 : vector<8x1xf32>
    %cst_82 = arith.constant 1.000000e+00 : f32
    %451 = vector.broadcast %cst_82 : f32 to vector<8x1xf32>
    %452 = arith.addf %451, %450 : vector<8x1xf32>
    %453 = arith.divf %451, %452 : vector<8x1xf32>
    %454 = vector.broadcast %453 : vector<8x1xf32> to vector<8x128xf32>
    %455 = arith.mulf %454, %442 : vector<8x128xf32>
    %456 = arith.addf %381, %455 : vector<8x128xf32>
    %c6_i32 = arith.constant 6 : i32
    %457 = arith.index_cast %c6_i32 : i32 to index
    %c0_83 = arith.constant 0 : index
    %c0_84 = arith.constant 0 : index
    %458 = vector.load %arg0[%457, %c0_83, %c0_84] : memref<8x8x128xf32, #tpu.memory_space<vmem>>, vector<1x8x128xf32>
    %459 = vector.shape_cast %458 : vector<1x8x128xf32> to vector<8x128xf32>
    %460 = tpu.concatenate %459, %413 in 1 : vector<8x128xf32>, vector<8x128xf32> -> vector<8x256xf32>
    %cst_85 = arith.constant dense<0.000000e+00> : vector<8x512xf32>
    %461 = tpu.matmul %460, %0, %cst_85 {dimension_numbers = #tpu.dot_dimension_numbers<[1], [0], [0], [1], [0, 0, 1, 1], [], []>} : vector<8x256xf32>, vector<256x512xf32>, vector<8x512xf32> -> vector<8x512xf32>
    %462 = vector.broadcast %1 : vector<1x512xf32> to vector<8x512xf32>
    %463 = arith.addf %461, %462 : vector<8x512xf32>
    %464 = vector.extract_strided_slice %463 {offsets = [0, 0], sizes = [8, 128], strides = [1, 1]} : vector<8x512xf32> to vector<8x128xf32>
    %465 = arith.negf %464 : vector<8x128xf32>
    %466 = math.exp %465 : vector<8x128xf32>
    %cst_86 = arith.constant 1.000000e+00 : f32
    %467 = vector.broadcast %cst_86 : f32 to vector<8x128xf32>
    %468 = arith.addf %467, %466 : vector<8x128xf32>
    %469 = arith.divf %467, %468 : vector<8x128xf32>
    %470 = vector.extract_strided_slice %463 {offsets = [0, 128], sizes = [8, 128], strides = [1, 1]} : vector<8x512xf32> to vector<8x128xf32>
    %471 = arith.negf %470 : vector<8x128xf32>
    %472 = math.exp %471 : vector<8x128xf32>
    %cst_87 = arith.constant 1.000000e+00 : f32
    %473 = vector.broadcast %cst_87 : f32 to vector<8x128xf32>
    %474 = arith.addf %473, %472 : vector<8x128xf32>
    %475 = arith.divf %473, %474 : vector<8x128xf32>
    %476 = vector.extract_strided_slice %463 {offsets = [0, 256], sizes = [8, 128], strides = [1, 1]} : vector<8x512xf32> to vector<8x128xf32>
    %477 = math.tanh %476 : vector<8x128xf32>
    %478 = vector.extract_strided_slice %463 {offsets = [0, 384], sizes = [8, 128], strides = [1, 1]} : vector<8x512xf32> to vector<8x128xf32>
    %479 = arith.negf %478 : vector<8x128xf32>
    %480 = math.exp %479 : vector<8x128xf32>
    %cst_88 = arith.constant 1.000000e+00 : f32
    %481 = vector.broadcast %cst_88 : f32 to vector<8x128xf32>
    %482 = arith.addf %481, %480 : vector<8x128xf32>
    %483 = arith.divf %481, %482 : vector<8x128xf32>
    %484 = arith.mulf %475, %411 : vector<8x128xf32>
    %485 = arith.mulf %469, %477 : vector<8x128xf32>
    %486 = arith.addf %484, %485 : vector<8x128xf32>
    %487 = math.tanh %486 : vector<8x128xf32>
    %488 = arith.mulf %483, %487 : vector<8x128xf32>
    %489 = tpu.concatenate %488, %442 in 1 : vector<8x128xf32>, vector<8x128xf32> -> vector<8x256xf32>
    %cst_89 = arith.constant dense<0.000000e+00> : vector<8x512xf32>
    %490 = tpu.matmul %489, %2, %cst_89 {dimension_numbers = #tpu.dot_dimension_numbers<[1], [0], [0], [1], [0, 0, 1, 1], [], []>} : vector<8x256xf32>, vector<256x512xf32>, vector<8x512xf32> -> vector<8x512xf32>
    %491 = vector.broadcast %3 : vector<1x512xf32> to vector<8x512xf32>
    %492 = arith.addf %490, %491 : vector<8x512xf32>
    %493 = vector.extract_strided_slice %492 {offsets = [0, 0], sizes = [8, 128], strides = [1, 1]} : vector<8x512xf32> to vector<8x128xf32>
    %494 = arith.negf %493 : vector<8x128xf32>
    %495 = math.exp %494 : vector<8x128xf32>
    %cst_90 = arith.constant 1.000000e+00 : f32
    %496 = vector.broadcast %cst_90 : f32 to vector<8x128xf32>
    %497 = arith.addf %496, %495 : vector<8x128xf32>
    %498 = arith.divf %496, %497 : vector<8x128xf32>
    %499 = vector.extract_strided_slice %492 {offsets = [0, 128], sizes = [8, 128], strides = [1, 1]} : vector<8x512xf32> to vector<8x128xf32>
    %500 = arith.negf %499 : vector<8x128xf32>
    %501 = math.exp %500 : vector<8x128xf32>
    %cst_91 = arith.constant 1.000000e+00 : f32
    %502 = vector.broadcast %cst_91 : f32 to vector<8x128xf32>
    %503 = arith.addf %502, %501 : vector<8x128xf32>
    %504 = arith.divf %502, %503 : vector<8x128xf32>
    %505 = vector.extract_strided_slice %492 {offsets = [0, 256], sizes = [8, 128], strides = [1, 1]} : vector<8x512xf32> to vector<8x128xf32>
    %506 = math.tanh %505 : vector<8x128xf32>
    %507 = vector.extract_strided_slice %492 {offsets = [0, 384], sizes = [8, 128], strides = [1, 1]} : vector<8x512xf32> to vector<8x128xf32>
    %508 = arith.negf %507 : vector<8x128xf32>
    %509 = math.exp %508 : vector<8x128xf32>
    %cst_92 = arith.constant 1.000000e+00 : f32
    %510 = vector.broadcast %cst_92 : f32 to vector<8x128xf32>
    %511 = arith.addf %510, %509 : vector<8x128xf32>
    %512 = arith.divf %510, %511 : vector<8x128xf32>
    %513 = arith.mulf %504, %440 : vector<8x128xf32>
    %514 = arith.mulf %498, %506 : vector<8x128xf32>
    %515 = arith.addf %513, %514 : vector<8x128xf32>
    %516 = math.tanh %515 : vector<8x128xf32>
    %517 = arith.mulf %512, %516 : vector<8x128xf32>
    %518 = vector.broadcast %4 : vector<1x128xf32> to vector<8x128xf32>
    %519 = arith.mulf %517, %518 : vector<8x128xf32>
    %cst_93 = arith.constant dense<0.000000e+00> : vector<8xf32>
    %520 = vector.multi_reduction <add>, %519, %cst_93 [1] : vector<8x128xf32> to vector<8xf32>
    %521 = vector.shape_cast %520 : vector<8xf32> to vector<8x1xf32>
    %522 = vector.broadcast %5 : vector<1x1xf32> to vector<8x1xf32>
    %523 = arith.addf %521, %522 : vector<8x1xf32>
    %524 = arith.negf %523 : vector<8x1xf32>
    %525 = math.exp %524 : vector<8x1xf32>
    %cst_94 = arith.constant 1.000000e+00 : f32
    %526 = vector.broadcast %cst_94 : f32 to vector<8x1xf32>
    %527 = arith.addf %526, %525 : vector<8x1xf32>
    %528 = arith.divf %526, %527 : vector<8x1xf32>
    %529 = vector.broadcast %528 : vector<8x1xf32> to vector<8x128xf32>
    %530 = arith.mulf %529, %517 : vector<8x128xf32>
    %531 = arith.addf %456, %530 : vector<8x128xf32>
    %c7_i32 = arith.constant 7 : i32
    %532 = arith.index_cast %c7_i32 : i32 to index
    %c0_95 = arith.constant 0 : index
    %c0_96 = arith.constant 0 : index
    %533 = vector.load %arg0[%532, %c0_95, %c0_96] : memref<8x8x128xf32, #tpu.memory_space<vmem>>, vector<1x8x128xf32>
    %534 = vector.shape_cast %533 : vector<1x8x128xf32> to vector<8x128xf32>
    %535 = tpu.concatenate %534, %488 in 1 : vector<8x128xf32>, vector<8x128xf32> -> vector<8x256xf32>
    %cst_97 = arith.constant dense<0.000000e+00> : vector<8x512xf32>
    %536 = tpu.matmul %535, %0, %cst_97 {dimension_numbers = #tpu.dot_dimension_numbers<[1], [0], [0], [1], [0, 0, 1, 1], [], []>} : vector<8x256xf32>, vector<256x512xf32>, vector<8x512xf32> -> vector<8x512xf32>
    %537 = vector.broadcast %1 : vector<1x512xf32> to vector<8x512xf32>
    %538 = arith.addf %536, %537 : vector<8x512xf32>
    %539 = vector.extract_strided_slice %538 {offsets = [0, 0], sizes = [8, 128], strides = [1, 1]} : vector<8x512xf32> to vector<8x128xf32>
    %540 = arith.negf %539 : vector<8x128xf32>
    %541 = math.exp %540 : vector<8x128xf32>
    %cst_98 = arith.constant 1.000000e+00 : f32
    %542 = vector.broadcast %cst_98 : f32 to vector<8x128xf32>
    %543 = arith.addf %542, %541 : vector<8x128xf32>
    %544 = arith.divf %542, %543 : vector<8x128xf32>
    %545 = vector.extract_strided_slice %538 {offsets = [0, 128], sizes = [8, 128], strides = [1, 1]} : vector<8x512xf32> to vector<8x128xf32>
    %546 = arith.negf %545 : vector<8x128xf32>
    %547 = math.exp %546 : vector<8x128xf32>
    %cst_99 = arith.constant 1.000000e+00 : f32
    %548 = vector.broadcast %cst_99 : f32 to vector<8x128xf32>
    %549 = arith.addf %548, %547 : vector<8x128xf32>
    %550 = arith.divf %548, %549 : vector<8x128xf32>
    %551 = vector.extract_strided_slice %538 {offsets = [0, 256], sizes = [8, 128], strides = [1, 1]} : vector<8x512xf32> to vector<8x128xf32>
    %552 = math.tanh %551 : vector<8x128xf32>
    %553 = vector.extract_strided_slice %538 {offsets = [0, 384], sizes = [8, 128], strides = [1, 1]} : vector<8x512xf32> to vector<8x128xf32>
    %554 = arith.negf %553 : vector<8x128xf32>
    %555 = math.exp %554 : vector<8x128xf32>
    %cst_100 = arith.constant 1.000000e+00 : f32
    %556 = vector.broadcast %cst_100 : f32 to vector<8x128xf32>
    %557 = arith.addf %556, %555 : vector<8x128xf32>
    %558 = arith.divf %556, %557 : vector<8x128xf32>
    %559 = arith.mulf %550, %486 : vector<8x128xf32>
    %560 = arith.mulf %544, %552 : vector<8x128xf32>
    %561 = arith.addf %559, %560 : vector<8x128xf32>
    %562 = math.tanh %561 : vector<8x128xf32>
    %563 = arith.mulf %558, %562 : vector<8x128xf32>
    %564 = tpu.concatenate %563, %517 in 1 : vector<8x128xf32>, vector<8x128xf32> -> vector<8x256xf32>
    %cst_101 = arith.constant dense<0.000000e+00> : vector<8x512xf32>
    %565 = tpu.matmul %564, %2, %cst_101 {dimension_numbers = #tpu.dot_dimension_numbers<[1], [0], [0], [1], [0, 0, 1, 1], [], []>} : vector<8x256xf32>, vector<256x512xf32>, vector<8x512xf32> -> vector<8x512xf32>
    %566 = vector.broadcast %3 : vector<1x512xf32> to vector<8x512xf32>
    %567 = arith.addf %565, %566 : vector<8x512xf32>
    %568 = vector.extract_strided_slice %567 {offsets = [0, 0], sizes = [8, 128], strides = [1, 1]} : vector<8x512xf32> to vector<8x128xf32>
    %569 = arith.negf %568 : vector<8x128xf32>
    %570 = math.exp %569 : vector<8x128xf32>
    %cst_102 = arith.constant 1.000000e+00 : f32
    %571 = vector.broadcast %cst_102 : f32 to vector<8x128xf32>
    %572 = arith.addf %571, %570 : vector<8x128xf32>
    %573 = arith.divf %571, %572 : vector<8x128xf32>
    %574 = vector.extract_strided_slice %567 {offsets = [0, 128], sizes = [8, 128], strides = [1, 1]} : vector<8x512xf32> to vector<8x128xf32>
    %575 = arith.negf %574 : vector<8x128xf32>
    %576 = math.exp %575 : vector<8x128xf32>
    %cst_103 = arith.constant 1.000000e+00 : f32
    %577 = vector.broadcast %cst_103 : f32 to vector<8x128xf32>
    %578 = arith.addf %577, %576 : vector<8x128xf32>
    %579 = arith.divf %577, %578 : vector<8x128xf32>
    %580 = vector.extract_strided_slice %567 {offsets = [0, 256], sizes = [8, 128], strides = [1, 1]} : vector<8x512xf32> to vector<8x128xf32>
    %581 = math.tanh %580 : vector<8x128xf32>
    %582 = vector.extract_strided_slice %567 {offsets = [0, 384], sizes = [8, 128], strides = [1, 1]} : vector<8x512xf32> to vector<8x128xf32>
    %583 = arith.negf %582 : vector<8x128xf32>
    %584 = math.exp %583 : vector<8x128xf32>
    %cst_104 = arith.constant 1.000000e+00 : f32
    %585 = vector.broadcast %cst_104 : f32 to vector<8x128xf32>
    %586 = arith.addf %585, %584 : vector<8x128xf32>
    %587 = arith.divf %585, %586 : vector<8x128xf32>
    %588 = arith.mulf %579, %515 : vector<8x128xf32>
    %589 = arith.mulf %573, %581 : vector<8x128xf32>
    %590 = arith.addf %588, %589 : vector<8x128xf32>
    %591 = math.tanh %590 : vector<8x128xf32>
    %592 = arith.mulf %587, %591 : vector<8x128xf32>
    %593 = vector.broadcast %4 : vector<1x128xf32> to vector<8x128xf32>
    %594 = arith.mulf %592, %593 : vector<8x128xf32>
    %cst_105 = arith.constant dense<0.000000e+00> : vector<8xf32>
    %595 = vector.multi_reduction <add>, %594, %cst_105 [1] : vector<8x128xf32> to vector<8xf32>
    %596 = vector.shape_cast %595 : vector<8xf32> to vector<8x1xf32>
    %597 = vector.broadcast %5 : vector<1x1xf32> to vector<8x1xf32>
    %598 = arith.addf %596, %597 : vector<8x1xf32>
    %599 = arith.negf %598 : vector<8x1xf32>
    %600 = math.exp %599 : vector<8x1xf32>
    %cst_106 = arith.constant 1.000000e+00 : f32
    %601 = vector.broadcast %cst_106 : f32 to vector<8x1xf32>
    %602 = arith.addf %601, %600 : vector<8x1xf32>
    %603 = arith.divf %601, %602 : vector<8x1xf32>
    %604 = vector.broadcast %603 : vector<8x1xf32> to vector<8x128xf32>
    %605 = arith.mulf %604, %592 : vector<8x128xf32>
    %606 = arith.addf %531, %605 : vector<8x128xf32>
    %c8_i32 = arith.constant 8 : i32
    %c0_107 = arith.constant 0 : index
    %c0_108 = arith.constant 0 : index
    %607 = vector.load %arg1[%c0_107, %c0_108] : memref<8x128xf32, #tpu.memory_space<vmem>>, vector<8x128xf32>
    %608 = tpu.concatenate %606, %607 in 1 : vector<8x128xf32>, vector<8x128xf32> -> vector<8x256xf32>
    %c0_109 = arith.constant 0 : index
    %c0_110 = arith.constant 0 : index
    %609 = vector.load %arg8[%c0_109, %c0_110] : memref<256x256xf32, #tpu.memory_space<vmem>>, vector<256x256xf32>
    %cst_111 = arith.constant dense<0.000000e+00> : vector<8x256xf32>
    %610 = tpu.matmul %608, %609, %cst_111 {dimension_numbers = #tpu.dot_dimension_numbers<[1], [0], [0], [1], [0, 0, 1, 1], [], []>} : vector<8x256xf32>, vector<256x256xf32>, vector<8x256xf32> -> vector<8x256xf32>
    %c0_112 = arith.constant 0 : index
    %c0_113 = arith.constant 0 : index
    %611 = vector.load %arg9[%c0_112, %c0_113] : memref<1x256xf32, #tpu.memory_space<vmem>>, vector<1x256xf32>
    %612 = vector.broadcast %611 : vector<1x256xf32> to vector<8x256xf32>
    %613 = arith.addf %610, %612 : vector<8x256xf32>
    %c0_114 = arith.constant 0 : index
    %c0_115 = arith.constant 0 : index
    %614 = vector.load %arg10[%c0_114, %c0_115] : memref<256x128xf32, #tpu.memory_space<vmem>>, vector<256x128xf32>
    %cst_116 = arith.constant dense<0.000000e+00> : vector<8x128xf32>
    %615 = tpu.matmul %613, %614, %cst_116 {dimension_numbers = #tpu.dot_dimension_numbers<[1], [0], [0], [1], [0, 0, 1, 1], [], []>} : vector<8x256xf32>, vector<256x128xf32>, vector<8x128xf32> -> vector<8x128xf32>
    %616 = arith.negf %615 : vector<8x128xf32>
    %617 = math.exp %616 : vector<8x128xf32>
    %cst_117 = arith.constant 1.000000e+00 : f32
    %618 = vector.broadcast %cst_117 : f32 to vector<8x128xf32>
    %619 = arith.addf %618, %617 : vector<8x128xf32>
    %620 = arith.divf %618, %619 : vector<8x128xf32>
    %c0_118 = arith.constant 0 : index
    %c0_119 = arith.constant 0 : index
    %621 = vector.load %arg11[%c0_118, %c0_119] : memref<8x128xf32, #tpu.memory_space<vmem>>, vector<8x128xf32>
    tpu.vector_store %arg11[%c0_118, %c0_119], %620 {strides = array<i32>} : memref<8x128xf32, #tpu.memory_space<vmem>>, vector<8x128xf32>,
    return
  }
}

</mosaic_0001>

<bundles_post_ra>
// kernel: mlinknet_forward.1
= control target key start
LH: loop header
LB: loop body
LE: loop exit
PB: predicated region body
PF: predicated region fallthrough
CT: control target
= control target key end

     0   :  { %s8003_s0 = inlined_call_operand.vmem [shape: f32[8,8,128], index: 0, kind: input, shape index: {}]   ;;  %s8004_s1 = inlined_call_operand.vmem [shape: f32[8,128], index: 1, kind: input, shape index: {}]   ;;  %s8005_s2 = inlined_call_operand.hbm [shape: f32[256,512], index: 2, kind: input, shape index: {}]   ;;  %s8006_s3 = inlined_call_operand.vmem [shape: f32[1,512], index: 3, kind: input, shape index: {}]   ;;  %s8007_s4 = inlined_call_operand.hbm [shape: f32[256,512], index: 4, kind: input, shape index: {}]   ;;  %s8008_s5 = inlined_call_operand.vmem [shape: f32[1,512], index: 5, kind: input, shape index: {}]   ;;  %s8009_s6 = inlined_call_operand.hbm [shape: f32[1,128], index: 6, kind: input, shape index: {}]   ;;  %s8010_s7 = inlined_call_operand.<no memory space> [shape: f32[1,1], index: 7, kind: input, shape index: {}]   ;;  %s8011_s8 = inlined_call_operand.vmem [shape: f32[256,256], index: 8, kind: input, shape index: {}]   ;;  %s8012_s9 = inlined_call_operand.vmem [shape: f32[1,256], index: 9, kind: input, shape index: {}]   ;;  %s8013_s10 = inlined_call_operand.hbm [shape: f32[256,128], index: 10, kind: input, shape index: {}]   ;;  %s8014_s11 = inlined_call_operand.vmem [shape: f32[8,128], index: 11, kind: output, shape index: {}]  }
   0x1   :  { %v16_v0 = vstv %s8010_s7 }
   0x2   :  { %17 = vst [vmem:[#allocation2] sm:$0x1] %v16_v0 }
   0x3   :  { %18 = vsyncpa [#allocation4], 0 }
   0x4   :  { %19 = vsyncpa [#allocation6], 0 }
   0x5   :  { %20 = vsyncpa [#allocation9], 0  ;;  %s6123_s19 = smov [#allocation5]   ;;  %s6124_s21 = smov [#allocation3]  }
   0x6   :  { %s44_s20 = sshll.u32 %s6123_s19, 4  ;;  %s30_s22 = sshll.u32 %s6124_s21, 4  ;;  %s45_s20 = int_to_ptr.vmem [resolvable:$true] %s44_s20  ;;  %s6196_s22 = int_to_ptr.vmem [resolvable:$true] %s30_s22 }
   0x7   :  { %s6029_s25 = scalar_lea.hbm %s8007_s4, 16384 }
   0x8   :  { %p6030_p0 = scmp.ne.s32.totalorder %s8007_s4, %s6029_s25  ;;  %p6033_p1 = scmp.lt.u32.totalorder %s6029_s25, %s8007_s4 }
   0xa   :  { %p6035_p2 = pnand %p6033_p1, %p6030_p0 }
   0xc   :  { %6038 = shalt.err (!%p6035_p2)
}
   0xd   :  { %s6039_s29 = scalar_lea.vmem %s45_s20, 16384  ;;  %p6044_p4 = scmp.lt.s32.totalorder %s45_s20, %s45_s20 }
   0xe   :  { %p6040_p3 = scmp.ne.s32.totalorder %s45_s20, %s6039_s29  ;;  %p6045_p5 = scmp.lt.s32.totalorder %s6039_s29, %s6039_s29 }
  0x10   :  { %p6046_p6 = por %p6045_p5, %p6044_p4 }
  0x12   :  { %p6047_p7 = pnand %p6046_p6, %p6040_p3 }
  0x14   :  { %6050 = shalt.err (!%p6047_p7)
}
  0x15   :  { %s6125_s30 = smov 512   ;;  %s6126_s12 = smov 32  }
  0x16   :  { %50 = dma.hbm_to_vmem [thread:$0]  %s8007_s4, 16384, %s45_s20, [#allocation6], %s6125_s30, %s6125_s30, %s6126_s12  }
  0x17   :  { %s6051_s17 = scalar_lea.hbm %s8005_s2, 16384 }
  0x18   :  { %p6052_p8 = scmp.ne.s32.totalorder %s8005_s2, %s6051_s17  ;;  %p6055_p9 = scmp.lt.u32.totalorder %s6051_s17, %s8005_s2 }
  0x1a   :  { %p6057_p10 = pnand %p6055_p9, %p6052_p8 }
  0x1c   :  { %6060 = shalt.err (!%p6057_p10)
}
  0x1d   :  { %s6061_s24 = scalar_lea.vmem %s6196_s22, 16384  ;;  %p6066_p12 = scmp.lt.s32.totalorder %s6196_s22, %s6196_s22 }
  0x1e   :  { %p6062_p11 = scmp.ne.s32.totalorder %s6196_s22, %s6061_s24  ;;  %p6067_p13 = scmp.lt.s32.totalorder %s6061_s24, %s6061_s24 }
  0x20   :  { %p6068_p0 = por %p6067_p13, %p6066_p12 }
  0x22   :  { %p6069_p1 = pnand %p6068_p0, %p6062_p11 }
  0x24   :  { %6072 = shalt.err (!%p6069_p1)
}
  0x25   :  { %36 = dma.hbm_to_vmem [thread:$0]  %s8005_s2, 16384, %s6196_s22, [#allocation4], %s6125_s30, %s6125_s30, %s6126_s12  }
  0x26   :  { %s6127_s25 = smov [#allocation7]   ;;  %s6128_s27 = smov [#allocation8]  }
  0x27   :  { %s59_s26 = sshll.u32 %s6127_s25, 4  ;;  %s74_s7 = sshll.u32 %s6128_s27, 4  ;;  %s60_s26 = int_to_ptr.vmem [resolvable:$true] %s59_s26  ;;  %s6227_s7 = int_to_ptr.vmem [resolvable:$true] %s74_s7 }
  0x28   :  { %s6073_s13 = scalar_lea.hbm %s8009_s6, 16 }
  0x29   :  { %p6074_p2 = scmp.ne.s32.totalorder %s8009_s6, %s6073_s13  ;;  %p6077_p3 = scmp.lt.u32.totalorder %s6073_s13, %s8009_s6 }
  0x2b   :  { %p6079_p4 = pnand %p6077_p3, %p6074_p2 }
  0x2d   :  { %6082 = shalt.err (!%p6079_p4)
}
  0x2e   :  { %s6083_s2 = scalar_lea.vmem %s60_s26, 16  ;;  %s6087_s22 = scalar_lea.vmem %s60_s26, 32 }
  0x2f   :  { %p6084_p5 = scmp.ne.s32.totalorder %s60_s26, %s6083_s2  ;;  %p6088_p6 = scmp.lt.s32.totalorder %s60_s26, %s60_s26 }
  0x30   :  { %p6089_p7 = scmp.lt.s32.totalorder %s6087_s22, %s6083_s2 }
  0x32   :  { %p6090_p8 = por %p6089_p7, %p6088_p6 }
  0x34   :  { %p6091_p9 = pnand %p6090_p8, %p6084_p5 }
  0x36   :  { %6094 = shalt.err (!%p6091_p9)
}
  0x37   :  { %62 = dma.hbm_to_vmem [thread:$0]  %s8009_s6, 16, %s60_s26, [#allocation6]  }
  0x38   :  { %s6095_s21 = scalar_lea.hbm %s8013_s10, 4096 }
  0x39   :  { %p6096_p10 = scmp.ne.s32.totalorder %s8013_s10, %s6095_s21  ;;  %p6099_p11 = scmp.lt.u32.totalorder %s6095_s21, %s8013_s10 }
  0x3b   :  { %p6101_p12 = pnand %p6099_p11, %p6096_p10 }
  0x3d   :  { %6104 = shalt.err (!%p6101_p12)
}
  0x3e   :  { %s6105_s25 = scalar_lea.vmem %s6227_s7, 4096  ;;  %p6110_p0 = scmp.lt.s32.totalorder %s6227_s7, %s6227_s7 }
  0x3f   :  { %p6106_p13 = scmp.ne.s32.totalorder %s6227_s7, %s6105_s25  ;;  %p6111_p1 = scmp.lt.s32.totalorder %s6105_s25, %s6105_s25 }
  0x41   :  { %p6112_p2 = por %p6111_p1, %p6110_p0 }
  0x43   :  { %p6113_p3 = pnand %p6112_p2, %p6106_p13 }
  0x45   :  { %6116 = shalt.err (!%p6113_p3)
}
  0x46   :  { %s6129_s6 = smov 128   ;;  %s6130_s26 = smov 8  }
  0x47   :  { %80 = dma.hbm_to_vmem [thread:$0]  %s8013_s10, 4096, %s6227_s7, [#allocation9], %s6129_s6, %s6129_s6, %s6130_s26  }
  0x48   :  { %6117 = dma.done.wait [#allocation4], 16384  }
  0x49   :  { %6118 = vsyncadd [#allocation4], 4294950912 }
  0x4a   :  { %6119 = dma.done.wait [#allocation6], 16400  }
  0x4b   :  { %6120 = vsyncadd [#allocation6], 4294950896 }
  0x4c   :  { %6121 = dma.done.wait [#allocation9], 4096  }
  0x4d   :  { %6122 = vsyncadd [#allocation9], 4294963200  ;;  %v8015_v1 = vmov 0.0   ;;  %v94_v2 = vld [vmem:[#allocation3 + $0x8] sm:$0xff]  ;;  %v93_v4 = vld [vmem:[#allocation3] sm:$0xff] }
  0x4e   :  { %439 = vmatprep.mubr.f32.mxu0 %v8015_v1  ;;  %510 = vmatprep.mubr.f32.mxu1 %v8015_v1  ;;  %v98_v3 = vld [vmem:[#allocation3 + $0x28] sm:$0xff]  ;;  %v97_v6 = vld [vmem:[#allocation3 + $0x20] sm:$0xff]  ;;  %v96_v20 = vld [vmem:[#allocation3 + $0x18] sm:$0xff] }
  0x4f   :  { %v6260_v5 = vpack.c.bf16 %v98_v3, %v94_v2  ;;  %v102_v7 = vld [vmem:[#allocation3 + $0x48] sm:$0xff]  ;;  %v6262_v9 = vpack.c.bf16 %v97_v6, %v93_v4  ;;  %v101_v11 = vld [vmem:[#allocation3 + $0x40] sm:$0xff]  ;;  %v100_v21 = vld [vmem:[#allocation3 + $0x38] sm:$0xff] }
  0x50   :  { %v106_v8 = vld [vmem:[#allocation3 + $0x68] sm:$0xff]  ;;  %v105_v12 = vld [vmem:[#allocation3 + $0x60] sm:$0xff]  ;;  %v6273_v23 = vpack.c.bf16 %v100_v21, %v96_v20  ;;  %v95_v24 = vld [vmem:[#allocation3 + $0x10] sm:$0xff] }
  0x51   :  { %8228 = vst [vmem:[#allocation13_spill] sm:$0xff] %v6260_v5  ;;  %v6264_v10 = vpack.c.bf16 %v106_v8, %v102_v7  ;;  %v110_v13 = vld [vmem:[#allocation3 + $0x88] sm:$0xff]  ;;  %3580 = vmatprep.subr.bf16.mxu0 %v6260_v5  ;;  %v6268_v15 = vpack.c.bf16 %v105_v12, %v101_v11  ;;  %v109_v16 = vld [vmem:[#allocation3 + $0x80] sm:$0xff]  ;;  %v99_v25 = vld [vmem:[#allocation3 + $0x30] sm:$0xff] }
  0x52   :  { %v114_v14 = vld [vmem:[#allocation3 + $0xa8] sm:$0xff]  ;;  %3582 = vmatpush1.bf16.msra.mxu0 %v6262_v9  ;;  %v113_v17 = vld [vmem:[#allocation3 + $0xa0] sm:$0xff]  ;;  %8229 = vst [vmem:[#allocation14_spill] sm:$0xff] %v6273_v23  ;;  %v6275_v26 = vpack.c.bf16 %v99_v25, %v95_v24  ;;  %3644 = vmatprep.subr.bf16.mxu1 %v6273_v23  ;;  %v104_v28 = vld [vmem:[#allocation3 + $0x58] sm:$0xff] }
  0x53   :  { %3584 = vmatprep.subr.bf16.mxu0 %v6264_v10  ;;  %v6271_v18 = vpack.c.bf16 %v114_v14, %v110_v13  ;;  %v118_v19 = vld [vmem:[#allocation3 + $0xc8] sm:$0xff]  ;;  %v6278_v27 = vpack.c.bf16 %v113_v17, %v109_v16  ;;  %v108_v29 = vld [vmem:[#allocation3 + $0x78] sm:$0xff]  ;;  %v103_v30 = vld [vmem:[#allocation3 + $0x50] sm:$0xff] }
  0x54   :  { %v122_v22 = vld [vmem:[#allocation3 + $0xe8] sm:$0xff]  ;;  %v117_v32 = vld [vmem:[#allocation3 + $0xc0] sm:$0xff]  ;;  %3646 = vmatpush1.bf16.msra.mxu1 %v6275_v26  ;;  %v6285_v34 = vpack.c.bf16 %v108_v29, %v104_v28  ;;  %v107_v35 = vld [vmem:[#allocation3 + $0x70] sm:$0xff] }
  0x55   :  { %v6282_v31 = vpack.c.bf16 %v122_v22, %v118_v19  ;;  %v121_v33 = vld [vmem:[#allocation3 + $0xe0] sm:$0xff]  ;;  %v126_v36 = vld [vmem:[#allocation3 + $0x108] sm:$0xff]  ;;  %v6287_v38 = vpack.c.bf16 %v107_v35, %v103_v30  ;;  %v112_v39 = vld [vmem:[#allocation3 + $0x98] sm:$0xff] }
  0x56   :  { %3586 = vmatpush1.bf16.msra.mxu0 %v6268_v15  ;;  %v130_v37 = vld [vmem:[#allocation3 + $0x128] sm:$0xff]  ;;  %3648 = vmatprep.subr.bf16.mxu1 %v6285_v34  ;;  %v116_v40 = vld [vmem:[#allocation3 + $0xb8] sm:$0xff]  ;;  %v111_v41 = vld [vmem:[#allocation3 + $0x90] sm:$0xff]  ;;  %v6291_v43 = vpack.c.bf16 %v121_v33, %v117_v32 }
  0x57   :  { %3588 = vmatprep.subr.bf16.mxu0 %v6271_v18  ;;  %v115_v42 = vld [vmem:[#allocation3 + $0xb0] sm:$0xff]  ;;  %v125_v44 = vld [vmem:[#allocation3 + $0x100] sm:$0xff]  ;;  %v6293_v46 = vpack.c.bf16 %v116_v40, %v112_v39  ;;  %v6296_v47 = vpack.c.bf16 %v130_v37, %v126_v36  ;;  %v134_v48 = vld [vmem:[#allocation3 + $0x148] sm:$0xff] }
  0x58   :  { %v129_v45 = vld [vmem:[#allocation3 + $0x120] sm:$0xff]  ;;  %3650 = vmatpush1.bf16.msra.mxu1 %v6287_v38  ;;  %v6299_v49 = vpack.c.bf16 %v115_v42, %v111_v41  ;;  %v120_v50 = vld [vmem:[#allocation3 + $0xd8] sm:$0xff]  ;;  %v138_v52 = vld [vmem:[#allocation3 + $0x168] sm:$0xff] }
  0x59   :  { %v124_v51 = vld [vmem:[#allocation3 + $0xf8] sm:$0xff]  ;;  %3652 = vmatprep.subr.bf16.mxu1 %v6293_v46  ;;  %v119_v54 = vld [vmem:[#allocation3 + $0xd0] sm:$0xff]  ;;  %v6305_v56 = vpack.c.bf16 %v129_v45, %v125_v44  ;;  %v6308_v59 = vpack.c.bf16 %v138_v52, %v134_v48  ;;  %v133_v60 = vld [vmem:[#allocation3 + $0x140] sm:$0xff] }
  0x5a   :  { %3590 = vmatpush1.bf16.msra.mxu0 %v6278_v27  ;;  %v6302_v53 = vpack.c.bf16 %v124_v51, %v120_v50  ;;  %v123_v55 = vld [vmem:[#allocation3 + $0xf0] sm:$0xff]  ;;  %v128_v57 = vld [vmem:[#allocation3 + $0x118] sm:$0xff]  ;;  %v137_v61 = vld [vmem:[#allocation3 + $0x160] sm:$0xff] }
  0x5b   :  { %3592 = vmatprep.subr.bf16.mxu0 %v6282_v31  ;;  %v132_v58 = vld [vmem:[#allocation3 + $0x138] sm:$0xff]  ;;  %v142_v62 = vld [vmem:[#allocation3 + $0x188] sm:$0xff]  ;;  %v6311_v63 = vpack.c.bf16 %v123_v55, %v119_v54  ;;  %v127_v3 = vld [vmem:[#allocation3 + $0x110] sm:$0xff]  ;;  %v6317_v8 = vpack.c.bf16 %v137_v61, %v133_v60 }
  0x5c   :  { %3654 = vmatpush1.bf16.msra.mxu1 %v6299_v49  ;;  %v146_v0 = vld [vmem:[#allocation3 + $0x1a8] sm:$0xff]  ;;  %v6314_v2 = vpack.c.bf16 %v132_v58, %v128_v57  ;;  %v131_v4 = vld [vmem:[#allocation3 + $0x130] sm:$0xff]  ;;  %v136_v6 = vld [vmem:[#allocation3 + $0x158] sm:$0xff] }
  0x5d   :  { %3656 = vmatprep.subr.bf16.mxu1 %v6302_v53  ;;  %v140_v7 = vld [vmem:[#allocation3 + $0x178] sm:$0xff]  ;;  %v6320_v11 = vpack.c.bf16 %v146_v0, %v142_v62  ;;  %v141_v12 = vld [vmem:[#allocation3 + $0x180] sm:$0xff]  ;;  %v150_v14 = vld [vmem:[#allocation3 + $0x1c8] sm:$0xff]  ;;  %v6323_v16 = vpack.c.bf16 %v131_v4, %v127_v3 }
  0x5e   :  { %3594 = vmatpush1.bf16.msra.mxu0 %v6291_v43  ;;  %v145_v13 = vld [vmem:[#allocation3 + $0x1a0] sm:$0xff]  ;;  %v154_v17 = vld [vmem:[#allocation3 + $0x1e8] sm:$0xff]  ;;  %v6326_v19 = vpack.c.bf16 %v140_v7, %v136_v6  ;;  %v135_v20 = vld [vmem:[#allocation3 + $0x150] sm:$0xff] }
  0x5f   :  { %3596 = vmatprep.subr.bf16.mxu0 %v6296_v47  ;;  %v139_v21 = vld [vmem:[#allocation3 + $0x170] sm:$0xff]  ;;  %v144_v22 = vld [vmem:[#allocation3 + $0x198] sm:$0xff]  ;;  %v6329_v25 = vpack.c.bf16 %v145_v13, %v141_v12  ;;  %v6332_v28 = vpack.c.bf16 %v154_v17, %v150_v14  ;;  %v149_v29 = vld [vmem:[#allocation3 + $0x1c0] sm:$0xff] }
  0x60   :  { %3658 = vmatpush1.bf16.msra.mxu1 %v6311_v63  ;;  %v148_v24 = vld [vmem:[#allocation3 + $0x1b8] sm:$0xff]  ;;  %v153_v30 = vld [vmem:[#allocation3 + $0x1e0] sm:$0xff]  ;;  %v158_v32 = vld [vmem:[#allocation3 + $0x208] sm:$0xff]  ;;  %v6335_v33 = vpack.c.bf16 %v139_v21, %v135_v20 }
  0x61   :  { %3660 = vmatprep.subr.bf16.mxu1 %v6314_v2  ;;  %v162_v35 = vld [vmem:[#allocation3 + $0x228] sm:$0xff]  ;;  %v6338_v36 = vpack.c.bf16 %v148_v24, %v144_v22  ;;  %v143_v37 = vld [vmem:[#allocation3 + $0x190] sm:$0xff]  ;;  %v152_v40 = vld [vmem:[#allocation3 + $0x1d8] sm:$0xff]  ;;  %v6341_v42 = vpack.c.bf16 %v153_v30, %v149_v29 }
  0x62   :  { %3598 = vmatpush1.bf16.msra.mxu0 %v6305_v56  ;;  %v147_v39 = vld [vmem:[#allocation3 + $0x1b0] sm:$0xff]  ;;  %v156_v41 = vld [vmem:[#allocation3 + $0x1f8] sm:$0xff]  ;;  %v6344_v44 = vpack.c.bf16 %v162_v35, %v158_v32  ;;  %v157_v45 = vld [vmem:[#allocation3 + $0x200] sm:$0xff] }
  0x63   :  { %3600 = vmatprep.subr.bf16.mxu0 %v6308_v59  ;;  %v161_v48 = vld [vmem:[#allocation3 + $0x220] sm:$0xff]  ;;  %v166_v50 = vld [vmem:[#allocation3 + $0x248] sm:$0xff]  ;;  %v6347_v51 = vpack.c.bf16 %v147_v39, %v143_v37  ;;  %v6350_v54 = vpack.c.bf16 %v156_v41, %v152_v40  ;;  %v151_v55 = vld [vmem:[#allocation3 + $0x1d0] sm:$0xff] }
  0x64   :  { %3662 = vmatpush1.bf16.msra.mxu1 %v6323_v16  ;;  %v170_v52 = vld [vmem:[#allocation3 + $0x268] sm:$0xff]  ;;  %v155_v57 = vld [vmem:[#allocation3 + $0x1f0] sm:$0xff]  ;;  %v160_v58 = vld [vmem:[#allocation3 + $0x218] sm:$0xff]  ;;  %v6353_v61 = vpack.c.bf16 %v161_v48, %v157_v45 }
  0x65   :  { %3664 = vmatprep.subr.bf16.mxu1 %v6326_v19  ;;  %v164_v60 = vld [vmem:[#allocation3 + $0x238] sm:$0xff]  ;;  %v6356_v62 = vpack.c.bf16 %v170_v52, %v166_v50  ;;  %v165_v0 = vld [vmem:[#allocation3 + $0x240] sm:$0xff]  ;;  %v174_v4 = vld [vmem:[#allocation3 + $0x288] sm:$0xff]  ;;  %v6359_v6 = vpack.c.bf16 %v155_v57, %v151_v55 }
  0x66   :  { %3602 = vmatpush1.bf16.msra.mxu0 %v6317_v8  ;;  %v169_v3 = vld [vmem:[#allocation3 + $0x260] sm:$0xff]  ;;  %v178_v7 = vld [vmem:[#allocation3 + $0x2a8] sm:$0xff]  ;;  %v6362_v12 = vpack.c.bf16 %v164_v60, %v160_v58  ;;  %v159_v13 = vld [vmem:[#allocation3 + $0x210] sm:$0xff] }
  0x67   :  { %3604 = vmatprep.subr.bf16.mxu0 %v6320_v11  ;;  %v163_v14 = vld [vmem:[#allocation3 + $0x230] sm:$0xff]  ;;  %v168_v17 = vld [vmem:[#allocation3 + $0x258] sm:$0xff]  ;;  %v6365_v21 = vpack.c.bf16 %v169_v3, %v165_v0  ;;  %v6368_v22 = vpack.c.bf16 %v178_v7, %v174_v4  ;;  %v173_v24 = vld [vmem:[#allocation3 + $0x280] sm:$0xff] }
  0x68   :  { %3666 = vmatpush1.bf16.msra.mxu1 %v6335_v33  ;;  %v172_v20 = vld [vmem:[#allocation3 + $0x278] sm:$0xff]  ;;  %v177_v29 = vld [vmem:[#allocation3 + $0x2a0] sm:$0xff]  ;;  %v182_v30 = vld [vmem:[#allocation3 + $0x2c8] sm:$0xff]  ;;  %v6371_v32 = vpack.c.bf16 %v163_v14, %v159_v13 }
  0x69   :  { %3668 = vmatprep.subr.bf16.mxu1 %v6338_v36  ;;  %v186_v35 = vld [vmem:[#allocation3 + $0x2e8] sm:$0xff]  ;;  %v6374_v37 = vpack.c.bf16 %v172_v20, %v168_v17  ;;  %v167_v39 = vld [vmem:[#allocation3 + $0x250] sm:$0xff]  ;;  %v176_v41 = vld [vmem:[#allocation3 + $0x298] sm:$0xff]  ;;  %v6377_v48 = vpack.c.bf16 %v177_v29, %v173_v24 }
  0x6a   :  { %3606 = vmatpush1.bf16.msra.mxu0 %v6329_v25  ;;  %v171_v40 = vld [vmem:[#allocation3 + $0x270] sm:$0xff]  ;;  %v180_v45 = vld [vmem:[#allocation3 + $0x2b8] sm:$0xff]  ;;  %v6380_v50 = vpack.c.bf16 %v186_v35, %v182_v30  ;;  %v181_v52 = vld [vmem:[#allocation3 + $0x2c0] sm:$0xff] }
  0x6b   :  { %3608 = vmatprep.subr.bf16.mxu0 %v6332_v28  ;;  %8230 = vst [vmem:[#allocation15_spill] sm:$0xff] %v6377_v48  ;;  %v185_v55 = vld [vmem:[#allocation3 + $0x2e0] sm:$0xff]  ;;  %v190_v57 = vld [vmem:[#allocation3 + $0x308] sm:$0xff]  ;;  %v6383_v58 = vpack.c.bf16 %v171_v40, %v167_v39  ;;  %v6386_v0 = vpack.c.bf16 %v180_v45, %v176_v41  ;;  %v175_v3 = vld [vmem:[#allocation3 + $0x290] sm:$0xff] }
  0x6c   :  { %3670 = vmatpush1.bf16.msra.mxu1 %v6347_v51  ;;  %8231 = vst [vmem:[#allocation16_spill] sm:$0xff] %v6380_v50  ;;  %v194_v60 = vld [vmem:[#allocation3 + $0x328] sm:$0xff]  ;;  %v179_v4 = vld [vmem:[#allocation3 + $0x2b0] sm:$0xff]  ;;  %v184_v7 = vld [vmem:[#allocation3 + $0x2d8] sm:$0xff]  ;;  %v6389_v14 = vpack.c.bf16 %v185_v55, %v181_v52 }
  0x6d   :  { %3672 = vmatprep.subr.bf16.mxu1 %v6350_v54  ;;  %8232 = vst [vmem:[#allocation17_spill] sm:$0xff] %v6386_v0  ;;  %v188_v13 = vld [vmem:[#allocation3 + $0x2f8] sm:$0xff]  ;;  %v6392_v17 = vpack.c.bf16 %v194_v60, %v190_v57  ;;  %v189_v20 = vld [vmem:[#allocation3 + $0x300] sm:$0xff]  ;;  %v198_v29 = vld [vmem:[#allocation3 + $0x348] sm:$0xff]  ;;  %v6395_v30 = vpack.c.bf16 %v179_v4, %v175_v3 }
  0x6e   :  { %3610 = vmatpush1.bf16.msra.mxu0 %v6341_v42  ;;  %8233 = vst [vmem:[#allocation18_spill] sm:$0xff] %v6389_v14  ;;  %v193_v24 = vld [vmem:[#allocation3 + $0x320] sm:$0xff]  ;;  %v202_v35 = vld [vmem:[#allocation3 + $0x368] sm:$0xff]  ;;  %v6398_v39 = vpack.c.bf16 %v188_v13, %v184_v7  ;;  %v183_v40 = vld [vmem:[#allocation3 + $0x2d0] sm:$0xff] }
  0x6f   :  { %3612 = vmatprep.subr.bf16.mxu0 %v6344_v44  ;;  %8234 = vst [vmem:[#allocation19_spill] sm:$0xff] %v6392_v17  ;;  %8235 = vst [vmem:[#allocation20_spill] sm:$0xff] %v6395_v30  ;;  %v187_v41 = vld [vmem:[#allocation3 + $0x2f0] sm:$0xff]  ;;  %v192_v45 = vld [vmem:[#allocation3 + $0x318] sm:$0xff]  ;;  %v6401_v55 = vpack.c.bf16 %v193_v24, %v189_v20  ;;  %v6404_v57 = vpack.c.bf16 %v202_v35, %v198_v29 }
  0x70   :  { %3674 = vmatpush1.bf16.msra.mxu1 %v6359_v6  ;;  %8236 = vst [vmem:[#allocation21_spill] sm:$0xff] %v6398_v39  ;;  %v196_v52 = vld [vmem:[#allocation3 + $0x338] sm:$0xff]  ;;  %v197_v60 = vld [vmem:[#allocation3 + $0x340] sm:$0xff]  ;;  %v206_v4 = vld [vmem:[#allocation3 + $0x388] sm:$0xff]  ;;  %v6407_v1 = vpack.c.bf16 %v187_v41, %v183_v40 }
  0x71   :  { %3676 = vmatprep.subr.bf16.mxu1 %v6362_v12  ;;  %8237 = vst [vmem:[#allocation22_spill] sm:$0xff] %v6401_v55  ;;  %8238 = vst [vmem:[#allocation23_spill] sm:$0xff] %v6404_v57  ;;  %v201_v3 = vld [vmem:[#allocation3 + $0x360] sm:$0xff]  ;;  %v210_v7 = vld [vmem:[#allocation3 + $0x3a8] sm:$0xff]  ;;  %v6410_v13 = vpack.c.bf16 %v196_v52, %v192_v45 }
  0x72   :  { %3614 = vmatpush1.bf16.msra.mxu0 %v6353_v61  ;;  %8239 = vst [vmem:[#allocation24_spill] sm:$0xff] %v6407_v1  ;;  %v200_v20 = vld [vmem:[#allocation3 + $0x358] sm:$0xff]  ;;  %v6413_v29 = vpack.c.bf16 %v201_v3, %v197_v60  ;;  %v6416_v35 = vpack.c.bf16 %v210_v7, %v206_v4  ;;  %v209_v40 = vld [vmem:[#allocation3 + $0x3a0] sm:$0xff]  ;;  %v214_v41 = vld [vmem:[#allocation3 + $0x3c8] sm:$0xff] }
  0x73   :  { %3616 = vmatprep.subr.bf16.mxu0 %v6356_v62  ;;  %8240 = vst [vmem:[#allocation25_spill] sm:$0xff] %v6410_v13  ;;  %v204_v24 = vld [vmem:[#allocation3 + $0x378] sm:$0xff]  ;;  %v218_v45 = vld [vmem:[#allocation3 + $0x3e8] sm:$0xff] }
  0x74   :  { %3678 = vmatpush1.bf16.msra.mxu1 %v6371_v32  ;;  %8241 = vst [vmem:[#allocation26_spill] sm:$0xff] %v6413_v29  ;;  %8242 = vst [vmem:[#allocation27_spill] sm:$0xff] %v6416_v35  ;;  %v6422_v52 = vpack.c.bf16 %v204_v24, %v200_v20  ;;  %v208_v60 = vld [vmem:[#allocation3 + $0x398] sm:$0xff]  ;;  %v6428_v7 = vpack.c.bf16 %v218_v45, %v214_v41  ;;  %v207_v20 = vld [vmem:[#allocation3 + $0x390] sm:$0xff] }
  0x75   :  { %3680 = vmatprep.subr.bf16.mxu1 %v6374_v37  ;;  %v212_v3 = vld [vmem:[#allocation3 + $0x3b8] sm:$0xff] }
  0x76   :  { %3618 = vmatpush1.bf16.msra.mxu0 %v6365_v21  ;;  %8244 = vst [vmem:[#allocation29_spill] sm:$0xff] %v6422_v52  ;;  %8246 = vst [vmem:[#allocation31_spill] sm:$0xff] %v6428_v7  ;;  %v6434_v24 = vpack.c.bf16 %v212_v3, %v208_v60  ;;  %v222_v60 = vld [vmem:[#allocation5] sm:$0xff] }
  0x77   :  { %3620 = vmatprep.subr.bf16.mxu0 %v6368_v22  ;;  %v226_v3 = vld [vmem:[#allocation5 + $0x20] sm:$0xff] }
  0x78   :  { %3682 = vmatpush1.bf16.msra.mxu1 %v6383_v58  ;;  %8248 = vst [vmem:[#allocation33_spill] sm:$0xff] %v6434_v24 }
  0x79   :  { %3684 = vmatprep.subr.bf16.mxu1 %v6386_v0  ;;  %v245_v0 = vld [vmem:[#allocation5 + $0xb8] sm:$0xff] }
  0x7a   :  { %3622 = vmatpush1.bf16.msra.mxu0 %v6377_v48  ;;  %v243_v48 = vld [vmem:[#allocation5 + $0xa8] sm:$0xff] }
  0x7b   :  { %3624 = vmatprep.subr.bf16.mxu0 %v6380_v50  ;;  %v191_v50 = vld [vmem:[#allocation3 + $0x310] sm:$0xff] }
  0x7c   :  { %3686 = vmatpush1.bf16.msra.mxu1 %v6395_v30  ;;  %v199_v30 = vld [vmem:[#allocation3 + $0x350] sm:$0xff] }
  0x7d   :  { %3688 = vmatprep.subr.bf16.mxu1 %v6398_v39 }
  0x7e   :  { %3626 = vmatpush1.bf16.msra.mxu0 %v6389_v14  ;;  %v195_v14 = vld [vmem:[#allocation3 + $0x330] sm:$0xff] }
  0x7f   :  { %3628 = vmatprep.subr.bf16.mxu0 %v6392_v17  ;;  %v205_v17 = vld [vmem:[#allocation3 + $0x380] sm:$0xff]  ;;  %v6419_v39 = vpack.c.bf16 %v195_v14, %v191_v50 }
  0x80   :  { %3690 = vmatpush1.bf16.msra.mxu1 %v6407_v1  ;;  %v6425_v4 = vpack.c.bf16 %v209_v40, %v205_v17  ;;  %v217_v50 = vld [vmem:[#allocation3 + $0x3e0] sm:$0xff]  ;;  %v223_v1 = vld [vmem:[#allocation5 + $0x8] sm:$0xff]  ;;  %v216_v17 = vld [vmem:[#allocation3 + $0x3d8] sm:$0xff] }
  0x81   :  { %8243 = vst [vmem:[#allocation28_spill] sm:$0xff] %v6419_v39  ;;  %3692 = vmatprep.subr.bf16.mxu1 %v6410_v13  ;;  %v211_v13 = vld [vmem:[#allocation3 + $0x3b0] sm:$0xff]  ;;  %v220_v40 = vld [vmem:[#allocation3 + $0x3f8] sm:$0xff] }
  0x82   :  { %3630 = vmatpush1.bf16.msra.mxu0 %v6401_v55  ;;  %v203_v55 = vld [vmem:[#allocation3 + $0x370] sm:$0xff]  ;;  %8245 = vst [vmem:[#allocation30_spill] sm:$0xff] %v6425_v4 }
  0x83   :  { %3632 = vmatprep.subr.bf16.mxu0 %v6404_v57  ;;  %v213_v57 = vld [vmem:[#allocation3 + $0x3c0] sm:$0xff]  ;;  %v6431_v14 = vpack.c.bf16 %v203_v55, %v199_v30  ;;  %v6441_v30 = vpack.c.bf16 %v211_v13, %v207_v20  ;;  %v215_v55 = vld [vmem:[#allocation3 + $0x3d0] sm:$0xff]  ;;  %v6452_v20 = vpack.c.bf16 %v226_v3, %v222_v60  ;;  %v233_v60 = vld [vmem:[#allocation5 + $0x58] sm:$0xff] }
  0x84   :  { %3694 = vmatpush1.bf16.msra.mxu1 %v6419_v39  ;;  %v6437_v41 = vpack.c.bf16 %v217_v50, %v213_v57  ;;  %v231_v39 = vld [vmem:[#allocation5 + $0x48] sm:$0xff]  ;;  %v225_v57 = vld [vmem:[#allocation5 + $0x18] sm:$0xff] }
  0x85   :  { %8247 = vst [vmem:[#allocation32_spill] sm:$0xff] %v6431_v14  ;;  %3696 = vmatprep.subr.bf16.mxu1 %v6422_v52  ;;  %8250 = vst [vmem:[#allocation35_spill] sm:$0xff] %v6441_v30  ;;  %v219_v52 = vld [vmem:[#allocation3 + $0x3f0] sm:$0xff]  ;;  %v229_v50 = vld [vmem:[#allocation5 + $0x38] sm:$0xff] }
  0x86   :  { %3634 = vmatpush1.bf16.msra.mxu0 %v6413_v29  ;;  %v227_v29 = vld [vmem:[#allocation5 + $0x28] sm:$0xff]  ;;  %8249 = vst [vmem:[#allocation34_spill] sm:$0xff] %v6437_v41  ;;  %v353_v13 = vld [vmem:[%s8003_s0] sm:$0xff]  ;;  %8253 = vst [vmem:[#allocation38_spill] sm:$0xff] %v6452_v20 }
  0x87   :  { %3636 = vmatprep.subr.bf16.mxu0 %v6416_v35  ;;  %v6443_v45 = vpack.c.bf16 %v227_v29, %v223_v1  ;;  %v6446_v35 = vpack.c.bf16 %v220_v40, %v216_v17  ;;  %v6455_v1 = vpack.c.bf16 %v219_v52, %v215_v55  ;;  %v224_v29 = vld [vmem:[#allocation5 + $0x10] sm:$0xff]  ;;  %v230_v40 = vld [vmem:[#allocation5 + $0x40] sm:$0xff]  ;;  %v237_v3 = vld [vmem:[#allocation5 + $0x78] sm:$0xff]  ;;  %v8258_v55 = vmov 0.0  }
  0x88   :  { %3698 = vmatpush1.bf16.msra.mxu1 %v6431_v14  ;;  %v239_v14 = vld [vmem:[#allocation5 + $0x88] sm:$0xff] }
  0x89   :  { %8251 = vst [vmem:[#allocation36_spill] sm:$0xff] %v6443_v45  ;;  %3700 = vmatprep.subr.bf16.mxu1 %v6434_v24  ;;  %8252 = vst [vmem:[#allocation37_spill] sm:$0xff] %v6446_v35  ;;  %v228_v24 = vld [vmem:[#allocation5 + $0x30] sm:$0xff] }
  0x8a   :  { %3638 = vmatpush1.bf16.msra.mxu0 %v6425_v4  ;;  %v235_v4 = vld [vmem:[#allocation5 + $0x68] sm:$0xff]  ;;  %8254 = vst [vmem:[#allocation39_spill] sm:$0xff] %v6455_v1 }
  0x8b   :  { %3640 = vmatprep.subr.bf16.mxu0 %v6428_v7  ;;  %v6458_v17 = vpack.c.bf16 %v235_v4, %v231_v39  ;;  %v234_v7 = vld [vmem:[#allocation5 + $0x60] sm:$0xff]  ;;  %v6468_v39 = vpack.c.bf16 %v228_v24, %v224_v29  ;;  %v232_v4 = vld [vmem:[#allocation5 + $0x50] sm:$0xff] }
  0x8c   :  { %3702 = vmatpush1.bf16.msra.mxu1 %v6441_v30  ;;  %v6464_v52 = vpack.c.bf16 %v234_v7, %v230_v40  ;;  %v247_v7 = vld [vmem:[#allocation5 + $0xc8] sm:$0xff]  ;;  %v241_v30 = vld [vmem:[#allocation5 + $0x98] sm:$0xff] }
  0x8d   :  { %8255 = vst [vmem:[#allocation40_spill] sm:$0xff] %v6458_v17  ;;  %3704 = vmatprep.subr.bf16.mxu1 %v6446_v35  ;;  %8259 = vst [vmem:[#allocation43_spill] sm:$0xff] %v6468_v39  ;;  %v6474_v35 = vpack.c.bf16 %v237_v3, %v233_v60  ;;  %v251_v40 = vld [vmem:[#allocation5 + $0xe8] sm:$0xff]  ;;  %v246_v60 = vld [vmem:[#allocation5 + $0xc0] sm:$0xff] }
  0x8e   :  { %3642 = vmatpush1.bf16.msra.mxu0 %v6437_v41  ;;  %v6461_v41 = vpack.c.bf16 %v229_v50, %v225_v57  ;;  %8257 = vst [vmem:[#allocation42_spill] sm:$0xff] %v6464_v52  ;;  %v6471_v57 = vpack.c.bf16 %v243_v48, %v239_v14  ;;  %v238_v50 = vld [vmem:[#allocation5 + $0x80] sm:$0xff]  ;;  %v240_v14 = vld [vmem:[#allocation5 + $0x90] sm:$0xff]  ;;  %v6483_v29 = vpack.c.bf16 %v251_v40, %v247_v7 }
  0x8f   :  { %3708 = vmatprep.subr.bf16.mxu0 %v6443_v45  ;;  %v242_v45 = vld [vmem:[#allocation5 + $0xa0] sm:$0xff]  ;;  %8261 = vst [vmem:[#allocation45_spill] sm:$0xff] %v6474_v35 }
  0x90   :  { %8256 = vst [vmem:[#allocation41_spill] sm:$0xff] %v6461_v41  ;;  %3706 = vmatpush1.bf16.msra.mxu1 %v6455_v1  ;;  %8260 = vst [vmem:[#allocation44_spill] sm:$0xff] %v6471_v57  ;;  %v6477_v24 = vpack.c.bf16 %v242_v45, %v238_v50  ;;  %v250_v3 = vld [vmem:[#allocation5 + $0xe0] sm:$0xff]  ;;  %v249_v45 = vld [vmem:[#allocation5 + $0xd8] sm:$0xff] }
  0x91   :  { %440 = vmatmul.mubr.f32.vlgmr.msra.gmra.mrb[0].mxu0 %v353_v13  ;;  %3772 = vmatprep.subr.bf16.mxu1 %v6461_v41  ;;  %8264 = vst [vmem:[#allocation48_spill] sm:$0xff] %v6483_v29  ;;  %v255_v41 = vld [vmem:[#allocation5 + $0x108] sm:$0xff]  ;;  %v253_v50 = vld [vmem:[#allocation5 + $0xf8] sm:$0xff] }
  0x92   :  { %3710 = vmatpush1.bf16.msra.mxu0 %v6452_v20  ;;  %626 = vmatprep.mubr.f32.mxu0 %v8258_v55  ;;  %v236_v20 = vld [vmem:[#allocation5 + $0x70] sm:$0xff]  ;;  %8262 = vst [vmem:[#allocation46_spill] sm:$0xff] %v6477_v24  ;;  %v6499_v40 = vpack.c.bf16 %v253_v50, %v249_v45  ;;  %v263_v45 = vld [vmem:[#allocation5 + $0x148] sm:$0xff] }
  0x93   :  { %3712 = vmatprep.subr.bf16.mxu0 %v6458_v17  ;;  %511 = vmatmul.mubr.f32.vlgmr.msra.gmra.mrb[0].mxu1 %v353_v13  ;;  %v6480_v48 = vpack.c.bf16 %v236_v20, %v232_v4  ;;  %v6486_v17 = vpack.c.bf16 %v245_v0, %v241_v30  ;;  %v244_v13 = vld [vmem:[#allocation5 + $0xb0] sm:$0xff]  ;;  %v6490_v20 = vpack.c.bf16 %v250_v3, %v246_v60  ;;  %v254_v0 = vld [vmem:[#allocation5 + $0x100] sm:$0xff]  ;;  %v267_v50 = vld [vmem:[#allocation5 + $0x168] sm:$0xff] }
  0x94   :  { %3774 = vmatpush1.bf16.msra.mxu1 %v6468_v39  ;;  %697 = vmatprep.mubr.f32.mxu1 %v8258_v55  ;;  %v6493_v4 = vpack.c.bf16 %v244_v13, %v240_v14  ;;  %v258_v30 = vld [vmem:[#allocation5 + $0x120] sm:$0xff]  ;;  %8269 = vst [vmem:[#allocation53_spill] sm:$0xff] %v6499_v40  ;;  %v248_v55 = vld [vmem:[#allocation5 + $0xd0] sm:$0xff] }
  0x95   :  { %8263 = vst [vmem:[#allocation47_spill] sm:$0xff] %v6480_v48  ;;  %3776 = vmatprep.subr.bf16.mxu1 %v6474_v35  ;;  %8265 = vst [vmem:[#allocation49_spill] sm:$0xff] %v6486_v17  ;;  %v257_v35 = vld [vmem:[#allocation5 + $0x118] sm:$0xff]  ;;  %v6502_v60 = vpack.c.bf16 %v258_v30, %v254_v0  ;;  %v260_v3 = vld [vmem:[#allocation5 + $0x130] sm:$0xff] }
  0x96   :  { %3714 = vmatpush1.bf16.msra.mxu0 %v6464_v52  ;;  %v259_v52 = vld [vmem:[#allocation5 + $0x128] sm:$0xff]  ;;  %8266 = vst [vmem:[#allocation50_spill] sm:$0xff] %v6490_v20  ;;  %8267 = vst [vmem:[#allocation51_spill] sm:$0xff] %v6493_v4  ;;  %v262_v0 = vld [vmem:[#allocation5 + $0x140] sm:$0xff] }
  0x97   :  { %3716 = vmatprep.subr.bf16.mxu0 %v6471_v57  ;;  %v6496_v7 = vpack.c.bf16 %v259_v52, %v255_v41  ;;  %v252_v57 = vld [vmem:[#allocation5 + $0xf0] sm:$0xff]  ;;  %8270 = vst [vmem:[#allocation54_spill] sm:$0xff] %v6502_v60  ;;  %v266_v30 = vld [vmem:[#allocation5 + $0x160] sm:$0xff] }
  0x98   :  { %3778 = vmatpush1.bf16.msra.mxu1 %v6480_v48  ;;  %v6505_v14 = vpack.c.bf16 %v252_v57, %v248_v55  ;;  %v256_v52 = vld [vmem:[#allocation5 + $0x110] sm:$0xff]  ;;  %v6517_v57 = vpack.c.bf16 %v267_v50, %v263_v45  ;;  %v269_v55 = vld [vmem:[#allocation5 + $0x178] sm:$0xff]  ;;  %v270_v50 = vld [vmem:[#allocation5 + $0x180] sm:$0xff] }
  0x99   :  { %8268 = vst [vmem:[#allocation52_spill] sm:$0xff] %v6496_v7  ;;  %3780 = vmatprep.subr.bf16.mxu1 %v6486_v17  ;;  %v6514_v13 = vpack.c.bf16 %v260_v3, %v256_v52  ;;  %v271_v3 = vld [vmem:[#allocation5 + $0x188] sm:$0xff] }
  0x9a   :  { %3718 = vmatpush1.bf16.msra.mxu0 %v6477_v24  ;;  %v261_v24 = vld [vmem:[#allocation5 + $0x138] sm:$0xff]  ;;  %8271 = vst [vmem:[#allocation55_spill] sm:$0xff] %v6505_v14  ;;  %8274 = vst [vmem:[#allocation58_spill] sm:$0xff] %v6517_v57 }
  0x9b   :  { %3720 = vmatprep.subr.bf16.mxu0 %v6483_v29  ;;  %v6509_v41 = vpack.c.bf16 %v261_v24, %v257_v35  ;;  %8273 = vst [vmem:[#allocation57_spill] sm:$0xff] %v6514_v13  ;;  %v265_v35 = vld [vmem:[#allocation5 + $0x158] sm:$0xff]  ;;  %v6519_v24 = vpack.c.bf16 %v266_v30, %v262_v0  ;;  %v274_v0 = vld [vmem:[#allocation5 + $0x1a0] sm:$0xff] }
  0x9c   :  { %3782 = vmatpush1.bf16.msra.mxu1 %v6493_v4  ;;  %v273_v30 = vld [vmem:[#allocation5 + $0x198] sm:$0xff] }
  0x9d   :  { %3784 = vmatprep.subr.bf16.mxu1 %v6499_v40  ;;  %8272 = vst [vmem:[#allocation56_spill] sm:$0xff] %v6509_v41  ;;  %8275 = vst [vmem:[#allocation59_spill] sm:$0xff] %v6519_v24 }
  0x9e   :  { %3722 = vmatpush1.bf16.msra.mxu0 %v6490_v20  ;;  %v338_v20 = vld [vmem:[#allocation5 + $0x3a0] sm:$0xff] }
  0x9f   :  { %3724 = vmatprep.subr.bf16.mxu0 %v6496_v7  ;;  %v6531_v7 = vpack.c.bf16 %v274_v0, %v270_v50  ;;  %v282_v50 = vld [vmem:[#allocation5 + $0x1e0] sm:$0xff]  ;;  %v281_v0 = vld [vmem:[#allocation5 + $0x1d8] sm:$0xff] }
  0xa0   :  { %3786 = vmatpush1.bf16.msra.mxu1 %v6505_v14  ;;  %v268_v14 = vld [vmem:[#allocation5 + $0x170] sm:$0xff] }
  0xa1   :  { %3788 = vmatprep.subr.bf16.mxu1 %v6509_v41  ;;  %v6522_v41 = vpack.c.bf16 %v269_v55, %v265_v35  ;;  %8279 = vst [vmem:[#allocation63_spill] sm:$0xff] %v6531_v7  ;;  %v272_v35 = vld [vmem:[#allocation5 + $0x190] sm:$0xff] }
  0xa2   :  { %3726 = vmatpush1.bf16.msra.mxu0 %v6502_v60  ;;  %v264_v60 = vld [vmem:[#allocation5 + $0x150] sm:$0xff] }
  0xa3   :  { %3728 = vmatprep.subr.bf16.mxu0 %v6517_v57  ;;  %8276 = vst [vmem:[#allocation60_spill] sm:$0xff] %v6522_v41  ;;  %v6524_v52 = vpack.c.bf16 %v268_v14, %v264_v60  ;;  %v277_v57 = vld [vmem:[#allocation5 + $0x1b8] sm:$0xff]  ;;  %v276_v55 = vld [vmem:[#allocation5 + $0x1b0] sm:$0xff] }
  0xa4   :  { %3790 = vmatpush1.bf16.msra.mxu1 %v6514_v13  ;;  %v275_v13 = vld [vmem:[#allocation5 + $0x1a8] sm:$0xff]  ;;  %v6534_v60 = vpack.c.bf16 %v277_v57, %v273_v30  ;;  %v6536_v14 = vpack.c.bf16 %v276_v55, %v272_v35  ;;  %v280_v57 = vld [vmem:[#allocation5 + $0x1d0] sm:$0xff] }
  0xa5   :  { %8277 = vst [vmem:[#allocation61_spill] sm:$0xff] %v6524_v52  ;;  %3792 = vmatprep.subr.bf16.mxu1 %v6522_v41  ;;  %v6528_v45 = vpack.c.bf16 %v275_v13, %v271_v3  ;;  %v279_v13 = vld [vmem:[#allocation5 + $0x1c8] sm:$0xff]  ;;  %v284_v30 = vld [vmem:[#allocation5 + $0x1f0] sm:$0xff] }
  0xa6   :  { %3730 = vmatpush1.bf16.msra.mxu0 %v6519_v24  ;;  %8280 = vst [vmem:[#allocation64_spill] sm:$0xff] %v6534_v60  ;;  %8281 = vst [vmem:[#allocation65_spill] sm:$0xff] %v6536_v14  ;;  %v283_v3 = vld [vmem:[#allocation5 + $0x1e8] sm:$0xff]  ;;  %v6548_v55 = vpack.c.bf16 %v284_v30, %v280_v57 }
  0xa7   :  { %8278 = vst [vmem:[#allocation62_spill] sm:$0xff] %v6528_v45  ;;  %3732 = vmatprep.subr.bf16.mxu0 %v6528_v45  ;;  %v6540_v24 = vpack.c.bf16 %v283_v3, %v279_v13  ;;  %v285_v45 = vld [vmem:[#allocation5 + $0x1f8] sm:$0xff]  ;;  %v287_v13 = vld [vmem:[#allocation5 + $0x208] sm:$0xff] }
  0xa8   :  { %3794 = vmatpush1.bf16.msra.mxu1 %v6524_v52  ;;  %v278_v52 = vld [vmem:[#allocation5 + $0x1c0] sm:$0xff]  ;;  %v6546_v35 = vpack.c.bf16 %v285_v45, %v281_v0  ;;  %8285 = vst [vmem:[#allocation69_spill] sm:$0xff] %v6548_v55  ;;  %v291_v3 = vld [vmem:[#allocation5 + $0x228] sm:$0xff]  ;;  %v288_v45 = vld [vmem:[#allocation5 + $0x210] sm:$0xff] }
  0xa9   :  { %3796 = vmatprep.subr.bf16.mxu1 %v6534_v60  ;;  %8282 = vst [vmem:[#allocation66_spill] sm:$0xff] %v6540_v24  ;;  %v6543_v41 = vpack.c.bf16 %v282_v50, %v278_v52  ;;  %v290_v52 = vld [vmem:[#allocation5 + $0x220] sm:$0xff]  ;;  %v289_v50 = vld [vmem:[#allocation5 + $0x218] sm:$0xff]  ;;  %v292_v0 = vld [vmem:[#allocation5 + $0x230] sm:$0xff] }
  0xaa   :  { %3734 = vmatpush1.bf16.msra.mxu0 %v6531_v7  ;;  %8284 = vst [vmem:[#allocation68_spill] sm:$0xff] %v6546_v35  ;;  %v6552_v7 = vpack.c.bf16 %v291_v3, %v287_v13  ;;  %v6560_v30 = vpack.c.bf16 %v292_v0, %v288_v45  ;;  %v295_v13 = vld [vmem:[#allocation5 + $0x248] sm:$0xff] }
  0xab   :  { %8283 = vst [vmem:[#allocation67_spill] sm:$0xff] %v6543_v41  ;;  %3736 = vmatprep.subr.bf16.mxu0 %v6540_v24  ;;  %v293_v24 = vld [vmem:[#allocation5 + $0x238] sm:$0xff]  ;;  %v299_v3 = vld [vmem:[#allocation5 + $0x268] sm:$0xff] }
  0xac   :  { %3798 = vmatpush1.bf16.msra.mxu1 %v6536_v14  ;;  %8286 = vst [vmem:[#allocation70_spill] sm:$0xff] %v6552_v7  ;;  %v286_v14 = vld [vmem:[#allocation5 + $0x200] sm:$0xff]  ;;  %v6558_v57 = vpack.c.bf16 %v293_v24, %v289_v50  ;;  %8289 = vst [vmem:[#allocation73_spill] sm:$0xff] %v6560_v30  ;;  %v296_v24 = vld [vmem:[#allocation5 + $0x250] sm:$0xff] }
  0xad   :  { %3800 = vmatprep.subr.bf16.mxu1 %v6546_v35  ;;  %v6555_v60 = vpack.c.bf16 %v290_v52, %v286_v14  ;;  %v298_v14 = vld [vmem:[#allocation5 + $0x260] sm:$0xff]  ;;  %v297_v52 = vld [vmem:[#allocation5 + $0x258] sm:$0xff]  ;;  %v300_v50 = vld [vmem:[#allocation5 + $0x270] sm:$0xff] }
  0xae   :  { %3738 = vmatpush1.bf16.msra.mxu0 %v6543_v41  ;;  %8288 = vst [vmem:[#allocation72_spill] sm:$0xff] %v6558_v57  ;;  %v6564_v41 = vpack.c.bf16 %v299_v3, %v295_v13  ;;  %v6572_v0 = vpack.c.bf16 %v300_v50, %v296_v24  ;;  %v303_v13 = vld [vmem:[#allocation5 + $0x288] sm:$0xff] }
  0xaf   :  { %8287 = vst [vmem:[#allocation71_spill] sm:$0xff] %v6555_v60  ;;  %3740 = vmatprep.subr.bf16.mxu0 %v6552_v7  ;;  %v301_v7 = vld [vmem:[#allocation5 + $0x278] sm:$0xff]  ;;  %v307_v3 = vld [vmem:[#allocation5 + $0x2a8] sm:$0xff] }
  0xb0   :  { %3802 = vmatpush1.bf16.msra.mxu1 %v6548_v55  ;;  %8290 = vst [vmem:[#allocation74_spill] sm:$0xff] %v6564_v41  ;;  %v294_v55 = vld [vmem:[#allocation5 + $0x240] sm:$0xff]  ;;  %v6570_v45 = vpack.c.bf16 %v301_v7, %v297_v52  ;;  %8293 = vst [vmem:[#allocation77_spill] sm:$0xff] %v6572_v0  ;;  %v304_v7 = vld [vmem:[#allocation5 + $0x290] sm:$0xff] }
  0xb1   :  { %3804 = vmatprep.subr.bf16.mxu1 %v6558_v57  ;;  %v6567_v35 = vpack.c.bf16 %v298_v14, %v294_v55  ;;  %v306_v55 = vld [vmem:[#allocation5 + $0x2a0] sm:$0xff]  ;;  %v305_v14 = vld [vmem:[#allocation5 + $0x298] sm:$0xff]  ;;  %v308_v52 = vld [vmem:[#allocation5 + $0x2b0] sm:$0xff] }
  0xb2   :  { %3742 = vmatpush1.bf16.msra.mxu0 %v6555_v60  ;;  %8292 = vst [vmem:[#allocation76_spill] sm:$0xff] %v6570_v45  ;;  %v6576_v60 = vpack.c.bf16 %v307_v3, %v303_v13  ;;  %v6584_v50 = vpack.c.bf16 %v308_v52, %v304_v7  ;;  %v311_v13 = vld [vmem:[#allocation5 + $0x2c8] sm:$0xff] }
  0xb3   :  { %8291 = vst [vmem:[#allocation75_spill] sm:$0xff] %v6567_v35  ;;  %3744 = vmatprep.subr.bf16.mxu0 %v6564_v41  ;;  %v309_v41 = vld [vmem:[#allocation5 + $0x2b8] sm:$0xff]  ;;  %v315_v3 = vld [vmem:[#allocation5 + $0x2e8] sm:$0xff] }
  0xb4   :  { %3806 = vmatpush1.bf16.msra.mxu1 %v6560_v30  ;;  %8294 = vst [vmem:[#allocation78_spill] sm:$0xff] %v6576_v60  ;;  %v302_v30 = vld [vmem:[#allocation5 + $0x280] sm:$0xff]  ;;  %v6582_v24 = vpack.c.bf16 %v309_v41, %v305_v14  ;;  %8297 = vst [vmem:[#allocation81_spill] sm:$0xff] %v6584_v50  ;;  %v312_v41 = vld [vmem:[#allocation5 + $0x2d0] sm:$0xff] }
  0xb5   :  { %3808 = vmatprep.subr.bf16.mxu1 %v6570_v45  ;;  %v6579_v57 = vpack.c.bf16 %v306_v55, %v302_v30  ;;  %v314_v30 = vld [vmem:[#allocation5 + $0x2e0] sm:$0xff]  ;;  %v313_v55 = vld [vmem:[#allocation5 + $0x2d8] sm:$0xff]  ;;  %v316_v14 = vld [vmem:[#allocation5 + $0x2f0] sm:$0xff] }
  0xb6   :  { %3746 = vmatpush1.bf16.msra.mxu0 %v6567_v35  ;;  %8296 = vst [vmem:[#allocation80_spill] sm:$0xff] %v6582_v24  ;;  %v6588_v35 = vpack.c.bf16 %v315_v3, %v311_v13  ;;  %v6596_v52 = vpack.c.bf16 %v316_v14, %v312_v41  ;;  %v319_v13 = vld [vmem:[#allocation5 + $0x308] sm:$0xff] }
  0xb7   :  { %8295 = vst [vmem:[#allocation79_spill] sm:$0xff] %v6579_v57  ;;  %3748 = vmatprep.subr.bf16.mxu0 %v6576_v60  ;;  %v317_v60 = vld [vmem:[#allocation5 + $0x2f8] sm:$0xff]  ;;  %v323_v3 = vld [vmem:[#allocation5 + $0x328] sm:$0xff] }
  0xb8   :  { %3810 = vmatpush1.bf16.msra.mxu1 %v6572_v0  ;;  %8298 = vst [vmem:[#allocation82_spill] sm:$0xff] %v6588_v35  ;;  %v310_v0 = vld [vmem:[#allocation5 + $0x2c0] sm:$0xff]  ;;  %v6594_v7 = vpack.c.bf16 %v317_v60, %v313_v55  ;;  %8301 = vst [vmem:[#allocation85_spill] sm:$0xff] %v6596_v52  ;;  %v320_v60 = vld [vmem:[#allocation5 + $0x310] sm:$0xff] }
  0xb9   :  { %3812 = vmatprep.subr.bf16.mxu1 %v6582_v24  ;;  %v6591_v45 = vpack.c.bf16 %v314_v30, %v310_v0  ;;  %v322_v0 = vld [vmem:[#allocation5 + $0x320] sm:$0xff]  ;;  %v321_v30 = vld [vmem:[#allocation5 + $0x318] sm:$0xff]  ;;  %v324_v55 = vld [vmem:[#allocation5 + $0x330] sm:$0xff] }
  0xba   :  { %3750 = vmatpush1.bf16.msra.mxu0 %v6579_v57  ;;  %8300 = vst [vmem:[#allocation84_spill] sm:$0xff] %v6594_v7  ;;  %v6600_v57 = vpack.c.bf16 %v323_v3, %v319_v13  ;;  %v6608_v14 = vpack.c.bf16 %v324_v55, %v320_v60  ;;  %v327_v13 = vld [vmem:[#allocation5 + $0x348] sm:$0xff] }
  0xbb   :  { %8299 = vst [vmem:[#allocation83_spill] sm:$0xff] %v6591_v45  ;;  %3752 = vmatprep.subr.bf16.mxu0 %v6588_v35  ;;  %v325_v35 = vld [vmem:[#allocation5 + $0x338] sm:$0xff]  ;;  %v331_v3 = vld [vmem:[#allocation5 + $0x368] sm:$0xff] }
  0xbc   :  { %3814 = vmatpush1.bf16.msra.mxu1 %v6584_v50  ;;  %8302 = vst [vmem:[#allocation86_spill] sm:$0xff] %v6600_v57  ;;  %v318_v50 = vld [vmem:[#allocation5 + $0x300] sm:$0xff]  ;;  %v6606_v41 = vpack.c.bf16 %v325_v35, %v321_v30  ;;  %8305 = vst [vmem:[#allocation89_spill] sm:$0xff] %v6608_v14  ;;  %v328_v35 = vld [vmem:[#allocation5 + $0x350] sm:$0xff] }
  0xbd   :  { %3816 = vmatprep.subr.bf16.mxu1 %v6594_v7  ;;  %v6603_v24 = vpack.c.bf16 %v322_v0, %v318_v50  ;;  %v330_v50 = vld [vmem:[#allocation5 + $0x360] sm:$0xff]  ;;  %v329_v0 = vld [vmem:[#allocation5 + $0x358] sm:$0xff]  ;;  %v332_v30 = vld [vmem:[#allocation5 + $0x370] sm:$0xff] }
  0xbe   :  { %3754 = vmatpush1.bf16.msra.mxu0 %v6591_v45  ;;  %8304 = vst [vmem:[#allocation88_spill] sm:$0xff] %v6606_v41  ;;  %v6612_v45 = vpack.c.bf16 %v331_v3, %v327_v13  ;;  %v6620_v55 = vpack.c.bf16 %v332_v30, %v328_v35  ;;  %v334_v13 = vld [vmem:[#allocation5 + $0x380] sm:$0xff]  ;;  %v343_v35 = vld [vmem:[#allocation5 + $0x3c8] sm:$0xff] }
  0xbf   :  { %8303 = vst [vmem:[#allocation87_spill] sm:$0xff] %v6603_v24  ;;  %3756 = vmatprep.subr.bf16.mxu0 %v6600_v57  ;;  %v333_v57 = vld [vmem:[#allocation5 + $0x378] sm:$0xff] }
  0xc0   :  { %3818 = vmatpush1.bf16.msra.mxu1 %v6596_v52  ;;  %8306 = vst [vmem:[#allocation90_spill] sm:$0xff] %v6612_v45  ;;  %v326_v52 = vld [vmem:[#allocation5 + $0x340] sm:$0xff]  ;;  %v6618_v60 = vpack.c.bf16 %v333_v57, %v329_v0  ;;  %8309 = vst [vmem:[#allocation93_spill] sm:$0xff] %v6620_v55  ;;  %v336_v57 = vld [vmem:[#allocation5 + $0x390] sm:$0xff] }
  0xc1   :  { %3820 = vmatprep.subr.bf16.mxu1 %v6606_v41  ;;  %v6615_v7 = vpack.c.bf16 %v330_v50, %v326_v52  ;;  %v339_v41 = vld [vmem:[#allocation5 + $0x3a8] sm:$0xff]  ;;  %v341_v52 = vld [vmem:[#allocation5 + $0x3b8] sm:$0xff]  ;;  %v6626_v50 = vpack.c.bf16 %v338_v20, %v334_v13  ;;  %v340_v0 = vld [vmem:[#allocation5 + $0x3b0] sm:$0xff] }
  0xc2   :  { %3758 = vmatpush1.bf16.msra.mxu0 %v6603_v24  ;;  %8308 = vst [vmem:[#allocation92_spill] sm:$0xff] %v6618_v60  ;;  %v335_v24 = vld [vmem:[#allocation5 + $0x388] sm:$0xff]  ;;  %v6632_v30 = vpack.c.bf16 %v340_v0, %v336_v57  ;;  %v345_v20 = vld [vmem:[#allocation5 + $0x3d8] sm:$0xff] }
  0xc3   :  { %8307 = vst [vmem:[#allocation91_spill] sm:$0xff] %v6615_v7  ;;  %3760 = vmatprep.subr.bf16.mxu0 %v6612_v45  ;;  %v6623_v3 = vpack.c.bf16 %v339_v41, %v335_v24  ;;  %8311 = vst [vmem:[#allocation95_spill] sm:$0xff] %v6626_v50  ;;  %v347_v24 = vld [vmem:[#allocation5 + $0x3e8] sm:$0xff]  ;;  %v342_v41 = vld [vmem:[#allocation5 + $0x3c0] sm:$0xff] }
  0xc4   :  { %3822 = vmatpush1.bf16.msra.mxu1 %v6608_v14  ;;  %v337_v14 = vld [vmem:[#allocation5 + $0x398] sm:$0xff]  ;;  %8313 = vst [vmem:[#allocation97_spill] sm:$0xff] %v6632_v30  ;;  %v6635_v45 = vpack.c.bf16 %v347_v24, %v343_v35 }
  0xc5   :  { %8310 = vst [vmem:[#allocation94_spill] sm:$0xff] %v6623_v3  ;;  %3824 = vmatprep.subr.bf16.mxu1 %v6618_v60  ;;  %v6628_v40 = vpack.c.bf16 %v341_v52, %v337_v14  ;;  %v349_v13 = vld [vmem:[#allocation5 + $0x3f8] sm:$0xff]  ;;  %v344_v14 = vld [vmem:[#allocation5 + $0x3d0] sm:$0xff] }
  0xc6   :  { %3762 = vmatpush1.bf16.msra.mxu0 %v6615_v7  ;;  %v346_v7 = vld [vmem:[#allocation5 + $0x3e0] sm:$0xff]  ;;  %8314 = vst [vmem:[#allocation98_spill] sm:$0xff] %v6635_v45  ;;  %v6640_v60 = vpack.c.bf16 %v349_v13, %v345_v20 }
  0xc7   :  { %8312 = vst [vmem:[#allocation96_spill] sm:$0xff] %v6628_v40  ;;  %3764 = vmatprep.subr.bf16.mxu0 %v6623_v3  ;;  %v6638_v52 = vpack.c.bf16 %v346_v7, %v342_v41  ;;  %v355_v7 = vlaneseq }
  0xc8   :  { %3826 = vmatpush1.bf16.msra.mxu1 %v6620_v55  ;;  %8316 = vst [vmem:[#allocation100_spill] sm:$0xff] %v6640_v60  ;;  %v348_v55 = vld [vmem:[#allocation5 + $0x3f0] sm:$0xff] }
  0xc9   :  { %3828 = vmatprep.subr.bf16.mxu1 %v6628_v40  ;;  %8315 = vst [vmem:[#allocation99_spill] sm:$0xff] %v6638_v52  ;;  %v6644_v57 = vpack.c.bf16 %v348_v55, %v344_v14  ;;  %v6651_v0 = vshrl.u32 %v355_v7, 7  ;;  %v221_v55 = vld [vmem:[%s8006_s3] sm:$0xf] }
  0xca   :  { %3766 = vmatpush1.bf16.msra.mxu0 %v6626_v50 }
  0xcb   :  { %3768 = vmatprep.subr.bf16.mxu0 %v6635_v45  ;;  %8317 = vst [vmem:[#allocation101_spill] sm:$0xff] %v6644_v57  ;;  %8318 = vst [vmem:[#allocation102_spill] sm:$0xff] %v6651_v0  ;;  %v6654_v35 = vsub.s32 0, %v6651_v0  ;;  %v6660_v24 = vsub.s32 1, %v6651_v0  ;;  %v8183_v13 = vsub.s32 3, %v6651_v0 }
  0xcc   :  { %3830 = vmatpush1.bf16.msra.mxu1 %v6632_v30 }
  0xcd   :  { %3832 = vmatprep.subr.bf16.mxu1 %v6640_v60  ;;  %8319 = vst [vmem:[#allocation103_spill] sm:$0xff] %v6654_v35  ;;  %8320 = vst [vmem:[#allocation104_spill] sm:$0xff] %v6660_v24  ;;  %v6663_v41 = vrot.slane %v221_v55, %v6654_v35  ;;  %v6666_v20 = vrot.slane %v221_v55, %v6660_v24  ;;  %v8194_v35 = vsub.s32 2, %v6651_v0 }
  0xce   :  { %3770 = vmatpush1.bf16.msra.mxu0 %v6638_v52  ;;  %v6673_v52 = vrot.slane %v221_v55, %v8183_v13 }
  0xcf   :  { %3836 = vmatprep.subr.bf16.mxu0 %v6260_v5  ;;  %8321 = vst [vmem:[#allocation105_spill] sm:$0xff] %v6663_v41  ;;  %8322 = vst [vmem:[#allocation106_spill] sm:$0xff] %v6666_v20 }
  0xd0   :  { %3834 = vmatpush1.bf16.msra.mxu1 %v6644_v57  ;;  %8323 = vst [vmem:[#allocation107_spill] sm:$0xff] %v6673_v52 }
  0xd1   :  { %3900 = vmatprep.subr.bf16.mxu1 %v6273_v23 }
 0x164   :  { %v441_v14 = vpop.f32.mrb[0].mxu0 }
 0x165   :  { %v442_v7 = vadd.f32 %v441_v14, %v6663_v41  ;;  %v443_v23 = vpop.f32.mrb[1].mxu0  ;;  %v6679_v14 = vrot.slane %v221_v55, %v8194_v35  ;;  %v8339_v35 = vld [vmem:[#allocation32_spill] sm:$0xff] }
 0x166   :  { %v444_v57 = vadd.f32 %v443_v23, %v6666_v20  ;;  %v512_v30 = vpop.f32.mrb[0].mxu1 }
 0x167   :  { %v3478_v5 = vmul.f32 -1.442695, %v442_v7  ;;  %v514_v24 = vpop.f32.mrb[1].mxu1  ;;  %v513_v23 = vadd.f32 %v512_v30, %v6679_v14 }
 0x168   :  { %v3479_v60 = vmul.f32 -1.442695, %v444_v57  ;;  %v515_v45 = vadd.f32 %v514_v24, %v6673_v52 }
 0x169   :  { %5735 = vpow2.f32 %v3478_v5 }
 0x16a   :  { %5737 = vpow2.f32 %v3479_v60  ;;  %v3480_v41 = vmul.f32 -1.442695, %v515_v45 }
 0x16c   :  { %5739 = vpow2.f32 %v3480_v41 }
 0x16d   :  { %5741 = vtanh.f32 %v513_v23  ;;  %v8330_v23 = vld [vmem:[#allocation19_spill] sm:$0xff] }
 0x173   :  { %v5736_v7 = vpop.eup %5735 }
 0x174   :  { %v5738_v13 = vpop.eup %5737  ;;  %v520_v20 = vadd.f32 1.0, %v5736_v7  ;;  %v8331_v7 = vld [vmem:[#allocation24_spill] sm:$0xff] }
 0x175   :  { %v526_v57 = vadd.f32 1.0, %v5738_v13  ;;  %v8329_v13 = vld [vmem:[#allocation18_spill] sm:$0xff] }
 0x176   :  { %5743 = vrcp.f32 %v520_v20  ;;  %v5740_v5 = vpop.eup %5739  ;;  %v8328_v20 = vld [vmem:[#allocation21_spill] sm:$0xff] }
 0x177   :  { %5745 = vrcp.f32 %v526_v57  ;;  %v5742_v60 = vpop.eup %5741  ;;  %v533_v40 = vadd.f32 1.0, %v5740_v5  ;;  %v8332_v57 = vld [vmem:[#allocation25_spill] sm:$0xff]  ;;  %v8333_v5 = vld [vmem:[#allocation22_spill] sm:$0xff] }
 0x179   :  { %5747 = vrcp.f32 %v533_v40  ;;  %v8324_v40 = vld [vmem:[#allocation17_spill] sm:$0xff] }
 0x180   :  { %v5744_v50 = vpop.eup %5743 }
 0x181   :  { %v5746_v24 = vpop.eup %5745  ;;  %v537_v52 = vmul.f32 %v5744_v50, %v5742_v60  ;;  %v8325_v50 = vld [vmem:[#allocation15_spill] sm:$0xff] }
 0x182   :  { %v536_v0 = vmul.f32 0.0, %v5746_v24  ;;  %v8334_v60 = vld [vmem:[#allocation23_spill] sm:$0xff]  ;;  %v8335_v24 = vld [vmem:[#allocation28_spill] sm:$0xff] }
 0x183   :  { %v5748_v45 = vpop.eup %5747 }
 0x184   :  { %v6682_v55 = vadd.f32 %v537_v52, %v536_v0  ;;  %v8326_v52 = vld [vmem:[#allocation16_spill] sm:$0xff] }
 0x185   :  { %v8327_v0 = vld [vmem:[#allocation20_spill] sm:$0xff] }
 0x186   :  { %5749 = vtanh.f32 %v6682_v55 }
 0x190   :  { %v5750_v30 = vpop.eup %5749 }
 0x191   :  { %v540_v41 = vmul.f32 %v5750_v30, %v5748_v45  ;;  %v8336_v45 = vld [vmem:[#allocation29_spill] sm:$0xff]  ;;  %v8337_v30 = vld [vmem:[#allocation26_spill] sm:$0xff] }
 0x193   :  { %627 = vmatmul.mubr.f32.vlgmr.msra.gmra.mrb[2].mxu0 %v540_v41  ;;  %698 = vmatmul.mubr.f32.vlgmr.msra.gmra.mrb[2].mxu1 %v540_v41 }
 0x194   :  { %3838 = vmatpush1.bf16.msra.mxu0 %v6262_v9  ;;  %823 = vmatprep.mubr.f32.mxu0 %v540_v41 }
 0x195   :  { %894 = vmatprep.mubr.f32.mxu1 %v540_v41  ;;  %3840 = vmatprep.subr.bf16.mxu0 %v6264_v10  ;;  %v8338_v41 = vld [vmem:[#allocation27_spill] sm:$0xff] }
 0x196   :  { %3902 = vmatpush1.bf16.msra.mxu1 %v6275_v26 }
 0x197   :  { %3904 = vmatprep.subr.bf16.mxu1 %v6285_v34 }
 0x198   :  { %3842 = vmatpush1.bf16.msra.mxu0 %v6268_v15 }
 0x199   :  { %3844 = vmatprep.subr.bf16.mxu0 %v6271_v18 }
 0x19a   :  { %3906 = vmatpush1.bf16.msra.mxu1 %v6287_v38 }
 0x19b   :  { %3908 = vmatprep.subr.bf16.mxu1 %v6293_v46 }
 0x19c   :  { %3846 = vmatpush1.bf16.msra.mxu0 %v6278_v27 }
 0x19d   :  { %3848 = vmatprep.subr.bf16.mxu0 %v6282_v31 }
 0x19e   :  { %3910 = vmatpush1.bf16.msra.mxu1 %v6299_v49 }
 0x19f   :  { %3912 = vmatprep.subr.bf16.mxu1 %v6302_v53 }
 0x1a0   :  { %3850 = vmatpush1.bf16.msra.mxu0 %v6291_v43 }
 0x1a1   :  { %3852 = vmatprep.subr.bf16.mxu0 %v6296_v47 }
 0x1a2   :  { %3914 = vmatpush1.bf16.msra.mxu1 %v6311_v63 }
 0x1a3   :  { %3916 = vmatprep.subr.bf16.mxu1 %v6314_v2 }
 0x1a4   :  { %3854 = vmatpush1.bf16.msra.mxu0 %v6305_v56 }
 0x1a5   :  { %3856 = vmatprep.subr.bf16.mxu0 %v6308_v59 }
 0x1a6   :  { %3918 = vmatpush1.bf16.msra.mxu1 %v6323_v16 }
 0x1a7   :  { %3920 = vmatprep.subr.bf16.mxu1 %v6326_v19 }
 0x1a8   :  { %3858 = vmatpush1.bf16.msra.mxu0 %v6317_v8 }
 0x1a9   :  { %3860 = vmatprep.subr.bf16.mxu0 %v6320_v11 }
 0x1aa   :  { %3922 = vmatpush1.bf16.msra.mxu1 %v6335_v33 }
 0x1ab   :  { %3924 = vmatprep.subr.bf16.mxu1 %v6338_v36 }
 0x1ac   :  { %3862 = vmatpush1.bf16.msra.mxu0 %v6329_v25 }
 0x1ad   :  { %3864 = vmatprep.subr.bf16.mxu0 %v6332_v28 }
 0x1ae   :  { %3926 = vmatpush1.bf16.msra.mxu1 %v6347_v51 }
 0x1af   :  { %3928 = vmatprep.subr.bf16.mxu1 %v6350_v54 }
 0x1b0   :  { %3866 = vmatpush1.bf16.msra.mxu0 %v6341_v42 }
 0x1b1   :  { %3868 = vmatprep.subr.bf16.mxu0 %v6344_v44 }
 0x1b2   :  { %3930 = vmatpush1.bf16.msra.mxu1 %v6359_v6 }
 0x1b3   :  { %3932 = vmatprep.subr.bf16.mxu1 %v6362_v12 }
 0x1b4   :  { %3870 = vmatpush1.bf16.msra.mxu0 %v6353_v61 }
 0x1b5   :  { %3872 = vmatprep.subr.bf16.mxu0 %v6356_v62 }
 0x1b6   :  { %3934 = vmatpush1.bf16.msra.mxu1 %v6371_v32 }
 0x1b7   :  { %3936 = vmatprep.subr.bf16.mxu1 %v6374_v37 }
 0x1b8   :  { %3874 = vmatpush1.bf16.msra.mxu0 %v6365_v21 }
 0x1b9   :  { %3876 = vmatprep.subr.bf16.mxu0 %v6368_v22 }
 0x1ba   :  { %3938 = vmatpush1.bf16.msra.mxu1 %v6383_v58 }
 0x1bb   :  { %3940 = vmatprep.subr.bf16.mxu1 %v8324_v40 }
 0x1bc   :  { %3878 = vmatpush1.bf16.msra.mxu0 %v8325_v50 }
 0x1bd   :  { %3880 = vmatprep.subr.bf16.mxu0 %v8326_v52 }
 0x1be   :  { %3942 = vmatpush1.bf16.msra.mxu1 %v8327_v0 }
 0x1bf   :  { %3944 = vmatprep.subr.bf16.mxu1 %v8328_v20 }
 0x1c0   :  { %3882 = vmatpush1.bf16.msra.mxu0 %v8329_v13  ;;  %v8340_v13 = vld [vmem:[#allocation33_spill] sm:$0xff] }
 0x1c1   :  { %3884 = vmatprep.subr.bf16.mxu0 %v8330_v23  ;;  %v8341_v23 = vld [vmem:[#allocation30_spill] sm:$0xff] }
 0x1c2   :  { %3946 = vmatpush1.bf16.msra.mxu1 %v8331_v7  ;;  %v8342_v7 = vld [vmem:[#allocation31_spill] sm:$0xff] }
 0x1c3   :  { %3948 = vmatprep.subr.bf16.mxu1 %v8332_v57  ;;  %v8343_v57 = vld [vmem:[#allocation35_spill] sm:$0xff] }
 0x1c4   :  { %3886 = vmatpush1.bf16.msra.mxu0 %v8333_v5  ;;  %v8344_v5 = vld [vmem:[#allocation37_spill] sm:$0xff] }
 0x1c5   :  { %3888 = vmatprep.subr.bf16.mxu0 %v8334_v60  ;;  %v8345_v60 = vld [vmem:[#allocation34_spill] sm:$0xff] }
 0x1c6   :  { %3950 = vmatpush1.bf16.msra.mxu1 %v8335_v24 }
 0x1c7   :  { %3952 = vmatprep.subr.bf16.mxu1 %v8336_v45  ;;  %v8346_v45 = vld [vmem:[#allocation36_spill] sm:$0xff] }
 0x1c8   :  { %3890 = vmatpush1.bf16.msra.mxu0 %v8337_v30  ;;  %v3487_v30 = vld [vmem:[%s8003_s0 + $0x8] sm:$0xff] }
 0x1c9   :  { %3892 = vmatprep.subr.bf16.mxu0 %v8338_v41 }
 0x1ca   :  { %3954 = vmatpush1.bf16.msra.mxu1 %v8339_v35 }
 0x1cb   :  { %3956 = vmatprep.subr.bf16.mxu1 %v8340_v13  ;;  %v8347_v13 = vld [vmem:[#allocation41_spill] sm:$0xff] }
 0x1cc   :  { %3894 = vmatpush1.bf16.msra.mxu0 %v8341_v23  ;;  %v8348_v23 = vld [vmem:[#allocation38_spill] sm:$0xff] }
 0x1cd   :  { %3896 = vmatprep.subr.bf16.mxu0 %v8342_v7  ;;  %v8349_v7 = vld [vmem:[#allocation40_spill] sm:$0xff] }
 0x1ce   :  { %3958 = vmatpush1.bf16.msra.mxu1 %v8343_v57  ;;  %v8352_v57 = vld [vmem:[#allocation44_spill] sm:$0xff] }
 0x1cf   :  { %3960 = vmatprep.subr.bf16.mxu1 %v8344_v5  ;;  %v8350_v5 = vld [vmem:[#allocation45_spill] sm:$0xff] }
 0x1d0   :  { %3898 = vmatpush1.bf16.msra.mxu0 %v8345_v60  ;;  %v8351_v60 = vld [vmem:[#allocation42_spill] sm:$0xff] }
 0x1d1   :  { %3964 = vmatprep.subr.bf16.mxu0 %v8346_v45 }
 0x1d2   :  { %3962 = vmatpush1.bf16.msra.mxu1 %v6455_v1  ;;  %v8353_v1 = vld [vmem:[#allocation46_spill] sm:$0xff] }
 0x1d3   :  { %824 = vmatmul.mubr.f32.vlgmr.msra.gmra.mrb[4].mxu0 %v3487_v30  ;;  %4028 = vmatprep.subr.bf16.mxu1 %v8347_v13  ;;  %v8410_v13 = vld [vmem:[#allocation102_spill] sm:$0xff] }
 0x1d4   :  { %3966 = vmatpush1.bf16.msra.mxu0 %v8348_v23  ;;  %v8411_v45 = vsub.s32 3, %v8410_v13 }
 0x1d5   :  { %895 = vmatmul.mubr.f32.vlgmr.msra.gmra.mrb[4].mxu1 %v3487_v30  ;;  %3968 = vmatprep.subr.bf16.mxu0 %v8349_v7  ;;  %v8354_v30 = vld [vmem:[#allocation53_spill] sm:$0xff]  ;;  %v8355_v7 = vld [vmem:[#allocation50_spill] sm:$0xff] }
 0x1d6   :  { %4030 = vmatpush1.bf16.msra.mxu1 %v6468_v39  ;;  %v8356_v39 = vld [vmem:[#allocation52_spill] sm:$0xff] }
 0x1d7   :  { %4032 = vmatprep.subr.bf16.mxu1 %v8350_v5  ;;  %v8357_v5 = vld [vmem:[#allocation55_spill] sm:$0xff] }
 0x1d8   :  { %3970 = vmatpush1.bf16.msra.mxu0 %v8351_v60  ;;  %v8358_v60 = vld [vmem:[#allocation56_spill] sm:$0xff] }
 0x1d9   :  { %3972 = vmatprep.subr.bf16.mxu0 %v8352_v57  ;;  %v8359_v57 = vld [vmem:[#allocation54_spill] sm:$0xff] }
 0x1da   :  { %4034 = vmatpush1.bf16.msra.mxu1 %v6480_v48  ;;  %v8360_v48 = vld [vmem:[#allocation58_spill] sm:$0xff] }
 0x1db   :  { %4036 = vmatprep.subr.bf16.mxu1 %v6486_v17  ;;  %v8361_v17 = vld [vmem:[#allocation57_spill] sm:$0xff] }
 0x1dc   :  { %3974 = vmatpush1.bf16.msra.mxu0 %v8353_v1  ;;  %v8362_v1 = vld [vmem:[#allocation60_spill] sm:$0xff] }
 0x1dd   :  { %3976 = vmatprep.subr.bf16.mxu0 %v6483_v29  ;;  %v8363_v29 = vld [vmem:[#allocation59_spill] sm:$0xff] }
 0x1de   :  { %4038 = vmatpush1.bf16.msra.mxu1 %v6493_v4  ;;  %v8364_v4 = vld [vmem:[#allocation62_spill] sm:$0xff] }
 0x1df   :  { %4040 = vmatprep.subr.bf16.mxu1 %v8354_v30  ;;  %v8365_v30 = vld [vmem:[#allocation61_spill] sm:$0xff] }
 0x1e0   :  { %3978 = vmatpush1.bf16.msra.mxu0 %v8355_v7  ;;  %v8366_v7 = vld [vmem:[#allocation64_spill] sm:$0xff] }
 0x1e1   :  { %3980 = vmatprep.subr.bf16.mxu0 %v8356_v39  ;;  %v8367_v39 = vld [vmem:[#allocation63_spill] sm:$0xff] }
 0x1e2   :  { %4042 = vmatpush1.bf16.msra.mxu1 %v8357_v5  ;;  %v8368_v5 = vld [vmem:[#allocation66_spill] sm:$0xff] }
 0x1e3   :  { %4044 = vmatprep.subr.bf16.mxu1 %v8358_v60  ;;  %v8369_v60 = vld [vmem:[#allocation65_spill] sm:$0xff] }
 0x1e4   :  { %3982 = vmatpush1.bf16.msra.mxu0 %v8359_v57  ;;  %v8370_v57 = vld [vmem:[#allocation68_spill] sm:$0xff] }
 0x1e5   :  { %3984 = vmatprep.subr.bf16.mxu0 %v8360_v48  ;;  %v8371_v48 = vld [vmem:[#allocation67_spill] sm:$0xff] }
 0x1e6   :  { %4046 = vmatpush1.bf16.msra.mxu1 %v8361_v17  ;;  %v8372_v17 = vld [vmem:[#allocation70_spill] sm:$0xff] }
 0x1e7   :  { %4048 = vmatprep.subr.bf16.mxu1 %v8362_v1  ;;  %v8373_v1 = vld [vmem:[#allocation69_spill] sm:$0xff] }
 0x1e8   :  { %3986 = vmatpush1.bf16.msra.mxu0 %v8363_v29  ;;  %v8374_v29 = vld [vmem:[#allocation72_spill] sm:$0xff] }
 0x1e9   :  { %3988 = vmatprep.subr.bf16.mxu0 %v8364_v4  ;;  %v8375_v4 = vld [vmem:[#allocation71_spill] sm:$0xff] }
 0x1ea   :  { %4050 = vmatpush1.bf16.msra.mxu1 %v8365_v30  ;;  %v8376_v30 = vld [vmem:[#allocation74_spill] sm:$0xff] }
 0x1eb   :  { %4052 = vmatprep.subr.bf16.mxu1 %v8366_v7  ;;  %v8377_v7 = vld [vmem:[#allocation73_spill] sm:$0xff] }
 0x1ec   :  { %3990 = vmatpush1.bf16.msra.mxu0 %v8367_v39  ;;  %v8378_v39 = vld [vmem:[#allocation76_spill] sm:$0xff] }
 0x1ed   :  { %3992 = vmatprep.subr.bf16.mxu0 %v8368_v5  ;;  %v8379_v5 = vld [vmem:[#allocation75_spill] sm:$0xff] }
 0x1ee   :  { %4054 = vmatpush1.bf16.msra.mxu1 %v8369_v60  ;;  %v8380_v60 = vld [vmem:[#allocation78_spill] sm:$0xff] }
 0x1ef   :  { %4056 = vmatprep.subr.bf16.mxu1 %v8370_v57  ;;  %v8381_v57 = vld [vmem:[#allocation77_spill] sm:$0xff] }
 0x1f0   :  { %3994 = vmatpush1.bf16.msra.mxu0 %v8371_v48  ;;  %v8382_v48 = vld [vmem:[#allocation80_spill] sm:$0xff] }
 0x1f1   :  { %3996 = vmatprep.subr.bf16.mxu0 %v8372_v17  ;;  %v8383_v17 = vld [vmem:[#allocation79_spill] sm:$0xff] }
 0x1f2   :  { %4058 = vmatpush1.bf16.msra.mxu1 %v8373_v1  ;;  %v8384_v1 = vld [vmem:[#allocation82_spill] sm:$0xff] }
 0x1f3   :  { %4060 = vmatprep.subr.bf16.mxu1 %v8374_v29  ;;  %v8385_v29 = vld [vmem:[#allocation81_spill] sm:$0xff] }
 0x1f4   :  { %3998 = vmatpush1.bf16.msra.mxu0 %v8375_v4  ;;  %v8386_v4 = vld [vmem:[#allocation84_spill] sm:$0xff] }
 0x1f5   :  { %4000 = vmatprep.subr.bf16.mxu0 %v8376_v30  ;;  %v8387_v30 = vld [vmem:[#allocation83_spill] sm:$0xff] }
 0x1f6   :  { %4062 = vmatpush1.bf16.msra.mxu1 %v8377_v7  ;;  %v8388_v7 = vld [vmem:[#allocation86_spill] sm:$0xff] }
 0x1f7   :  { %4064 = vmatprep.subr.bf16.mxu1 %v8378_v39  ;;  %v8389_v39 = vld [vmem:[#allocation85_spill] sm:$0xff] }
 0x1f8   :  { %4002 = vmatpush1.bf16.msra.mxu0 %v8379_v5  ;;  %v8390_v5 = vld [vmem:[#allocation88_spill] sm:$0xff] }
 0x1f9   :  { %4004 = vmatprep.subr.bf16.mxu0 %v8380_v60  ;;  %v8391_v60 = vld [vmem:[#allocation87_spill] sm:$0xff] }
 0x1fa   :  { %4066 = vmatpush1.bf16.msra.mxu1 %v8381_v57  ;;  %v8392_v57 = vld [vmem:[#allocation90_spill] sm:$0xff] }
 0x1fb   :  { %4068 = vmatprep.subr.bf16.mxu1 %v8382_v48  ;;  %v8393_v48 = vld [vmem:[#allocation89_spill] sm:$0xff] }
 0x1fc   :  { %4006 = vmatpush1.bf16.msra.mxu0 %v8383_v17  ;;  %v8394_v17 = vld [vmem:[#allocation92_spill] sm:$0xff] }
 0x1fd   :  { %4008 = vmatprep.subr.bf16.mxu0 %v8384_v1  ;;  %v8395_v1 = vld [vmem:[#allocation91_spill] sm:$0xff] }
 0x1fe   :  { %4070 = vmatpush1.bf16.msra.mxu1 %v8385_v29 }
 0x1ff   :  { %4072 = vmatprep.subr.bf16.mxu1 %v8386_v4  ;;  %v8396_v4 = vld [vmem:[#allocation93_spill] sm:$0xff] }
 0x200   :  { %4010 = vmatpush1.bf16.msra.mxu0 %v8387_v30  ;;  %v8397_v30 = vld [vmem:[#allocation96_spill] sm:$0xff] }
 0x201   :  { %4012 = vmatprep.subr.bf16.mxu0 %v8388_v7  ;;  %v8398_v7 = vld [vmem:[#allocation95_spill] sm:$0xff] }
 0x202   :  { %4074 = vmatpush1.bf16.msra.mxu1 %v8389_v39  ;;  %v8399_v39 = vld [vmem:[#allocation98_spill] sm:$0xff] }
 0x203   :  { %4076 = vmatprep.subr.bf16.mxu1 %v8390_v5  ;;  %v8400_v5 = vld [vmem:[#allocation97_spill] sm:$0xff] }
 0x204   :  { %4014 = vmatpush1.bf16.msra.mxu0 %v8391_v60  ;;  %v8401_v60 = vld [vmem:[#allocation100_spill] sm:$0xff] }
 0x205   :  { %4016 = vmatprep.subr.bf16.mxu0 %v8392_v57  ;;  %v8402_v57 = vld [vmem:[#allocation99_spill] sm:$0xff] }
 0x206   :  { %4078 = vmatpush1.bf16.msra.mxu1 %v8393_v48  ;;  %v8403_v48 = vld [vmem:[#allocation13_spill] sm:$0xff] }
 0x207   :  { %4080 = vmatprep.subr.bf16.mxu1 %v8394_v17  ;;  %v8404_v17 = vld [vmem:[#allocation101_spill] sm:$0xff] }
 0x208   :  { %4018 = vmatpush1.bf16.msra.mxu0 %v8395_v1  ;;  %v8405_v1 = vld [vmem:[#allocation14_spill] sm:$0xff] }
 0x209   :  { %4020 = vmatprep.subr.bf16.mxu0 %v6623_v3 }
 0x20a   :  { %4082 = vmatpush1.bf16.msra.mxu1 %v8396_v4  ;;  %v8406_v4 = vld [vmem:[#allocation103_spill] sm:$0xff] }
 0x20b   :  { %4084 = vmatprep.subr.bf16.mxu1 %v8397_v30  ;;  %v350_v30 = vld [vmem:[%s8008_s5] sm:$0xf] }
 0x20c   :  { %4022 = vmatpush1.bf16.msra.mxu0 %v8398_v7  ;;  %v6820_v7 = vrot.slane %v350_v30, %v8406_v4  ;;  %v6829_v35 = vrot.slane %v350_v30, %v8411_v45 }
 0x20d   :  { %4024 = vmatprep.subr.bf16.mxu0 %v8399_v39  ;;  %v8408_v39 = vld [vmem:[#allocation104_spill] sm:$0xff] }
 0x20e   :  { %4086 = vmatpush1.bf16.msra.mxu1 %v8400_v5  ;;  %8407 = vst [vmem:[#allocation17_spill] sm:$0xff] %v6820_v7  ;;  %v6823_v3 = vrot.slane %v350_v30, %v8408_v39  ;;  %8412 = vst [vmem:[#allocation102_spill] sm:$0xff] %v6829_v35  ;;  %v8413_v39 = vsub.s32 2, %v8410_v13 }
 0x20f   :  { %4088 = vmatprep.subr.bf16.mxu1 %v8401_v60 }
 0x210   :  { %4026 = vmatpush1.bf16.msra.mxu0 %v8402_v57  ;;  %8409 = vst [vmem:[#allocation108_spill] sm:$0xff] %v6823_v3  ;;  %v6834_v41 = vrot.slane %v350_v30, %v8413_v39 }
 0x211   :  { %4092 = vmatprep.subr.bf16.mxu0 %v8403_v48 }
 0x212   :  { %4090 = vmatpush1.bf16.msra.mxu1 %v8404_v17  ;;  %8414 = vst [vmem:[#allocation109_spill] sm:$0xff] %v6834_v41 }
 0x213   :  { %4156 = vmatprep.subr.bf16.mxu1 %v8405_v1 }
 0x266   :  { %v628_v5 = vpop.f32.mrb[2].mxu0  ;;  %v699_v60 = vpop.f32.mrb[2].mxu1 }
 0x267   :  { %v629_v57 = vadd.f32 %v628_v5, %v6820_v7  ;;  %v630_v29 = vpop.f32.mrb[3].mxu0  ;;  %v701_v48 = vpop.f32.mrb[3].mxu1  ;;  %v700_v5 = vadd.f32 %v699_v60, %v6834_v41 }
 0x268   :  { %v631_v17 = vadd.f32 %v630_v29, %v6823_v3  ;;  %v702_v4 = vadd.f32 %v701_v48, %v6829_v35 }
 0x269   :  { %v3481_v23 = vmul.f32 -1.442695, %v629_v57 }
 0x26a   :  { %v3482_v1 = vmul.f32 -1.442695, %v631_v17  ;;  %v3483_v24 = vmul.f32 -1.442695, %v702_v4 }
 0x26b   :  { %5751 = vpow2.f32 %v3481_v23 }
 0x26c   :  { %5753 = vpow2.f32 %v3482_v1 }
 0x26d   :  { %5755 = vpow2.f32 %v3483_v24 }
 0x26e   :  { %5757 = vtanh.f32 %v700_v5  ;;  %v8417_v5 = vld [vmem:[#allocation105_spill] sm:$0xff] }
 0x275   :  { %v5752_v7 = vpop.eup %5751 }
 0x276   :  { %v5754_v20 = vpop.eup %5753  ;;  %v707_v29 = vadd.f32 1.0, %v5752_v7  ;;  %v6840_v7 = vld [vmem:[#allocation7] ss:$0 sm:$0xff] }
 0x277   :  { %v713_v17 = vadd.f32 1.0, %v5754_v20  ;;  %v5756_v57 = vpop.eup %5755 }
 0x278   :  { %5759 = vrcp.f32 %v707_v29  ;;  %v5758_v23 = vpop.eup %5757  ;;  %v720_v35 = vadd.f32 1.0, %v5756_v57 }
 0x279   :  { %5761 = vrcp.f32 %v713_v17  ;;  %v8418_v17 = vld [vmem:[#allocation106_spill] sm:$0xff] }
 0x27a   :  { %5763 = vrcp.f32 %v720_v35 }
 0x282   :  { %v5760_v1 = vpop.eup %5759 }
 0x283   :  { %v5762_v45 = vpop.eup %5761  ;;  %v724_v48 = vmul.f32 %v5760_v1, %v5758_v23 }
 0x284   :  { %v723_v13 = vmul.f32 0.0, %v5762_v45  ;;  %v5764_v4 = vpop.eup %5763 }
 0x286   :  { %v6837_v39 = vadd.f32 %v724_v48, %v723_v13  ;;  %v8419_v13 = vld [vmem:[#allocation107_spill] sm:$0xff] }
 0x288   :  { %8415 = vst [vmem:[#allocation110_spill] sm:$0xff] %v6837_v39  ;;  %5765 = vtanh.f32 %v6837_v39 }
 0x292   :  { %v5766_v60 = vpop.eup %5765 }
 0x293   :  { %v6842_v24 = vmul.f32 %v5766_v60, %v5764_v4 }
 0x295   :  { %8416 = vst [vmem:[#allocation111_spill] sm:$0xff] %v6842_v24  ;;  %989 = vmatprep.mubr.f32.mxu0 %v6842_v24  ;;  %1060 = vmatprep.mubr.f32.mxu1 %v6842_v24  ;;  %v734_v20 = vmul.f32 %v6840_v7, %v6842_v24 }
 0x297   :  { %735 = vadd.xlane.f32.xlu0 %v734_v20 }
 0x2a6   :  { %v825_v30 = vpop.f32.mrb[4].mxu0 }
 0x2a7   :  { %v826_v29 = vadd.f32 %v825_v30, %v8417_v5  ;;  %v827_v35 = vpop.f32.mrb[5].mxu0 }
 0x2a8   :  { %v828_v57 = vadd.f32 %v827_v35, %v8418_v17  ;;  %v896_v23 = vpop.f32.mrb[4].mxu1 }
 0x2a9   :  { %v3488_v1 = vmul.f32 -1.442695, %v826_v29  ;;  %v898_v45 = vpop.f32.mrb[5].mxu1  ;;  %v897_v39 = vadd.f32 %v896_v23, %v6679_v14 }
 0x2aa   :  { %v3489_v48 = vmul.f32 -1.442695, %v828_v57  ;;  %v899_v4 = vadd.f32 %v898_v45, %v8419_v13 }
 0x2ab   :  { %5767 = vpow2.f32 %v3488_v1 }
 0x2ac   :  { %5769 = vpow2.f32 %v3489_v48  ;;  %v3490_v60 = vmul.f32 -1.442695, %v899_v4 }
 0x2ae   :  { %5771 = vpow2.f32 %v3490_v60  ;;  %v8425_v60 = vld [vmem:[#allocation22_spill] sm:$0xff] }
 0x2af   :  { %5773 = vtanh.f32 %v897_v39  ;;  %v8421_v39 = vld [vmem:[#allocation18_spill] sm:$0xff] }
 0x2b5   :  { %v5768_v41 = vpop.eup %5767 }
 0x2b6   :  { %v5770_v20 = vpop.eup %5769  ;;  %v904_v24 = vadd.f32 1.0, %v5768_v41 }
 0x2b7   :  { %v910_v30 = vadd.f32 1.0, %v5770_v20  ;;  %v8426_v20 = vld [vmem:[#allocation23_spill] sm:$0xff] }
 0x2b8   :  { %5775 = vrcp.f32 %v904_v24  ;;  %v5772_v35 = vpop.eup %5771  ;;  %v8422_v24 = vld [vmem:[#allocation19_spill] sm:$0xff] }
 0x2b9   :  { %5777 = vrcp.f32 %v910_v30  ;;  %v5774_v17 = vpop.eup %5773  ;;  %v917_v5 = vadd.f32 1.0, %v5772_v35  ;;  %v8427_v30 = vld [vmem:[#allocation28_spill] sm:$0xff]  ;;  %v8428_v35 = vld [vmem:[#allocation29_spill] sm:$0xff] }
 0x2bb   :  { %5779 = vrcp.f32 %v917_v5  ;;  %v8423_v5 = vld [vmem:[#allocation24_spill] sm:$0xff] }
 0x2c2   :  { %v5776_v29 = vpop.eup %5775 }
 0x2c3   :  { %v5778_v57 = vpop.eup %5777  ;;  %v921_v1 = vmul.f32 %v5776_v29, %v5774_v17  ;;  %v8424_v17 = vld [vmem:[#allocation25_spill] sm:$0xff]  ;;  %v8429_v29 = vld [vmem:[#allocation26_spill] sm:$0xff] }
 0x2c4   :  { %v920_v48 = vmul.f32 %v5778_v57, %v6682_v55  ;;  %v8420_v55 = vld [vmem:[#allocation21_spill] sm:$0xff]  ;;  %v8430_v57 = vld [vmem:[#allocation27_spill] sm:$0xff] }
 0x2c5   :  { %v5780_v23 = vpop.eup %5779 }
 0x2c6   :  { %v6853_v45 = vadd.f32 %v921_v1, %v920_v48  ;;  %v8431_v1 = vld [vmem:[#allocation32_spill] sm:$0xff]  ;;  %v8432_v48 = vld [vmem:[#allocation33_spill] sm:$0xff] }
 0x2c8   :  { %5781 = vtanh.f32 %v6853_v45 }
 0x2d2   :  { %v5782_v4 = vpop.eup %5781 }
 0x2d3   :  { %v924_v41 = vmul.f32 %v5782_v4, %v5780_v23  ;;  %v8433_v23 = vld [vmem:[#allocation30_spill] sm:$0xff]  ;;  %v8434_v4 = vld [vmem:[#allocation31_spill] sm:$0xff] }
 0x2d5   :  { %990 = vmatmul.mubr.f32.vlgmr.msra.gmra.mrb[6].mxu0 %v924_v41  ;;  %1061 = vmatmul.mubr.f32.vlgmr.msra.gmra.mrb[6].mxu1 %v924_v41 }
 0x2d6   :  { %4094 = vmatpush1.bf16.msra.mxu0 %v6262_v9  ;;  %1174 = vmatprep.mubr.f32.mxu0 %v924_v41 }
 0x2d7   :  { %1245 = vmatprep.mubr.f32.mxu1 %v924_v41  ;;  %4096 = vmatprep.subr.bf16.mxu0 %v6264_v10  ;;  %v8435_v41 = vld [vmem:[#allocation35_spill] sm:$0xff] }
 0x2d8   :  { %4158 = vmatpush1.bf16.msra.mxu1 %v6275_v26 }
 0x2d9   :  { %4160 = vmatprep.subr.bf16.mxu1 %v6285_v34 }
 0x2da   :  { %4098 = vmatpush1.bf16.msra.mxu0 %v6268_v15 }
 0x2db   :  { %4100 = vmatprep.subr.bf16.mxu0 %v6271_v18 }
 0x2dc   :  { %4162 = vmatpush1.bf16.msra.mxu1 %v6287_v38 }
 0x2dd   :  { %4164 = vmatprep.subr.bf16.mxu1 %v6293_v46 }
 0x2de   :  { %4102 = vmatpush1.bf16.msra.mxu0 %v6278_v27 }
 0x2df   :  { %4104 = vmatprep.subr.bf16.mxu0 %v6282_v31 }
 0x2e0   :  { %4166 = vmatpush1.bf16.msra.mxu1 %v6299_v49 }
 0x2e1   :  { %4168 = vmatprep.subr.bf16.mxu1 %v6302_v53 }
 0x2e2   :  { %4106 = vmatpush1.bf16.msra.mxu0 %v6291_v43 }
 0x2e3   :  { %4108 = vmatprep.subr.bf16.mxu0 %v6296_v47 }
 0x2e4   :  { %4170 = vmatpush1.bf16.msra.mxu1 %v6311_v63 }
 0x2e5   :  { %4172 = vmatprep.subr.bf16.mxu1 %v6314_v2 }
 0x2e6   :  { %4110 = vmatpush1.bf16.msra.mxu0 %v6305_v56 }
 0x2e7   :  { %4112 = vmatprep.subr.bf16.mxu0 %v6308_v59 }
 0x2e8   :  { %4174 = vmatpush1.bf16.msra.mxu1 %v6323_v16 }
 0x2e9   :  { %4176 = vmatprep.subr.bf16.mxu1 %v6326_v19 }
 0x2ea   :  { %4114 = vmatpush1.bf16.msra.mxu0 %v6317_v8 }
 0x2eb   :  { %4116 = vmatprep.subr.bf16.mxu0 %v6320_v11 }
 0x2ec   :  { %4178 = vmatpush1.bf16.msra.mxu1 %v6335_v33 }
 0x2ed   :  { %4180 = vmatprep.subr.bf16.mxu1 %v6338_v36 }
 0x2ee   :  { %4118 = vmatpush1.bf16.msra.mxu0 %v6329_v25 }
 0x2ef   :  { %4120 = vmatprep.subr.bf16.mxu0 %v6332_v28 }
 0x2f0   :  { %4182 = vmatpush1.bf16.msra.mxu1 %v6347_v51 }
 0x2f1   :  { %4184 = vmatprep.subr.bf16.mxu1 %v6350_v54 }
 0x2f2   :  { %4122 = vmatpush1.bf16.msra.mxu0 %v6341_v42 }
 0x2f3   :  { %4124 = vmatprep.subr.bf16.mxu0 %v6344_v44 }
 0x2f4   :  { %4186 = vmatpush1.bf16.msra.mxu1 %v6359_v6 }
 0x2f5   :  { %4188 = vmatprep.subr.bf16.mxu1 %v6362_v12 }
 0x2f6   :  { %4126 = vmatpush1.bf16.msra.mxu0 %v6353_v61 }
 0x2f7   :  { %4128 = vmatprep.subr.bf16.mxu0 %v6356_v62 }
 0x2f8   :  { %4190 = vmatpush1.bf16.msra.mxu1 %v6371_v32 }
 0x2f9   :  { %4192 = vmatprep.subr.bf16.mxu1 %v6374_v37 }
 0x2fa   :  { %4130 = vmatpush1.bf16.msra.mxu0 %v6365_v21 }
 0x2fb   :  { %4132 = vmatprep.subr.bf16.mxu0 %v6368_v22 }
 0x2fc   :  { %4194 = vmatpush1.bf16.msra.mxu1 %v6383_v58 }
 0x2fd   :  { %4196 = vmatprep.subr.bf16.mxu1 %v8324_v40 }
 0x2fe   :  { %4134 = vmatpush1.bf16.msra.mxu0 %v8325_v50 }
 0x2ff   :  { %4136 = vmatprep.subr.bf16.mxu0 %v8326_v52 }
 0x300   :  { %4198 = vmatpush1.bf16.msra.mxu1 %v8327_v0 }
 0x301   :  { %4200 = vmatprep.subr.bf16.mxu1 %v8420_v55 }
 0x302   :  { %4138 = vmatpush1.bf16.msra.mxu0 %v8421_v39 }
 0x303   :  { %4140 = vmatprep.subr.bf16.mxu0 %v8422_v24 }
 0x304   :  { %4202 = vmatpush1.bf16.msra.mxu1 %v8423_v5 }
 0x305   :  { %4204 = vmatprep.subr.bf16.mxu1 %v8424_v17  ;;  %v8505_v17 = vld [vmem:[#allocation17_spill] sm:$0xff] }
 0x306   :  { %4142 = vmatpush1.bf16.msra.mxu0 %v8425_v60  ;;  %v8436_v60 = vld [vmem:[#allocation37_spill] sm:$0xff] }
 0x307   :  { %4144 = vmatprep.subr.bf16.mxu0 %v8426_v20  ;;  %v8437_v20 = vld [vmem:[#allocation34_spill] sm:$0xff] }
 0x308   :  { %4206 = vmatpush1.bf16.msra.mxu1 %v8427_v30  ;;  %v8447_v30 = vld [vmem:[#allocation47_spill] sm:$0xff] }
 0x309   :  { %4208 = vmatprep.subr.bf16.mxu1 %v8428_v35  ;;  %v8438_v35 = vld [vmem:[#allocation36_spill] sm:$0xff] }
 0x30a   :  { %4146 = vmatpush1.bf16.msra.mxu0 %v8429_v29  ;;  %v3495_v29 = vld [vmem:[%s8003_s0 + $0x10] sm:$0xff] }
 0x30b   :  { %4148 = vmatprep.subr.bf16.mxu0 %v8430_v57  ;;  %v8439_v57 = vld [vmem:[#allocation39_spill] sm:$0xff] }
 0x30c   :  { %4210 = vmatpush1.bf16.msra.mxu1 %v8431_v1  ;;  %v8446_v1 = vld [vmem:[#allocation44_spill] sm:$0xff] }
 0x30d   :  { %4212 = vmatprep.subr.bf16.mxu1 %v8432_v48  ;;  %v8440_v48 = vld [vmem:[#allocation41_spill] sm:$0xff] }
 0x30e   :  { %4150 = vmatpush1.bf16.msra.mxu0 %v8433_v23  ;;  %v8441_v23 = vld [vmem:[#allocation38_spill] sm:$0xff] }
 0x30f   :  { %4152 = vmatprep.subr.bf16.mxu0 %v8434_v4  ;;  %v8442_v4 = vld [vmem:[#allocation40_spill] sm:$0xff] }
 0x310   :  { %4214 = vmatpush1.bf16.msra.mxu1 %v8435_v41  ;;  %v8443_v41 = vld [vmem:[#allocation43_spill] sm:$0xff] }
 0x311   :  { %4216 = vmatprep.subr.bf16.mxu1 %v8436_v60  ;;  %v8444_v60 = vld [vmem:[#allocation45_spill] sm:$0xff] }
 0x312   :  { %4154 = vmatpush1.bf16.msra.mxu0 %v8437_v20  ;;  %v8445_v20 = vld [vmem:[#allocation42_spill] sm:$0xff] }
 0x313   :  { %4220 = vmatprep.subr.bf16.mxu0 %v8438_v35  ;;  %v8448_v35 = vld [vmem:[#allocation49_spill] sm:$0xff] }
 0x314   :  { %4218 = vmatpush1.bf16.msra.mxu1 %v8439_v57  ;;  %v8449_v57 = vld [vmem:[#allocation46_spill] sm:$0xff] }
 0x315   :  { %1175 = vmatmul.mubr.f32.vlgmr.msra.gmra.mrb[8].mxu0 %v3495_v29  ;;  %4284 = vmatprep.subr.bf16.mxu1 %v8440_v48  ;;  %v8450_v48 = vld [vmem:[#allocation48_spill] sm:$0xff] }
 0x316   :  { %4222 = vmatpush1.bf16.msra.mxu0 %v8441_v23  ;;  %v8451_v23 = vld [vmem:[#allocation51_spill] sm:$0xff] }
 0x317   :  { %1246 = vmatmul.mubr.f32.vlgmr.msra.gmra.mrb[8].mxu1 %v3495_v29  ;;  %4224 = vmatprep.subr.bf16.mxu0 %v8442_v4  ;;  %v8452_v29 = vld [vmem:[#allocation53_spill] sm:$0xff]  ;;  %v8453_v4 = vld [vmem:[#allocation50_spill] sm:$0xff] }
 0x318   :  { %4286 = vmatpush1.bf16.msra.mxu1 %v8443_v41  ;;  %v8454_v41 = vld [vmem:[#allocation52_spill] sm:$0xff] }
 0x319   :  { %4288 = vmatprep.subr.bf16.mxu1 %v8444_v60  ;;  %v8455_v60 = vld [vmem:[#allocation55_spill] sm:$0xff] }
 0x31a   :  { %4226 = vmatpush1.bf16.msra.mxu0 %v8445_v20  ;;  %v8456_v20 = vld [vmem:[#allocation56_spill] sm:$0xff] }
 0x31b   :  { %4228 = vmatprep.subr.bf16.mxu0 %v8446_v1  ;;  %v8457_v1 = vld [vmem:[#allocation54_spill] sm:$0xff] }
 0x31c   :  { %4290 = vmatpush1.bf16.msra.mxu1 %v8447_v30  ;;  %v8458_v30 = vld [vmem:[#allocation58_spill] sm:$0xff] }
 0x31d   :  { %4292 = vmatprep.subr.bf16.mxu1 %v8448_v35  ;;  %v8459_v35 = vld [vmem:[#allocation57_spill] sm:$0xff] }
 0x31e   :  { %4230 = vmatpush1.bf16.msra.mxu0 %v8449_v57  ;;  %v8460_v57 = vld [vmem:[#allocation60_spill] sm:$0xff] }
 0x31f   :  { %4232 = vmatprep.subr.bf16.mxu0 %v8450_v48  ;;  %v8461_v48 = vld [vmem:[#allocation59_spill] sm:$0xff] }
 0x320   :  { %4294 = vmatpush1.bf16.msra.mxu1 %v8451_v23  ;;  %v8462_v23 = vld [vmem:[#allocation62_spill] sm:$0xff] }
 0x321   :  { %4296 = vmatprep.subr.bf16.mxu1 %v8452_v29  ;;  %v8463_v29 = vld [vmem:[#allocation61_spill] sm:$0xff] }
 0x322   :  { %4234 = vmatpush1.bf16.msra.mxu0 %v8453_v4  ;;  %v8464_v4 = vld [vmem:[#allocation64_spill] sm:$0xff] }
 0x323   :  { %4236 = vmatprep.subr.bf16.mxu0 %v8454_v41  ;;  %v8465_v41 = vld [vmem:[#allocation63_spill] sm:$0xff] }
 0x324   :  { %4298 = vmatpush1.bf16.msra.mxu1 %v8455_v60  ;;  %v8466_v60 = vld [vmem:[#allocation66_spill] sm:$0xff] }
 0x325   :  { %4300 = vmatprep.subr.bf16.mxu1 %v8456_v20  ;;  %v8467_v20 = vld [vmem:[#allocation65_spill] sm:$0xff] }
 0x326   :  { %4238 = vmatpush1.bf16.msra.mxu0 %v8457_v1  ;;  %v8468_v1 = vld [vmem:[#allocation68_spill] sm:$0xff] }
 0x327   :  { %4240 = vmatprep.subr.bf16.mxu0 %v8458_v30  ;;  %v8469_v30 = vld [vmem:[#allocation67_spill] sm:$0xff] }
 0x328   :  { %4302 = vmatpush1.bf16.msra.mxu1 %v8459_v35  ;;  %v8470_v35 = vld [vmem:[#allocation70_spill] sm:$0xff] }
 0x329   :  { %4304 = vmatprep.subr.bf16.mxu1 %v8460_v57  ;;  %v8471_v57 = vld [vmem:[#allocation69_spill] sm:$0xff] }
 0x32a   :  { %4242 = vmatpush1.bf16.msra.mxu0 %v8461_v48  ;;  %v8472_v48 = vld [vmem:[#allocation72_spill] sm:$0xff] }
 0x32b   :  { %4244 = vmatprep.subr.bf16.mxu0 %v8462_v23  ;;  %v8473_v23 = vld [vmem:[#allocation71_spill] sm:$0xff] }
 0x32c   :  { %4306 = vmatpush1.bf16.msra.mxu1 %v8463_v29  ;;  %v8474_v29 = vld [vmem:[#allocation74_spill] sm:$0xff] }
 0x32d   :  { %4308 = vmatprep.subr.bf16.mxu1 %v8464_v4  ;;  %v8475_v4 = vld [vmem:[#allocation73_spill] sm:$0xff] }
 0x32e   :  { %4246 = vmatpush1.bf16.msra.mxu0 %v8465_v41  ;;  %v8476_v41 = vld [vmem:[#allocation76_spill] sm:$0xff] }
 0x32f   :  { %4248 = vmatprep.subr.bf16.mxu0 %v8466_v60  ;;  %v8477_v60 = vld [vmem:[#allocation75_spill] sm:$0xff] }
 0x330   :  { %4310 = vmatpush1.bf16.msra.mxu1 %v8467_v20  ;;  %v8478_v20 = vld [vmem:[#allocation78_spill] sm:$0xff] }
 0x331   :  { %4312 = vmatprep.subr.bf16.mxu1 %v8468_v1  ;;  %v8479_v1 = vld [vmem:[#allocation77_spill] sm:$0xff] }
 0x332   :  { %4250 = vmatpush1.bf16.msra.mxu0 %v8469_v30  ;;  %v8480_v30 = vld [vmem:[#allocation80_spill] sm:$0xff] }
 0x333   :  { %4252 = vmatprep.subr.bf16.mxu0 %v8470_v35  ;;  %v8481_v35 = vld [vmem:[#allocation79_spill] sm:$0xff] }
 0x334   :  { %4314 = vmatpush1.bf16.msra.mxu1 %v8471_v57  ;;  %v8482_v57 = vld [vmem:[#allocation82_spill] sm:$0xff] }
 0x335   :  { %4316 = vmatprep.subr.bf16.mxu1 %v8472_v48  ;;  %v8483_v48 = vld [vmem:[#allocation81_spill] sm:$0xff] }
 0x336   :  { %4254 = vmatpush1.bf16.msra.mxu0 %v8473_v23  ;;  %v8484_v23 = vld [vmem:[#allocation84_spill] sm:$0xff] }
 0x337   :  { %4256 = vmatprep.subr.bf16.mxu0 %v8474_v29  ;;  %v8485_v29 = vld [vmem:[#allocation83_spill] sm:$0xff] }
 0x338   :  { %4318 = vmatpush1.bf16.msra.mxu1 %v8475_v4  ;;  %v8486_v4 = vld [vmem:[#allocation86_spill] sm:$0xff] }
 0x339   :  { %4320 = vmatprep.subr.bf16.mxu1 %v8476_v41  ;;  %v8487_v41 = vld [vmem:[#allocation85_spill] sm:$0xff] }
 0x33a   :  { %4258 = vmatpush1.bf16.msra.mxu0 %v8477_v60  ;;  %v8488_v60 = vld [vmem:[#allocation88_spill] sm:$0xff] }
 0x33b   :  { %4260 = vmatprep.subr.bf16.mxu0 %v8478_v20  ;;  %v8489_v20 = vld [vmem:[#allocation87_spill] sm:$0xff] }
 0x33c   :  { %4322 = vmatpush1.bf16.msra.mxu1 %v8479_v1  ;;  %v8490_v1 = vld [vmem:[#allocation90_spill] sm:$0xff] }
 0x33d   :  { %4324 = vmatprep.subr.bf16.mxu1 %v8480_v30  ;;  %v8491_v30 = vld [vmem:[#allocation89_spill] sm:$0xff] }
 0x33e   :  { %4262 = vmatpush1.bf16.msra.mxu0 %v8481_v35  ;;  %v8492_v35 = vld [vmem:[#allocation92_spill] sm:$0xff] }
 0x33f   :  { %4264 = vmatprep.subr.bf16.mxu0 %v8482_v57  ;;  %v8493_v57 = vld [vmem:[#allocation91_spill] sm:$0xff] }
 0x340   :  { %4326 = vmatpush1.bf16.msra.mxu1 %v8483_v48  ;;  %v8494_v48 = vld [vmem:[#allocation94_spill] sm:$0xff] }
 0x341   :  { %4328 = vmatprep.subr.bf16.mxu1 %v8484_v23  ;;  %v8495_v23 = vld [vmem:[#allocation93_spill] sm:$0xff] }
 0x342   :  { %4266 = vmatpush1.bf16.msra.mxu0 %v8485_v29  ;;  %v8496_v29 = vld [vmem:[#allocation96_spill] sm:$0xff] }
 0x343   :  { %4268 = vmatprep.subr.bf16.mxu0 %v8486_v4  ;;  %v8497_v4 = vld [vmem:[#allocation95_spill] sm:$0xff] }
 0x344   :  { %4330 = vmatpush1.bf16.msra.mxu1 %v8487_v41  ;;  %v8498_v41 = vld [vmem:[#allocation98_spill] sm:$0xff] }
 0x345   :  { %4332 = vmatprep.subr.bf16.mxu1 %v8488_v60  ;;  %v8499_v60 = vld [vmem:[#allocation97_spill] sm:$0xff] }
 0x346   :  { %4270 = vmatpush1.bf16.msra.mxu0 %v8489_v20  ;;  %v8500_v20 = vld [vmem:[#allocation100_spill] sm:$0xff] }
 0x347   :  { %4272 = vmatprep.subr.bf16.mxu0 %v8490_v1  ;;  %v8501_v1 = vld [vmem:[#allocation99_spill] sm:$0xff] }
 0x348   :  { %4334 = vmatpush1.bf16.msra.mxu1 %v8491_v30  ;;  %v8502_v30 = vld [vmem:[#allocation13_spill] sm:$0xff] }
 0x349   :  { %4336 = vmatprep.subr.bf16.mxu1 %v8492_v35  ;;  %v8503_v35 = vld [vmem:[#allocation101_spill] sm:$0xff] }
 0x34a   :  { %4274 = vmatpush1.bf16.msra.mxu0 %v8493_v57  ;;  %v8504_v57 = vld [vmem:[#allocation14_spill] sm:$0xff] }
 0x34b   :  { %4276 = vmatprep.subr.bf16.mxu0 %v8494_v48 }
 0x34c   :  { %4338 = vmatpush1.bf16.msra.mxu1 %v8495_v23 }
 0x34d   :  { %4340 = vmatprep.subr.bf16.mxu1 %v8496_v29 }
 0x34e   :  { %4278 = vmatpush1.bf16.msra.mxu0 %v8497_v4 }
 0x34f   :  { %4280 = vmatprep.subr.bf16.mxu0 %v8498_v41 }
 0x350   :  { %4342 = vmatpush1.bf16.msra.mxu1 %v8499_v60 }
 0x351   :  { %4344 = vmatprep.subr.bf16.mxu1 %v8500_v20  ;;  %v8506_v20 = vld [vmem:[#allocation102_spill] sm:$0xff] }
 0x352   :  { %4282 = vmatpush1.bf16.msra.mxu0 %v8501_v1 }
 0x353   :  { %4348 = vmatprep.subr.bf16.mxu0 %v8502_v30  ;;  %v8507_v30 = vld [vmem:[#allocation109_spill] sm:$0xff] }
 0x354   :  { %4346 = vmatpush1.bf16.msra.mxu1 %v8503_v35 }
 0x355   :  { %4412 = vmatprep.subr.bf16.mxu1 %v8504_v57 }
 0x3a8   :  { %v991_v48 = vpop.f32.mrb[6].mxu0  ;;  %v1062_v23 = vpop.f32.mrb[6].mxu1 }
 0x3a9   :  { %v992_v29 = vadd.f32 %v991_v48, %v8505_v17  ;;  %v993_v5 = vpop.f32.mrb[7].mxu0  ;;  %v1064_v4 = vpop.f32.mrb[7].mxu1  ;;  %v1063_v55 = vadd.f32 %v1062_v23, %v8507_v30 }
 0x3aa   :  { %v994_v41 = vadd.f32 %v993_v5, %v6823_v3  ;;  %v1065_v1 = vadd.f32 %v1064_v4, %v8506_v20 }
 0x3ab   :  { %v3491_v24 = vmul.f32 -1.442695, %v992_v29 }
 0x3ac   :  { %v3492_v60 = vmul.f32 -1.442695, %v994_v41  ;;  %v3493_v39 = vmul.f32 -1.442695, %v1065_v1 }
 0x3ad   :  { %5783 = vpow2.f32 %v3491_v24 }
 0x3ae   :  { %5785 = vpow2.f32 %v3492_v60  ;;  %v8508_v60 = vld [vmem:[#allocation110_spill] sm:$0xff] }
 0x3af   :  { %5787 = vpow2.f32 %v3493_v39 }
 0x3b0   :  { %5789 = vtanh.f32 %v1063_v55  ;;  %v8510_v55 = vld [vmem:[#allocation105_spill] sm:$0xff] }
 0x3b7   :  { %v5784_v35 = vpop.eup %5783 }
 0x3b8   :  { %v5786_v0 = vpop.eup %5785  ;;  %v1070_v57 = vadd.f32 1.0, %v5784_v35 }
 0x3b9   :  { %v1076_v52 = vadd.f32 1.0, %v5786_v0  ;;  %v5788_v48 = vpop.eup %5787 }
 0x3ba   :  { %5791 = vrcp.f32 %v1070_v57  ;;  %v5790_v17 = vpop.eup %5789  ;;  %v1083_v24 = vadd.f32 1.0, %v5788_v48  ;;  %v8511_v57 = vld [vmem:[#allocation106_spill] sm:$0xff] }
 0x3bb   :  { %5793 = vrcp.f32 %v1076_v52 }
 0x3bc   :  { %5795 = vrcp.f32 %v1083_v24 }
 0x3c4   :  { %v5792_v5 = vpop.eup %5791 }
 0x3c5   :  { %v5794_v29 = vpop.eup %5793  ;;  %v1087_v41 = vmul.f32 %v5792_v5, %v5790_v17 }
 0x3c6   :  { %v1086_v3 = vmul.f32 %v5794_v29, %v8508_v60  ;;  %v5796_v1 = vpop.eup %5795 }
 0x3c8   :  { %v6992_v4 = vadd.f32 %v1087_v41, %v1086_v3 }
 0x3ca   :  { %5797 = vtanh.f32 %v6992_v4 }
 0x3d4   :  { %v5798_v35 = vpop.eup %5797 }
 0x3d5   :  { %v6995_v39 = vmul.f32 %v5798_v35, %v5796_v1 }
 0x3d7   :  { %8509 = vst [vmem:[#allocation107_spill] sm:$0xff] %v6995_v39  ;;  %1340 = vmatprep.mubr.f32.mxu0 %v6995_v39  ;;  %1411 = vmatprep.mubr.f32.mxu1 %v6995_v39  ;;  %v1091_v52 = vmul.f32 %v6840_v7, %v6995_v39 }
 0x3d9   :  { %1092 = vadd.xlane.f32.xlu0 %v1091_v52 }
 0x3e8   :  { %v1176_v0 = vpop.f32.mrb[8].mxu0 }
 0x3e9   :  { %v1177_v17 = vadd.f32 %v1176_v0, %v8510_v55  ;;  %v1178_v3 = vpop.f32.mrb[9].mxu0 }
 0x3ea   :  { %v1179_v23 = vadd.f32 %v1178_v3, %v8511_v57  ;;  %v1247_v48 = vpop.f32.mrb[8].mxu1 }
 0x3eb   :  { %v3496_v5 = vmul.f32 -1.442695, %v1177_v17  ;;  %v1249_v29 = vpop.f32.mrb[9].mxu1  ;;  %v1248_v1 = vadd.f32 %v1247_v48, %v6679_v14 }
 0x3ec   :  { %v3497_v41 = vmul.f32 -1.442695, %v1179_v23  ;;  %v1250_v24 = vadd.f32 %v1249_v29, %v8419_v13 }
 0x3ed   :  { %5799 = vpow2.f32 %v3496_v5 }
 0x3ee   :  { %5801 = vpow2.f32 %v3497_v41  ;;  %v3498_v60 = vmul.f32 -1.442695, %v1250_v24 }
 0x3f0   :  { %5803 = vpow2.f32 %v3498_v60 }
 0x3f1   :  { %5805 = vtanh.f32 %v1248_v1  ;;  %v8516_v1 = vld [vmem:[#allocation19_spill] sm:$0xff] }
 0x3f7   :  { %v5800_v35 = vpop.eup %5799 }
 0x3f8   :  { %v5802_v52 = vpop.eup %5801  ;;  %v1255_v39 = vadd.f32 1.0, %v5800_v35  ;;  %v8517_v35 = vld [vmem:[#allocation24_spill] sm:$0xff] }
 0x3f9   :  { %v1261_v0 = vadd.f32 1.0, %v5802_v52  ;;  %v8518_v52 = vld [vmem:[#allocation25_spill] sm:$0xff] }
 0x3fa   :  { %5807 = vrcp.f32 %v1255_v39  ;;  %v5804_v3 = vpop.eup %5803  ;;  %v8513_v39 = vld [vmem:[#allocation20_spill] sm:$0xff] }
 0x3fb   :  { %5809 = vrcp.f32 %v1261_v0  ;;  %v5806_v57 = vpop.eup %5805  ;;  %v1268_v55 = vadd.f32 1.0, %v5804_v3  ;;  %v8519_v0 = vld [vmem:[#allocation22_spill] sm:$0xff]  ;;  %v8520_v3 = vld [vmem:[#allocation23_spill] sm:$0xff] }
 0x3fd   :  { %5811 = vrcp.f32 %v1268_v55  ;;  %v8514_v55 = vld [vmem:[#allocation21_spill] sm:$0xff] }
 0x404   :  { %v5808_v17 = vpop.eup %5807 }
 0x405   :  { %v5810_v23 = vpop.eup %5809  ;;  %v1272_v5 = vmul.f32 %v5808_v17, %v5806_v57  ;;  %v8515_v57 = vld [vmem:[#allocation18_spill] sm:$0xff]  ;;  %v8521_v17 = vld [vmem:[#allocation28_spill] sm:$0xff] }
 0x406   :  { %v1271_v41 = vmul.f32 %v5810_v23, %v6853_v45  ;;  %v8512_v45 = vld [vmem:[#allocation16_spill] sm:$0xff]  ;;  %v8522_v23 = vld [vmem:[#allocation29_spill] sm:$0xff] }
 0x407   :  { %v5812_v48 = vpop.eup %5811 }
 0x408   :  { %v7006_v29 = vadd.f32 %v1272_v5, %v1271_v41  ;;  %v8523_v5 = vld [vmem:[#allocation26_spill] sm:$0xff]  ;;  %v8524_v41 = vld [vmem:[#allocation27_spill] sm:$0xff] }
 0x40a   :  { %5813 = vtanh.f32 %v7006_v29 }
 0x414   :  { %v5814_v24 = vpop.eup %5813 }
 0x415   :  { %v1275_v60 = vmul.f32 %v5814_v24, %v5812_v48  ;;  %v8525_v48 = vld [vmem:[#allocation32_spill] sm:$0xff]  ;;  %v8526_v24 = vld [vmem:[#allocation33_spill] sm:$0xff] }
 0x417   :  { %1341 = vmatmul.mubr.f32.vlgmr.msra.gmra.mrb[10].mxu0 %v1275_v60  ;;  %1412 = vmatmul.mubr.f32.vlgmr.msra.gmra.mrb[10].mxu1 %v1275_v60 }
 0x418   :  { %4350 = vmatpush1.bf16.msra.mxu0 %v6262_v9  ;;  %1525 = vmatprep.mubr.f32.mxu0 %v1275_v60 }
 0x419   :  { %1596 = vmatprep.mubr.f32.mxu1 %v1275_v60  ;;  %4352 = vmatprep.subr.bf16.mxu0 %v6264_v10  ;;  %v8527_v60 = vld [vmem:[#allocation30_spill] sm:$0xff] }
 0x41a   :  { %4414 = vmatpush1.bf16.msra.mxu1 %v6275_v26 }
 0x41b   :  { %4416 = vmatprep.subr.bf16.mxu1 %v6285_v34 }
 0x41c   :  { %4354 = vmatpush1.bf16.msra.mxu0 %v6268_v15 }
 0x41d   :  { %4356 = vmatprep.subr.bf16.mxu0 %v6271_v18 }
 0x41e   :  { %4418 = vmatpush1.bf16.msra.mxu1 %v6287_v38 }
 0x41f   :  { %4420 = vmatprep.subr.bf16.mxu1 %v6293_v46 }
 0x420   :  { %4358 = vmatpush1.bf16.msra.mxu0 %v6278_v27 }
 0x421   :  { %4360 = vmatprep.subr.bf16.mxu0 %v6282_v31 }
 0x422   :  { %4422 = vmatpush1.bf16.msra.mxu1 %v6299_v49 }
 0x423   :  { %4424 = vmatprep.subr.bf16.mxu1 %v6302_v53 }
 0x424   :  { %4362 = vmatpush1.bf16.msra.mxu0 %v6291_v43 }
 0x425   :  { %4364 = vmatprep.subr.bf16.mxu0 %v6296_v47 }
 0x426   :  { %4426 = vmatpush1.bf16.msra.mxu1 %v6311_v63 }
 0x427   :  { %4428 = vmatprep.subr.bf16.mxu1 %v6314_v2 }
 0x428   :  { %4366 = vmatpush1.bf16.msra.mxu0 %v6305_v56 }
 0x429   :  { %4368 = vmatprep.subr.bf16.mxu0 %v6308_v59 }
 0x42a   :  { %4430 = vmatpush1.bf16.msra.mxu1 %v6323_v16 }
 0x42b   :  { %4432 = vmatprep.subr.bf16.mxu1 %v6326_v19 }
 0x42c   :  { %4370 = vmatpush1.bf16.msra.mxu0 %v6317_v8 }
 0x42d   :  { %4372 = vmatprep.subr.bf16.mxu0 %v6320_v11 }
 0x42e   :  { %4434 = vmatpush1.bf16.msra.mxu1 %v6335_v33 }
 0x42f   :  { %4436 = vmatprep.subr.bf16.mxu1 %v6338_v36 }
 0x430   :  { %4374 = vmatpush1.bf16.msra.mxu0 %v6329_v25 }
 0x431   :  { %4376 = vmatprep.subr.bf16.mxu0 %v6332_v28 }
 0x432   :  { %4438 = vmatpush1.bf16.msra.mxu1 %v6347_v51 }
 0x433   :  { %4440 = vmatprep.subr.bf16.mxu1 %v6350_v54 }
 0x434   :  { %4378 = vmatpush1.bf16.msra.mxu0 %v6341_v42 }
 0x435   :  { %4380 = vmatprep.subr.bf16.mxu0 %v6344_v44 }
 0x436   :  { %4442 = vmatpush1.bf16.msra.mxu1 %v6359_v6 }
 0x437   :  { %4444 = vmatprep.subr.bf16.mxu1 %v6362_v12 }
 0x438   :  { %4382 = vmatpush1.bf16.msra.mxu0 %v6353_v61 }
 0x439   :  { %4384 = vmatprep.subr.bf16.mxu0 %v6356_v62 }
 0x43a   :  { %4446 = vmatpush1.bf16.msra.mxu1 %v6371_v32 }
 0x43b   :  { %4448 = vmatprep.subr.bf16.mxu1 %v6374_v37 }
 0x43c   :  { %4386 = vmatpush1.bf16.msra.mxu0 %v6365_v21 }
 0x43d   :  { %4388 = vmatprep.subr.bf16.mxu0 %v6368_v22 }
 0x43e   :  { %4450 = vmatpush1.bf16.msra.mxu1 %v6383_v58 }
 0x43f   :  { %4452 = vmatprep.subr.bf16.mxu1 %v8324_v40 }
 0x440   :  { %4390 = vmatpush1.bf16.msra.mxu0 %v8325_v50 }
 0x441   :  { %4392 = vmatprep.subr.bf16.mxu0 %v8512_v45 }
 0x442   :  { %4454 = vmatpush1.bf16.msra.mxu1 %v8513_v39 }
 0x443   :  { %4456 = vmatprep.subr.bf16.mxu1 %v8514_v55  ;;  %v8600_v55 = vld [vmem:[#allocation108_spill] sm:$0xff] }
 0x444   :  { %4394 = vmatpush1.bf16.msra.mxu0 %v8515_v57 }
 0x445   :  { %4396 = vmatprep.subr.bf16.mxu0 %v8516_v1  ;;  %v8599_v1 = vld [vmem:[#allocation17_spill] sm:$0xff] }
 0x446   :  { %4458 = vmatpush1.bf16.msra.mxu1 %v8517_v35  ;;  %v8528_v35 = vld [vmem:[#allocation31_spill] sm:$0xff] }
 0x447   :  { %4460 = vmatprep.subr.bf16.mxu1 %v8518_v52  ;;  %v8529_v52 = vld [vmem:[#allocation35_spill] sm:$0xff] }
 0x448   :  { %4398 = vmatpush1.bf16.msra.mxu0 %v8519_v0  ;;  %v8530_v0 = vld [vmem:[#allocation37_spill] sm:$0xff] }
 0x449   :  { %4400 = vmatprep.subr.bf16.mxu0 %v8520_v3  ;;  %v8531_v3 = vld [vmem:[#allocation34_spill] sm:$0xff] }
 0x44a   :  { %4462 = vmatpush1.bf16.msra.mxu1 %v8521_v17  ;;  %v8541_v17 = vld [vmem:[#allocation47_spill] sm:$0xff] }
 0x44b   :  { %4464 = vmatprep.subr.bf16.mxu1 %v8522_v23  ;;  %v8532_v23 = vld [vmem:[#allocation36_spill] sm:$0xff] }
 0x44c   :  { %4402 = vmatpush1.bf16.msra.mxu0 %v8523_v5  ;;  %v3503_v5 = vld [vmem:[%s8003_s0 + $0x18] sm:$0xff] }
 0x44d   :  { %4404 = vmatprep.subr.bf16.mxu0 %v8524_v41  ;;  %v8533_v41 = vld [vmem:[#allocation39_spill] sm:$0xff] }
 0x44e   :  { %4466 = vmatpush1.bf16.msra.mxu1 %v8525_v48  ;;  %v8540_v48 = vld [vmem:[#allocation44_spill] sm:$0xff] }
 0x44f   :  { %4468 = vmatprep.subr.bf16.mxu1 %v8526_v24  ;;  %v8534_v24 = vld [vmem:[#allocation41_spill] sm:$0xff] }
 0x450   :  { %4406 = vmatpush1.bf16.msra.mxu0 %v8527_v60  ;;  %v8535_v60 = vld [vmem:[#allocation38_spill] sm:$0xff] }
 0x451   :  { %4408 = vmatprep.subr.bf16.mxu0 %v8528_v35  ;;  %v8536_v35 = vld [vmem:[#allocation40_spill] sm:$0xff] }
 0x452   :  { %4470 = vmatpush1.bf16.msra.mxu1 %v8529_v52  ;;  %v8537_v52 = vld [vmem:[#allocation43_spill] sm:$0xff] }
 0x453   :  { %4472 = vmatprep.subr.bf16.mxu1 %v8530_v0  ;;  %v8538_v0 = vld [vmem:[#allocation45_spill] sm:$0xff] }
 0x454   :  { %4410 = vmatpush1.bf16.msra.mxu0 %v8531_v3  ;;  %v8539_v3 = vld [vmem:[#allocation42_spill] sm:$0xff] }
 0x455   :  { %4476 = vmatprep.subr.bf16.mxu0 %v8532_v23  ;;  %v8542_v23 = vld [vmem:[#allocation49_spill] sm:$0xff] }
 0x456   :  { %4474 = vmatpush1.bf16.msra.mxu1 %v8533_v41  ;;  %v8543_v41 = vld [vmem:[#allocation46_spill] sm:$0xff] }
 0x457   :  { %1526 = vmatmul.mubr.f32.vlgmr.msra.gmra.mrb[12].mxu0 %v3503_v5  ;;  %4540 = vmatprep.subr.bf16.mxu1 %v8534_v24  ;;  %v8544_v24 = vld [vmem:[#allocation48_spill] sm:$0xff] }
 0x458   :  { %4478 = vmatpush1.bf16.msra.mxu0 %v8535_v60  ;;  %v8545_v60 = vld [vmem:[#allocation51_spill] sm:$0xff] }
 0x459   :  { %1597 = vmatmul.mubr.f32.vlgmr.msra.gmra.mrb[12].mxu1 %v3503_v5  ;;  %4480 = vmatprep.subr.bf16.mxu0 %v8536_v35  ;;  %v8546_v5 = vld [vmem:[#allocation53_spill] sm:$0xff]  ;;  %v8547_v35 = vld [vmem:[#allocation50_spill] sm:$0xff] }
 0x45a   :  { %4542 = vmatpush1.bf16.msra.mxu1 %v8537_v52  ;;  %v8548_v52 = vld [vmem:[#allocation52_spill] sm:$0xff] }
 0x45b   :  { %4544 = vmatprep.subr.bf16.mxu1 %v8538_v0  ;;  %v8549_v0 = vld [vmem:[#allocation55_spill] sm:$0xff] }
 0x45c   :  { %4482 = vmatpush1.bf16.msra.mxu0 %v8539_v3  ;;  %v8550_v3 = vld [vmem:[#allocation56_spill] sm:$0xff] }
 0x45d   :  { %4484 = vmatprep.subr.bf16.mxu0 %v8540_v48  ;;  %v8551_v48 = vld [vmem:[#allocation54_spill] sm:$0xff] }
 0x45e   :  { %4546 = vmatpush1.bf16.msra.mxu1 %v8541_v17  ;;  %v8552_v17 = vld [vmem:[#allocation58_spill] sm:$0xff] }
 0x45f   :  { %4548 = vmatprep.subr.bf16.mxu1 %v8542_v23  ;;  %v8553_v23 = vld [vmem:[#allocation57_spill] sm:$0xff] }
 0x460   :  { %4486 = vmatpush1.bf16.msra.mxu0 %v8543_v41  ;;  %v8554_v41 = vld [vmem:[#allocation60_spill] sm:$0xff] }
 0x461   :  { %4488 = vmatprep.subr.bf16.mxu0 %v8544_v24  ;;  %v8555_v24 = vld [vmem:[#allocation59_spill] sm:$0xff] }
 0x462   :  { %4550 = vmatpush1.bf16.msra.mxu1 %v8545_v60  ;;  %v8556_v60 = vld [vmem:[#allocation62_spill] sm:$0xff] }
 0x463   :  { %4552 = vmatprep.subr.bf16.mxu1 %v8546_v5  ;;  %v8557_v5 = vld [vmem:[#allocation61_spill] sm:$0xff] }
 0x464   :  { %4490 = vmatpush1.bf16.msra.mxu0 %v8547_v35  ;;  %v8558_v35 = vld [vmem:[#allocation64_spill] sm:$0xff] }
 0x465   :  { %4492 = vmatprep.subr.bf16.mxu0 %v8548_v52  ;;  %v8559_v52 = vld [vmem:[#allocation63_spill] sm:$0xff] }
 0x466   :  { %4554 = vmatpush1.bf16.msra.mxu1 %v8549_v0  ;;  %v8560_v0 = vld [vmem:[#allocation66_spill] sm:$0xff] }
 0x467   :  { %4556 = vmatprep.subr.bf16.mxu1 %v8550_v3  ;;  %v8561_v3 = vld [vmem:[#allocation65_spill] sm:$0xff] }
 0x468   :  { %4494 = vmatpush1.bf16.msra.mxu0 %v8551_v48  ;;  %v8562_v48 = vld [vmem:[#allocation68_spill] sm:$0xff] }
 0x469   :  { %4496 = vmatprep.subr.bf16.mxu0 %v8552_v17  ;;  %v8563_v17 = vld [vmem:[#allocation67_spill] sm:$0xff] }
 0x46a   :  { %4558 = vmatpush1.bf16.msra.mxu1 %v8553_v23  ;;  %v8564_v23 = vld [vmem:[#allocation70_spill] sm:$0xff] }
 0x46b   :  { %4560 = vmatprep.subr.bf16.mxu1 %v8554_v41  ;;  %v8565_v41 = vld [vmem:[#allocation69_spill] sm:$0xff] }
 0x46c   :  { %4498 = vmatpush1.bf16.msra.mxu0 %v8555_v24  ;;  %v8566_v24 = vld [vmem:[#allocation72_spill] sm:$0xff] }
 0x46d   :  { %4500 = vmatprep.subr.bf16.mxu0 %v8556_v60  ;;  %v8567_v60 = vld [vmem:[#allocation71_spill] sm:$0xff] }
 0x46e   :  { %4562 = vmatpush1.bf16.msra.mxu1 %v8557_v5  ;;  %v8568_v5 = vld [vmem:[#allocation74_spill] sm:$0xff] }
 0x46f   :  { %4564 = vmatprep.subr.bf16.mxu1 %v8558_v35  ;;  %v8569_v35 = vld [vmem:[#allocation73_spill] sm:$0xff] }
 0x470   :  { %4502 = vmatpush1.bf16.msra.mxu0 %v8559_v52  ;;  %v8570_v52 = vld [vmem:[#allocation76_spill] sm:$0xff] }
 0x471   :  { %4504 = vmatprep.subr.bf16.mxu0 %v8560_v0  ;;  %v8571_v0 = vld [vmem:[#allocation75_spill] sm:$0xff] }
 0x472   :  { %4566 = vmatpush1.bf16.msra.mxu1 %v8561_v3  ;;  %v8572_v3 = vld [vmem:[#allocation78_spill] sm:$0xff] }
 0x473   :  { %4568 = vmatprep.subr.bf16.mxu1 %v8562_v48  ;;  %v8573_v48 = vld [vmem:[#allocation77_spill] sm:$0xff] }
 0x474   :  { %4506 = vmatpush1.bf16.msra.mxu0 %v8563_v17  ;;  %v8574_v17 = vld [vmem:[#allocation80_spill] sm:$0xff] }
 0x475   :  { %4508 = vmatprep.subr.bf16.mxu0 %v8564_v23  ;;  %v8575_v23 = vld [vmem:[#allocation79_spill] sm:$0xff] }
 0x476   :  { %4570 = vmatpush1.bf16.msra.mxu1 %v8565_v41  ;;  %v8576_v41 = vld [vmem:[#allocation82_spill] sm:$0xff] }
 0x477   :  { %4572 = vmatprep.subr.bf16.mxu1 %v8566_v24  ;;  %v8577_v24 = vld [vmem:[#allocation81_spill] sm:$0xff] }
 0x478   :  { %4510 = vmatpush1.bf16.msra.mxu0 %v8567_v60  ;;  %v8578_v60 = vld [vmem:[#allocation84_spill] sm:$0xff] }
 0x479   :  { %4512 = vmatprep.subr.bf16.mxu0 %v8568_v5  ;;  %v8579_v5 = vld [vmem:[#allocation83_spill] sm:$0xff] }
 0x47a   :  { %4574 = vmatpush1.bf16.msra.mxu1 %v8569_v35  ;;  %v8580_v35 = vld [vmem:[#allocation86_spill] sm:$0xff] }
 0x47b   :  { %4576 = vmatprep.subr.bf16.mxu1 %v8570_v52  ;;  %v8581_v52 = vld [vmem:[#allocation85_spill] sm:$0xff] }
 0x47c   :  { %4514 = vmatpush1.bf16.msra.mxu0 %v8571_v0  ;;  %v8582_v0 = vld [vmem:[#allocation88_spill] sm:$0xff] }
 0x47d   :  { %4516 = vmatprep.subr.bf16.mxu0 %v8572_v3  ;;  %v8583_v3 = vld [vmem:[#allocation87_spill] sm:$0xff] }
 0x47e   :  { %4578 = vmatpush1.bf16.msra.mxu1 %v8573_v48  ;;  %v8584_v48 = vld [vmem:[#allocation90_spill] sm:$0xff] }
 0x47f   :  { %4580 = vmatprep.subr.bf16.mxu1 %v8574_v17  ;;  %v8585_v17 = vld [vmem:[#allocation89_spill] sm:$0xff] }
 0x480   :  { %4518 = vmatpush1.bf16.msra.mxu0 %v8575_v23  ;;  %v8586_v23 = vld [vmem:[#allocation92_spill] sm:$0xff] }
 0x481   :  { %4520 = vmatprep.subr.bf16.mxu0 %v8576_v41  ;;  %v8587_v41 = vld [vmem:[#allocation91_spill] sm:$0xff] }
 0x482   :  { %4582 = vmatpush1.bf16.msra.mxu1 %v8577_v24  ;;  %v8588_v24 = vld [vmem:[#allocation94_spill] sm:$0xff] }
 0x483   :  { %4584 = vmatprep.subr.bf16.mxu1 %v8578_v60  ;;  %v8589_v60 = vld [vmem:[#allocation93_spill] sm:$0xff] }
 0x484   :  { %4522 = vmatpush1.bf16.msra.mxu0 %v8579_v5  ;;  %v8590_v5 = vld [vmem:[#allocation96_spill] sm:$0xff] }
 0x485   :  { %4524 = vmatprep.subr.bf16.mxu0 %v8580_v35  ;;  %v8591_v35 = vld [vmem:[#allocation95_spill] sm:$0xff] }
 0x486   :  { %4586 = vmatpush1.bf16.msra.mxu1 %v8581_v52  ;;  %v8592_v52 = vld [vmem:[#allocation98_spill] sm:$0xff] }
 0x487   :  { %4588 = vmatprep.subr.bf16.mxu1 %v8582_v0  ;;  %v8593_v0 = vld [vmem:[#allocation97_spill] sm:$0xff] }
 0x488   :  { %4526 = vmatpush1.bf16.msra.mxu0 %v8583_v3  ;;  %v8594_v3 = vld [vmem:[#allocation100_spill] sm:$0xff] }
 0x489   :  { %4528 = vmatprep.subr.bf16.mxu0 %v8584_v48  ;;  %v8595_v48 = vld [vmem:[#allocation99_spill] sm:$0xff] }
 0x48a   :  { %4590 = vmatpush1.bf16.msra.mxu1 %v8585_v17  ;;  %v8596_v17 = vld [vmem:[#allocation13_spill] sm:$0xff] }
 0x48b   :  { %4592 = vmatprep.subr.bf16.mxu1 %v8586_v23  ;;  %v8597_v23 = vld [vmem:[#allocation101_spill] sm:$0xff] }
 0x48c   :  { %4530 = vmatpush1.bf16.msra.mxu0 %v8587_v41  ;;  %v8598_v41 = vld [vmem:[#allocation14_spill] sm:$0xff] }
 0x48d   :  { %4532 = vmatprep.subr.bf16.mxu0 %v8588_v24 }
 0x48e   :  { %4594 = vmatpush1.bf16.msra.mxu1 %v8589_v60 }
 0x48f   :  { %4596 = vmatprep.subr.bf16.mxu1 %v8590_v5 }
 0x490   :  { %4534 = vmatpush1.bf16.msra.mxu0 %v8591_v35 }
 0x491   :  { %4536 = vmatprep.subr.bf16.mxu0 %v8592_v52 }
 0x492   :  { %4598 = vmatpush1.bf16.msra.mxu1 %v8593_v0 }
 0x493   :  { %4600 = vmatprep.subr.bf16.mxu1 %v8594_v3 }
 0x494   :  { %4538 = vmatpush1.bf16.msra.mxu0 %v8595_v48 }
 0x495   :  { %4604 = vmatprep.subr.bf16.mxu0 %v8596_v17 }
 0x496   :  { %4602 = vmatpush1.bf16.msra.mxu1 %v8597_v23 }
 0x497   :  { %4668 = vmatprep.subr.bf16.mxu1 %v8598_v41 }
 0x4ea   :  { %v1342_v24 = vpop.f32.mrb[10].mxu0  ;;  %v1413_v60 = vpop.f32.mrb[10].mxu1 }
 0x4eb   :  { %v1343_v5 = vadd.f32 %v1342_v24, %v8599_v1  ;;  %v1344_v57 = vpop.f32.mrb[11].mxu0  ;;  %v1415_v35 = vpop.f32.mrb[11].mxu1  ;;  %v1414_v17 = vadd.f32 %v1413_v60, %v8507_v30 }
 0x4ec   :  { %v1345_v52 = vadd.f32 %v1344_v57, %v8600_v55  ;;  %v1416_v48 = vadd.f32 %v1415_v35, %v8506_v20 }
 0x4ed   :  { %v3499_v39 = vmul.f32 -1.442695, %v1343_v5 }
 0x4ee   :  { %v3500_v0 = vmul.f32 -1.442695, %v1345_v52  ;;  %v3501_v3 = vmul.f32 -1.442695, %v1416_v48 }
 0x4ef   :  { %5815 = vpow2.f32 %v3499_v39 }
 0x4f0   :  { %5817 = vpow2.f32 %v3500_v0 }
 0x4f1   :  { %5819 = vpow2.f32 %v3501_v3 }
 0x4f2   :  { %5821 = vtanh.f32 %v1414_v17 }
 0x4f9   :  { %v5816_v23 = vpop.eup %5815 }
 0x4fa   :  { %v5818_v45 = vpop.eup %5817  ;;  %v1421_v41 = vadd.f32 1.0, %v5816_v23 }
 0x4fb   :  { %v1427_v50 = vadd.f32 1.0, %v5818_v45  ;;  %v5820_v24 = vpop.eup %5819 }
 0x4fc   :  { %5823 = vrcp.f32 %v1421_v41  ;;  %v5822_v1 = vpop.eup %5821  ;;  %v1434_v39 = vadd.f32 1.0, %v5820_v24  ;;  %v8603_v41 = vld [vmem:[#allocation106_spill] sm:$0xff] }
 0x4fd   :  { %5825 = vrcp.f32 %v1427_v50 }
 0x4fe   :  { %5827 = vrcp.f32 %v1434_v39 }
 0x506   :  { %v5824_v57 = vpop.eup %5823 }
 0x507   :  { %v5826_v5 = vpop.eup %5825  ;;  %v1438_v52 = vmul.f32 %v5824_v57, %v5822_v1  ;;  %v8602_v1 = vld [vmem:[#allocation105_spill] sm:$0xff] }
 0x508   :  { %v1437_v0 = vmul.f32 %v5826_v5, %v6992_v4  ;;  %v5828_v48 = vpop.eup %5827 }
 0x50a   :  { %v7145_v35 = vadd.f32 %v1438_v52, %v1437_v0 }
 0x50c   :  { %5829 = vtanh.f32 %v7145_v35 }
 0x516   :  { %v5830_v23 = vpop.eup %5829 }
 0x517   :  { %v7148_v3 = vmul.f32 %v5830_v23, %v5828_v48 }
 0x519   :  { %8601 = vst [vmem:[#allocation102_spill] sm:$0xff] %v7148_v3  ;;  %1691 = vmatprep.mubr.f32.mxu0 %v7148_v3  ;;  %1762 = vmatprep.mubr.f32.mxu1 %v7148_v3  ;;  %v1442_v50 = vmul.f32 %v6840_v7, %v7148_v3 }
 0x51b   :  { %1443 = vadd.xlane.f32.xlu1 %v1442_v50 }
 0x52a   :  { %v1527_v45 = vpop.f32.mrb[12].mxu0 }
 0x52b   :  { %v1528_v4 = vadd.f32 %v1527_v45, %v8602_v1  ;;  %v1529_v17 = vpop.f32.mrb[13].mxu0 }
 0x52c   :  { %v1530_v60 = vadd.f32 %v1529_v17, %v8603_v41  ;;  %v1598_v24 = vpop.f32.mrb[12].mxu1 }
 0x52d   :  { %v3504_v57 = vmul.f32 -1.442695, %v1528_v4  ;;  %v1600_v5 = vpop.f32.mrb[13].mxu1  ;;  %v1599_v48 = vadd.f32 %v1598_v24, %v6679_v14 }
 0x52e   :  { %v3505_v52 = vmul.f32 -1.442695, %v1530_v60  ;;  %v1601_v39 = vadd.f32 %v1600_v5, %v8419_v13 }
 0x52f   :  { %5831 = vpow2.f32 %v3504_v57 }
 0x530   :  { %5833 = vpow2.f32 %v3505_v52  ;;  %v3506_v0 = vmul.f32 -1.442695, %v1601_v39 }
 0x532   :  { %5835 = vpow2.f32 %v3506_v0 }
 0x533   :  { %5837 = vtanh.f32 %v1599_v48  ;;  %v8607_v48 = vld [vmem:[#allocation21_spill] sm:$0xff] }
 0x539   :  { %v5832_v23 = vpop.eup %5831 }
 0x53a   :  { %v5834_v7 = vpop.eup %5833  ;;  %v1606_v50 = vadd.f32 1.0, %v5832_v23  ;;  %v8608_v23 = vld [vmem:[#allocation18_spill] sm:$0xff] }
 0x53b   :  { %v1612_v45 = vadd.f32 1.0, %v5834_v7  ;;  %v8609_v7 = vld [vmem:[#allocation19_spill] sm:$0xff] }
 0x53c   :  { %5839 = vrcp.f32 %v1606_v50  ;;  %v5836_v17 = vpop.eup %5835  ;;  %v8610_v50 = vld [vmem:[#allocation24_spill] sm:$0xff] }
 0x53d   :  { %5841 = vrcp.f32 %v1612_v45  ;;  %v5838_v3 = vpop.eup %5837  ;;  %v1619_v41 = vadd.f32 1.0, %v5836_v17  ;;  %v8611_v45 = vld [vmem:[#allocation25_spill] sm:$0xff]  ;;  %v8612_v17 = vld [vmem:[#allocation22_spill] sm:$0xff] }
 0x53f   :  { %5843 = vrcp.f32 %v1619_v41  ;;  %v8606_v41 = vld [vmem:[#allocation20_spill] sm:$0xff] }
 0x546   :  { %v5840_v4 = vpop.eup %5839 }
 0x547   :  { %v5842_v60 = vpop.eup %5841  ;;  %v1623_v57 = vmul.f32 %v5840_v4, %v5838_v3  ;;  %v8605_v3 = vld [vmem:[#allocation16_spill] sm:$0xff]  ;;  %v8613_v4 = vld [vmem:[#allocation23_spill] sm:$0xff] }
 0x548   :  { %v1622_v52 = vmul.f32 %v5842_v60, %v7006_v29  ;;  %v8604_v29 = vld [vmem:[#allocation15_spill] sm:$0xff]  ;;  %v8614_v60 = vld [vmem:[#allocation28_spill] sm:$0xff] }
 0x549   :  { %v5844_v24 = vpop.eup %5843 }
 0x54a   :  { %v7159_v5 = vadd.f32 %v1623_v57, %v1622_v52  ;;  %v8615_v57 = vld [vmem:[#allocation29_spill] sm:$0xff]  ;;  %v8616_v52 = vld [vmem:[#allocation26_spill] sm:$0xff] }
 0x54c   :  { %5845 = vtanh.f32 %v7159_v5 }
 0x556   :  { %v5846_v39 = vpop.eup %5845 }
 0x557   :  { %v1626_v0 = vmul.f32 %v5846_v39, %v5844_v24  ;;  %v8617_v24 = vld [vmem:[#allocation27_spill] sm:$0xff]  ;;  %v8618_v39 = vld [vmem:[#allocation32_spill] sm:$0xff] }
 0x559   :  { %1692 = vmatmul.mubr.f32.vlgmr.msra.gmra.mrb[14].mxu0 %v1626_v0  ;;  %1763 = vmatmul.mubr.f32.vlgmr.msra.gmra.mrb[14].mxu1 %v1626_v0 }
 0x55a   :  { %4606 = vmatpush1.bf16.msra.mxu0 %v6262_v9  ;;  %1876 = vmatprep.mubr.f32.mxu0 %v1626_v0 }
 0x55b   :  { %1947 = vmatprep.mubr.f32.mxu1 %v1626_v0  ;;  %4608 = vmatprep.subr.bf16.mxu0 %v6264_v10  ;;  %v8619_v0 = vld [vmem:[#allocation33_spill] sm:$0xff] }
 0x55c   :  { %4670 = vmatpush1.bf16.msra.mxu1 %v6275_v26 }
 0x55d   :  { %4672 = vmatprep.subr.bf16.mxu1 %v6285_v34 }
 0x55e   :  { %4610 = vmatpush1.bf16.msra.mxu0 %v6268_v15 }
 0x55f   :  { %4612 = vmatprep.subr.bf16.mxu0 %v6271_v18 }
 0x560   :  { %4674 = vmatpush1.bf16.msra.mxu1 %v6287_v38 }
 0x561   :  { %4676 = vmatprep.subr.bf16.mxu1 %v6293_v46 }
 0x562   :  { %4614 = vmatpush1.bf16.msra.mxu0 %v6278_v27 }
 0x563   :  { %4616 = vmatprep.subr.bf16.mxu0 %v6282_v31 }
 0x564   :  { %4678 = vmatpush1.bf16.msra.mxu1 %v6299_v49 }
 0x565   :  { %4680 = vmatprep.subr.bf16.mxu1 %v6302_v53 }
 0x566   :  { %4618 = vmatpush1.bf16.msra.mxu0 %v6291_v43 }
 0x567   :  { %4620 = vmatprep.subr.bf16.mxu0 %v6296_v47 }
 0x568   :  { %4682 = vmatpush1.bf16.msra.mxu1 %v6311_v63 }
 0x569   :  { %4684 = vmatprep.subr.bf16.mxu1 %v6314_v2 }
 0x56a   :  { %4622 = vmatpush1.bf16.msra.mxu0 %v6305_v56 }
 0x56b   :  { %4624 = vmatprep.subr.bf16.mxu0 %v6308_v59 }
 0x56c   :  { %4686 = vmatpush1.bf16.msra.mxu1 %v6323_v16 }
 0x56d   :  { %4688 = vmatprep.subr.bf16.mxu1 %v6326_v19 }
 0x56e   :  { %4626 = vmatpush1.bf16.msra.mxu0 %v6317_v8 }
 0x56f   :  { %4628 = vmatprep.subr.bf16.mxu0 %v6320_v11 }
 0x570   :  { %4690 = vmatpush1.bf16.msra.mxu1 %v6335_v33 }
 0x571   :  { %4692 = vmatprep.subr.bf16.mxu1 %v6338_v36 }
 0x572   :  { %4630 = vmatpush1.bf16.msra.mxu0 %v6329_v25 }
 0x573   :  { %4632 = vmatprep.subr.bf16.mxu0 %v6332_v28 }
 0x574   :  { %4694 = vmatpush1.bf16.msra.mxu1 %v6347_v51 }
 0x575   :  { %4696 = vmatprep.subr.bf16.mxu1 %v6350_v54 }
 0x576   :  { %4634 = vmatpush1.bf16.msra.mxu0 %v6341_v42 }
 0x577   :  { %4636 = vmatprep.subr.bf16.mxu0 %v6344_v44 }
 0x578   :  { %4698 = vmatpush1.bf16.msra.mxu1 %v6359_v6 }
 0x579   :  { %4700 = vmatprep.subr.bf16.mxu1 %v6362_v12 }
 0x57a   :  { %4638 = vmatpush1.bf16.msra.mxu0 %v6353_v61 }
 0x57b   :  { %4640 = vmatprep.subr.bf16.mxu0 %v6356_v62 }
 0x57c   :  { %4702 = vmatpush1.bf16.msra.mxu1 %v6371_v32 }
 0x57d   :  { %4704 = vmatprep.subr.bf16.mxu1 %v6374_v37 }
 0x57e   :  { %4642 = vmatpush1.bf16.msra.mxu0 %v6365_v21 }
 0x57f   :  { %4644 = vmatprep.subr.bf16.mxu0 %v6368_v22 }
 0x580   :  { %4706 = vmatpush1.bf16.msra.mxu1 %v6383_v58 }
 0x581   :  { %4708 = vmatprep.subr.bf16.mxu1 %v8324_v40 }
 0x582   :  { %4646 = vmatpush1.bf16.msra.mxu0 %v8604_v29 }
 0x583   :  { %4648 = vmatprep.subr.bf16.mxu0 %v8605_v3 }
 0x584   :  { %4710 = vmatpush1.bf16.msra.mxu1 %v8606_v41 }
 0x585   :  { %4712 = vmatprep.subr.bf16.mxu1 %v8607_v48 }
 0x586   :  { %4650 = vmatpush1.bf16.msra.mxu0 %v8608_v23  ;;  %v8692_v23 = vld [vmem:[#allocation17_spill] sm:$0xff] }
 0x587   :  { %4652 = vmatprep.subr.bf16.mxu0 %v8609_v7  ;;  %v8620_v7 = vld [vmem:[#allocation30_spill] sm:$0xff] }
 0x588   :  { %4714 = vmatpush1.bf16.msra.mxu1 %v8610_v50  ;;  %v8621_v50 = vld [vmem:[#allocation31_spill] sm:$0xff] }
 0x589   :  { %4716 = vmatprep.subr.bf16.mxu1 %v8611_v45  ;;  %v8622_v45 = vld [vmem:[#allocation35_spill] sm:$0xff] }
 0x58a   :  { %4654 = vmatpush1.bf16.msra.mxu0 %v8612_v17  ;;  %v8623_v17 = vld [vmem:[#allocation37_spill] sm:$0xff] }
 0x58b   :  { %4656 = vmatprep.subr.bf16.mxu0 %v8613_v4  ;;  %v8624_v4 = vld [vmem:[#allocation34_spill] sm:$0xff] }
 0x58c   :  { %4718 = vmatpush1.bf16.msra.mxu1 %v8614_v60  ;;  %v8634_v60 = vld [vmem:[#allocation47_spill] sm:$0xff] }
 0x58d   :  { %4720 = vmatprep.subr.bf16.mxu1 %v8615_v57  ;;  %v8625_v57 = vld [vmem:[#allocation36_spill] sm:$0xff] }
 0x58e   :  { %4658 = vmatpush1.bf16.msra.mxu0 %v8616_v52  ;;  %v3511_v52 = vld [vmem:[%s8003_s0 + $0x20] sm:$0xff] }
 0x58f   :  { %4660 = vmatprep.subr.bf16.mxu0 %v8617_v24  ;;  %v8626_v24 = vld [vmem:[#allocation39_spill] sm:$0xff] }
 0x590   :  { %4722 = vmatpush1.bf16.msra.mxu1 %v8618_v39  ;;  %v8633_v39 = vld [vmem:[#allocation44_spill] sm:$0xff] }
 0x591   :  { %4724 = vmatprep.subr.bf16.mxu1 %v8619_v0  ;;  %v8627_v0 = vld [vmem:[#allocation41_spill] sm:$0xff] }
 0x592   :  { %4662 = vmatpush1.bf16.msra.mxu0 %v8620_v7  ;;  %v8628_v7 = vld [vmem:[#allocation38_spill] sm:$0xff] }
 0x593   :  { %4664 = vmatprep.subr.bf16.mxu0 %v8621_v50  ;;  %v8629_v50 = vld [vmem:[#allocation40_spill] sm:$0xff] }
 0x594   :  { %4726 = vmatpush1.bf16.msra.mxu1 %v8622_v45  ;;  %v8630_v45 = vld [vmem:[#allocation43_spill] sm:$0xff] }
 0x595   :  { %4728 = vmatprep.subr.bf16.mxu1 %v8623_v17  ;;  %v8631_v17 = vld [vmem:[#allocation45_spill] sm:$0xff] }
 0x596   :  { %4666 = vmatpush1.bf16.msra.mxu0 %v8624_v4  ;;  %v8632_v4 = vld [vmem:[#allocation42_spill] sm:$0xff] }
 0x597   :  { %4732 = vmatprep.subr.bf16.mxu0 %v8625_v57  ;;  %v8635_v57 = vld [vmem:[#allocation49_spill] sm:$0xff] }
 0x598   :  { %4730 = vmatpush1.bf16.msra.mxu1 %v8626_v24  ;;  %v8636_v24 = vld [vmem:[#allocation46_spill] sm:$0xff] }
 0x599   :  { %1877 = vmatmul.mubr.f32.vlgmr.msra.gmra.mrb[16].mxu0 %v3511_v52  ;;  %4796 = vmatprep.subr.bf16.mxu1 %v8627_v0  ;;  %v8637_v0 = vld [vmem:[#allocation48_spill] sm:$0xff] }
 0x59a   :  { %4734 = vmatpush1.bf16.msra.mxu0 %v8628_v7  ;;  %v8638_v7 = vld [vmem:[#allocation51_spill] sm:$0xff] }
 0x59b   :  { %1948 = vmatmul.mubr.f32.vlgmr.msra.gmra.mrb[16].mxu1 %v3511_v52  ;;  %4736 = vmatprep.subr.bf16.mxu0 %v8629_v50  ;;  %v8639_v52 = vld [vmem:[#allocation53_spill] sm:$0xff]  ;;  %v8640_v50 = vld [vmem:[#allocation50_spill] sm:$0xff] }
 0x59c   :  { %4798 = vmatpush1.bf16.msra.mxu1 %v8630_v45  ;;  %v8641_v45 = vld [vmem:[#allocation52_spill] sm:$0xff] }
 0x59d   :  { %4800 = vmatprep.subr.bf16.mxu1 %v8631_v17  ;;  %v8642_v17 = vld [vmem:[#allocation55_spill] sm:$0xff] }
 0x59e   :  { %4738 = vmatpush1.bf16.msra.mxu0 %v8632_v4  ;;  %v8643_v4 = vld [vmem:[#allocation56_spill] sm:$0xff] }
 0x59f   :  { %4740 = vmatprep.subr.bf16.mxu0 %v8633_v39  ;;  %v8644_v39 = vld [vmem:[#allocation54_spill] sm:$0xff] }
 0x5a0   :  { %4802 = vmatpush1.bf16.msra.mxu1 %v8634_v60  ;;  %v8645_v60 = vld [vmem:[#allocation58_spill] sm:$0xff] }
 0x5a1   :  { %4804 = vmatprep.subr.bf16.mxu1 %v8635_v57  ;;  %v8646_v57 = vld [vmem:[#allocation57_spill] sm:$0xff] }
 0x5a2   :  { %4742 = vmatpush1.bf16.msra.mxu0 %v8636_v24  ;;  %v8647_v24 = vld [vmem:[#allocation60_spill] sm:$0xff] }
 0x5a3   :  { %4744 = vmatprep.subr.bf16.mxu0 %v8637_v0  ;;  %v8648_v0 = vld [vmem:[#allocation59_spill] sm:$0xff] }
 0x5a4   :  { %4806 = vmatpush1.bf16.msra.mxu1 %v8638_v7  ;;  %v8649_v7 = vld [vmem:[#allocation62_spill] sm:$0xff] }
 0x5a5   :  { %4808 = vmatprep.subr.bf16.mxu1 %v8639_v52  ;;  %v8650_v52 = vld [vmem:[#allocation61_spill] sm:$0xff] }
 0x5a6   :  { %4746 = vmatpush1.bf16.msra.mxu0 %v8640_v50  ;;  %v8651_v50 = vld [vmem:[#allocation64_spill] sm:$0xff] }
 0x5a7   :  { %4748 = vmatprep.subr.bf16.mxu0 %v8641_v45  ;;  %v8652_v45 = vld [vmem:[#allocation63_spill] sm:$0xff] }
 0x5a8   :  { %4810 = vmatpush1.bf16.msra.mxu1 %v8642_v17  ;;  %v8653_v17 = vld [vmem:[#allocation66_spill] sm:$0xff] }
 0x5a9   :  { %4812 = vmatprep.subr.bf16.mxu1 %v8643_v4  ;;  %v8654_v4 = vld [vmem:[#allocation65_spill] sm:$0xff] }
 0x5aa   :  { %4750 = vmatpush1.bf16.msra.mxu0 %v8644_v39  ;;  %v8655_v39 = vld [vmem:[#allocation68_spill] sm:$0xff] }
 0x5ab   :  { %4752 = vmatprep.subr.bf16.mxu0 %v8645_v60  ;;  %v8656_v60 = vld [vmem:[#allocation67_spill] sm:$0xff] }
 0x5ac   :  { %4814 = vmatpush1.bf16.msra.mxu1 %v8646_v57  ;;  %v8657_v57 = vld [vmem:[#allocation70_spill] sm:$0xff] }
 0x5ad   :  { %4816 = vmatprep.subr.bf16.mxu1 %v8647_v24  ;;  %v8658_v24 = vld [vmem:[#allocation69_spill] sm:$0xff] }
 0x5ae   :  { %4754 = vmatpush1.bf16.msra.mxu0 %v8648_v0  ;;  %v8659_v0 = vld [vmem:[#allocation72_spill] sm:$0xff] }
 0x5af   :  { %4756 = vmatprep.subr.bf16.mxu0 %v8649_v7  ;;  %v8660_v7 = vld [vmem:[#allocation71_spill] sm:$0xff] }
 0x5b0   :  { %4818 = vmatpush1.bf16.msra.mxu1 %v8650_v52  ;;  %v8661_v52 = vld [vmem:[#allocation74_spill] sm:$0xff] }
 0x5b1   :  { %4820 = vmatprep.subr.bf16.mxu1 %v8651_v50  ;;  %v8662_v50 = vld [vmem:[#allocation73_spill] sm:$0xff] }
 0x5b2   :  { %4758 = vmatpush1.bf16.msra.mxu0 %v8652_v45  ;;  %v8663_v45 = vld [vmem:[#allocation76_spill] sm:$0xff] }
 0x5b3   :  { %4760 = vmatprep.subr.bf16.mxu0 %v8653_v17  ;;  %v8664_v17 = vld [vmem:[#allocation75_spill] sm:$0xff] }
 0x5b4   :  { %4822 = vmatpush1.bf16.msra.mxu1 %v8654_v4  ;;  %v8665_v4 = vld [vmem:[#allocation78_spill] sm:$0xff] }
 0x5b5   :  { %4824 = vmatprep.subr.bf16.mxu1 %v8655_v39  ;;  %v8666_v39 = vld [vmem:[#allocation77_spill] sm:$0xff] }
 0x5b6   :  { %4762 = vmatpush1.bf16.msra.mxu0 %v8656_v60  ;;  %v8667_v60 = vld [vmem:[#allocation80_spill] sm:$0xff] }
 0x5b7   :  { %4764 = vmatprep.subr.bf16.mxu0 %v8657_v57  ;;  %v8668_v57 = vld [vmem:[#allocation79_spill] sm:$0xff] }
 0x5b8   :  { %4826 = vmatpush1.bf16.msra.mxu1 %v8658_v24  ;;  %v8669_v24 = vld [vmem:[#allocation82_spill] sm:$0xff] }
 0x5b9   :  { %4828 = vmatprep.subr.bf16.mxu1 %v8659_v0  ;;  %v8670_v0 = vld [vmem:[#allocation81_spill] sm:$0xff] }
 0x5ba   :  { %4766 = vmatpush1.bf16.msra.mxu0 %v8660_v7  ;;  %v8671_v7 = vld [vmem:[#allocation84_spill] sm:$0xff] }
 0x5bb   :  { %4768 = vmatprep.subr.bf16.mxu0 %v8661_v52  ;;  %v8672_v52 = vld [vmem:[#allocation83_spill] sm:$0xff] }
 0x5bc   :  { %4830 = vmatpush1.bf16.msra.mxu1 %v8662_v50  ;;  %v8673_v50 = vld [vmem:[#allocation86_spill] sm:$0xff] }
 0x5bd   :  { %4832 = vmatprep.subr.bf16.mxu1 %v8663_v45  ;;  %v8674_v45 = vld [vmem:[#allocation85_spill] sm:$0xff] }
 0x5be   :  { %4770 = vmatpush1.bf16.msra.mxu0 %v8664_v17  ;;  %v8675_v17 = vld [vmem:[#allocation88_spill] sm:$0xff] }
 0x5bf   :  { %4772 = vmatprep.subr.bf16.mxu0 %v8665_v4  ;;  %v8676_v4 = vld [vmem:[#allocation87_spill] sm:$0xff] }
 0x5c0   :  { %4834 = vmatpush1.bf16.msra.mxu1 %v8666_v39  ;;  %v8677_v39 = vld [vmem:[#allocation90_spill] sm:$0xff] }
 0x5c1   :  { %4836 = vmatprep.subr.bf16.mxu1 %v8667_v60  ;;  %v8678_v60 = vld [vmem:[#allocation89_spill] sm:$0xff] }
 0x5c2   :  { %4774 = vmatpush1.bf16.msra.mxu0 %v8668_v57  ;;  %v8679_v57 = vld [vmem:[#allocation92_spill] sm:$0xff] }
 0x5c3   :  { %4776 = vmatprep.subr.bf16.mxu0 %v8669_v24  ;;  %v8680_v24 = vld [vmem:[#allocation91_spill] sm:$0xff] }
 0x5c4   :  { %4838 = vmatpush1.bf16.msra.mxu1 %v8670_v0  ;;  %v8681_v0 = vld [vmem:[#allocation94_spill] sm:$0xff] }
 0x5c5   :  { %4840 = vmatprep.subr.bf16.mxu1 %v8671_v7  ;;  %v8682_v7 = vld [vmem:[#allocation93_spill] sm:$0xff] }
 0x5c6   :  { %4778 = vmatpush1.bf16.msra.mxu0 %v8672_v52  ;;  %v8683_v52 = vld [vmem:[#allocation96_spill] sm:$0xff] }
 0x5c7   :  { %4780 = vmatprep.subr.bf16.mxu0 %v8673_v50  ;;  %v8684_v50 = vld [vmem:[#allocation95_spill] sm:$0xff] }
 0x5c8   :  { %4842 = vmatpush1.bf16.msra.mxu1 %v8674_v45  ;;  %v8685_v45 = vld [vmem:[#allocation98_spill] sm:$0xff] }
 0x5c9   :  { %4844 = vmatprep.subr.bf16.mxu1 %v8675_v17  ;;  %v8686_v17 = vld [vmem:[#allocation97_spill] sm:$0xff] }
 0x5ca   :  { %4782 = vmatpush1.bf16.msra.mxu0 %v8676_v4  ;;  %v8687_v4 = vld [vmem:[#allocation100_spill] sm:$0xff] }
 0x5cb   :  { %4784 = vmatprep.subr.bf16.mxu0 %v8677_v39  ;;  %v8688_v39 = vld [vmem:[#allocation99_spill] sm:$0xff] }
 0x5cc   :  { %4846 = vmatpush1.bf16.msra.mxu1 %v8678_v60  ;;  %v8689_v60 = vld [vmem:[#allocation13_spill] sm:$0xff] }
 0x5cd   :  { %4848 = vmatprep.subr.bf16.mxu1 %v8679_v57  ;;  %v8690_v57 = vld [vmem:[#allocation101_spill] sm:$0xff] }
 0x5ce   :  { %4786 = vmatpush1.bf16.msra.mxu0 %v8680_v24  ;;  %v8691_v24 = vld [vmem:[#allocation14_spill] sm:$0xff] }
 0x5cf   :  { %4788 = vmatprep.subr.bf16.mxu0 %v8681_v0 }
 0x5d0   :  { %4850 = vmatpush1.bf16.msra.mxu1 %v8682_v7 }
 0x5d1   :  { %4852 = vmatprep.subr.bf16.mxu1 %v8683_v52 }
 0x5d2   :  { %4790 = vmatpush1.bf16.msra.mxu0 %v8684_v50 }
 0x5d3   :  { %4792 = vmatprep.subr.bf16.mxu0 %v8685_v45 }
 0x5d4   :  { %4854 = vmatpush1.bf16.msra.mxu1 %v8686_v17 }
 0x5d5   :  { %4856 = vmatprep.subr.bf16.mxu1 %v8687_v4 }
 0x5d6   :  { %4794 = vmatpush1.bf16.msra.mxu0 %v8688_v39 }
 0x5d7   :  { %4860 = vmatprep.subr.bf16.mxu0 %v8689_v60 }
 0x5d8   :  { %4858 = vmatpush1.bf16.msra.mxu1 %v8690_v57 }
 0x5d9   :  { %4924 = vmatprep.subr.bf16.mxu1 %v8691_v24 }
 0x62c   :  { %v1693_v0 = vpop.f32.mrb[14].mxu0  ;;  %v1764_v7 = vpop.f32.mrb[14].mxu1 }
 0x62d   :  { %v1694_v52 = vadd.f32 %v1693_v0, %v8692_v23  ;;  %v1695_v48 = vpop.f32.mrb[15].mxu0  ;;  %v1766_v50 = vpop.f32.mrb[15].mxu1  ;;  %v1765_v60 = vadd.f32 %v1764_v7, %v8507_v30 }
 0x62e   :  { %v1696_v45 = vadd.f32 %v1695_v48, %v8600_v55  ;;  %v1767_v39 = vadd.f32 %v1766_v50, %v8506_v20 }
 0x62f   :  { %v3507_v41 = vmul.f32 -1.442695, %v1694_v52 }
 0x630   :  { %v3508_v17 = vmul.f32 -1.442695, %v1696_v45  ;;  %v3509_v4 = vmul.f32 -1.442695, %v1767_v39 }
 0x631   :  { %5847 = vpow2.f32 %v3507_v41 }
 0x632   :  { %5849 = vpow2.f32 %v3508_v17 }
 0x633   :  { %5851 = vpow2.f32 %v3509_v4 }
 0x634   :  { %5853 = vtanh.f32 %v1765_v60 }
 0x63b   :  { %v5848_v57 = vpop.eup %5847 }
 0x63c   :  { %v5850_v3 = vpop.eup %5849  ;;  %v1772_v24 = vadd.f32 1.0, %v5848_v57 }
 0x63d   :  { %v1778_v29 = vadd.f32 1.0, %v5850_v3  ;;  %v5852_v0 = vpop.eup %5851 }
 0x63e   :  { %5855 = vrcp.f32 %v1772_v24  ;;  %v5854_v23 = vpop.eup %5853  ;;  %v1785_v41 = vadd.f32 1.0, %v5852_v0  ;;  %v8694_v24 = vld [vmem:[#allocation106_spill] sm:$0xff] }
 0x63f   :  { %5857 = vrcp.f32 %v1778_v29  ;;  %v7305_v29 = vld [vmem:[#allocation7] ss:$0 sm:$0xff] }
 0x640   :  { %5859 = vrcp.f32 %v1785_v41 }
 0x648   :  { %v5856_v48 = vpop.eup %5855 }
 0x649   :  { %v5858_v52 = vpop.eup %5857  ;;  %v1789_v45 = vmul.f32 %v5856_v48, %v5854_v23 }
 0x64a   :  { %v1788_v17 = vmul.f32 %v5858_v52, %v7145_v35  ;;  %v5860_v7 = vpop.eup %5859 }
 0x64c   :  { %v7298_v50 = vadd.f32 %v1789_v45, %v1788_v17 }
 0x64e   :  { %5861 = vtanh.f32 %v7298_v50 }
 0x658   :  { %v5862_v57 = vpop.eup %5861 }
 0x659   :  { %v7301_v4 = vmul.f32 %v5862_v57, %v5860_v7 }
 0x65b   :  { %8693 = vst [vmem:[#allocation109_spill] sm:$0xff] %v7301_v4  ;;  %2042 = vmatprep.mubr.f32.mxu0 %v7301_v4  ;;  %2113 = vmatprep.mubr.f32.mxu1 %v7301_v4  ;;  %v1793_v3 = vmul.f32 %v7305_v29, %v7301_v4 }
 0x65d   :  { %1794 = vadd.xlane.f32.xlu1 %v1793_v3 }
 0x66c   :  { %v1878_v35 = vpop.f32.mrb[16].mxu0 }
 0x66d   :  { %v1879_v23 = vadd.f32 %v1878_v35, %v8602_v1  ;;  %v1880_v60 = vpop.f32.mrb[17].mxu0 }
 0x66e   :  { %v1881_v39 = vadd.f32 %v1880_v60, %v8694_v24  ;;  %v1949_v0 = vpop.f32.mrb[16].mxu1 }
 0x66f   :  { %v3512_v48 = vmul.f32 -1.442695, %v1879_v23  ;;  %v1951_v52 = vpop.f32.mrb[17].mxu1  ;;  %v1950_v7 = vadd.f32 %v1949_v0, %v6679_v14 }
 0x670   :  { %v3513_v45 = vmul.f32 -1.442695, %v1881_v39  ;;  %v1952_v41 = vadd.f32 %v1951_v52, %v8419_v13 }
 0x671   :  { %5863 = vpow2.f32 %v3512_v48 }
 0x672   :  { %5865 = vpow2.f32 %v3513_v45  ;;  %v3514_v17 = vmul.f32 -1.442695, %v1952_v41 }
 0x674   :  { %5867 = vpow2.f32 %v3514_v17 }
 0x675   :  { %5869 = vtanh.f32 %v1950_v7  ;;  %v8699_v7 = vld [vmem:[#allocation18_spill] sm:$0xff] }
 0x67b   :  { %v5864_v57 = vpop.eup %5863 }
 0x67c   :  { %v5866_v3 = vpop.eup %5865  ;;  %v1957_v4 = vadd.f32 1.0, %v5864_v57  ;;  %v8700_v57 = vld [vmem:[#allocation19_spill] sm:$0xff] }
 0x67d   :  { %v1963_v35 = vadd.f32 1.0, %v5866_v3  ;;  %v8701_v3 = vld [vmem:[#allocation24_spill] sm:$0xff] }
 0x67e   :  { %5871 = vrcp.f32 %v1957_v4  ;;  %v5868_v60 = vpop.eup %5867  ;;  %v8697_v4 = vld [vmem:[#allocation20_spill] sm:$0xff] }
 0x67f   :  { %5873 = vrcp.f32 %v1963_v35  ;;  %v5870_v24 = vpop.eup %5869  ;;  %v1970_v1 = vadd.f32 1.0, %v5868_v60  ;;  %v8702_v35 = vld [vmem:[#allocation25_spill] sm:$0xff]  ;;  %v8703_v60 = vld [vmem:[#allocation22_spill] sm:$0xff] }
 0x681   :  { %5875 = vrcp.f32 %v1970_v1  ;;  %v8695_v1 = vld [vmem:[#allocation15_spill] sm:$0xff] }
 0x688   :  { %v5872_v23 = vpop.eup %5871 }
 0x689   :  { %v5874_v39 = vpop.eup %5873  ;;  %v1974_v48 = vmul.f32 %v5872_v23, %v5870_v24  ;;  %v8698_v24 = vld [vmem:[#allocation21_spill] sm:$0xff]  ;;  %v8704_v23 = vld [vmem:[#allocation23_spill] sm:$0xff] }
 0x68a   :  { %v1973_v45 = vmul.f32 %v5874_v39, %v7159_v5  ;;  %v8696_v5 = vld [vmem:[#allocation16_spill] sm:$0xff] }
 0x68b   :  { %v5876_v0 = vpop.eup %5875  ;;  %v8705_v39 = vld [vmem:[#allocation28_spill] sm:$0xff] }
 0x68c   :  { %v7314_v52 = vadd.f32 %v1974_v48, %v1973_v45  ;;  %v8706_v48 = vld [vmem:[#allocation29_spill] sm:$0xff]  ;;  %v8707_v45 = vld [vmem:[#allocation26_spill] sm:$0xff] }
 0x68e   :  { %5877 = vtanh.f32 %v7314_v52 }
 0x698   :  { %v5878_v41 = vpop.eup %5877 }
 0x699   :  { %v1977_v17 = vmul.f32 %v5878_v41, %v5876_v0  ;;  %v8708_v0 = vld [vmem:[#allocation27_spill] sm:$0xff]  ;;  %v8709_v41 = vld [vmem:[#allocation32_spill] sm:$0xff] }
 0x69b   :  { %2043 = vmatmul.mubr.f32.vlgmr.msra.gmra.mrb[18].mxu0 %v1977_v17  ;;  %2114 = vmatmul.mubr.f32.vlgmr.msra.gmra.mrb[18].mxu1 %v1977_v17 }
 0x69c   :  { %4862 = vmatpush1.bf16.msra.mxu0 %v6262_v9  ;;  %2227 = vmatprep.mubr.f32.mxu0 %v1977_v17 }
 0x69d   :  { %2298 = vmatprep.mubr.f32.mxu1 %v1977_v17  ;;  %4864 = vmatprep.subr.bf16.mxu0 %v6264_v10  ;;  %v8710_v17 = vld [vmem:[#allocation33_spill] sm:$0xff] }
 0x69e   :  { %4926 = vmatpush1.bf16.msra.mxu1 %v6275_v26 }
 0x69f   :  { %4928 = vmatprep.subr.bf16.mxu1 %v6285_v34 }
 0x6a0   :  { %4866 = vmatpush1.bf16.msra.mxu0 %v6268_v15 }
 0x6a1   :  { %4868 = vmatprep.subr.bf16.mxu0 %v6271_v18 }
 0x6a2   :  { %4930 = vmatpush1.bf16.msra.mxu1 %v6287_v38 }
 0x6a3   :  { %4932 = vmatprep.subr.bf16.mxu1 %v6293_v46 }
 0x6a4   :  { %4870 = vmatpush1.bf16.msra.mxu0 %v6278_v27 }
 0x6a5   :  { %4872 = vmatprep.subr.bf16.mxu0 %v6282_v31 }
 0x6a6   :  { %4934 = vmatpush1.bf16.msra.mxu1 %v6299_v49 }
 0x6a7   :  { %4936 = vmatprep.subr.bf16.mxu1 %v6302_v53 }
 0x6a8   :  { %4874 = vmatpush1.bf16.msra.mxu0 %v6291_v43 }
 0x6a9   :  { %4876 = vmatprep.subr.bf16.mxu0 %v6296_v47 }
 0x6aa   :  { %4938 = vmatpush1.bf16.msra.mxu1 %v6311_v63 }
 0x6ab   :  { %4940 = vmatprep.subr.bf16.mxu1 %v6314_v2 }
 0x6ac   :  { %4878 = vmatpush1.bf16.msra.mxu0 %v6305_v56 }
 0x6ad   :  { %4880 = vmatprep.subr.bf16.mxu0 %v6308_v59 }
 0x6ae   :  { %4942 = vmatpush1.bf16.msra.mxu1 %v6323_v16 }
 0x6af   :  { %4944 = vmatprep.subr.bf16.mxu1 %v6326_v19 }
 0x6b0   :  { %4882 = vmatpush1.bf16.msra.mxu0 %v6317_v8 }
 0x6b1   :  { %4884 = vmatprep.subr.bf16.mxu0 %v6320_v11 }
 0x6b2   :  { %4946 = vmatpush1.bf16.msra.mxu1 %v6335_v33 }
 0x6b3   :  { %4948 = vmatprep.subr.bf16.mxu1 %v6338_v36 }
 0x6b4   :  { %4886 = vmatpush1.bf16.msra.mxu0 %v6329_v25 }
 0x6b5   :  { %4888 = vmatprep.subr.bf16.mxu0 %v6332_v28 }
 0x6b6   :  { %4950 = vmatpush1.bf16.msra.mxu1 %v6347_v51 }
 0x6b7   :  { %4952 = vmatprep.subr.bf16.mxu1 %v6350_v54 }
 0x6b8   :  { %4890 = vmatpush1.bf16.msra.mxu0 %v6341_v42 }
 0x6b9   :  { %4892 = vmatprep.subr.bf16.mxu0 %v6344_v44 }
 0x6ba   :  { %4954 = vmatpush1.bf16.msra.mxu1 %v6359_v6 }
 0x6bb   :  { %4956 = vmatprep.subr.bf16.mxu1 %v6362_v12 }
 0x6bc   :  { %4894 = vmatpush1.bf16.msra.mxu0 %v6353_v61 }
 0x6bd   :  { %4896 = vmatprep.subr.bf16.mxu0 %v6356_v62 }
 0x6be   :  { %4958 = vmatpush1.bf16.msra.mxu1 %v6371_v32 }
 0x6bf   :  { %4960 = vmatprep.subr.bf16.mxu1 %v6374_v37 }
 0x6c0   :  { %4898 = vmatpush1.bf16.msra.mxu0 %v6365_v21 }
 0x6c1   :  { %4900 = vmatprep.subr.bf16.mxu0 %v6368_v22 }
 0x6c2   :  { %4962 = vmatpush1.bf16.msra.mxu1 %v6383_v58 }
 0x6c3   :  { %4964 = vmatprep.subr.bf16.mxu1 %v8324_v40 }
 0x6c4   :  { %4902 = vmatpush1.bf16.msra.mxu0 %v8695_v1 }
 0x6c5   :  { %4904 = vmatprep.subr.bf16.mxu0 %v8696_v5 }
 0x6c6   :  { %4966 = vmatpush1.bf16.msra.mxu1 %v8697_v4 }
 0x6c7   :  { %4968 = vmatprep.subr.bf16.mxu1 %v8698_v24 }
 0x6c8   :  { %4906 = vmatpush1.bf16.msra.mxu0 %v8699_v7  ;;  %v8783_v7 = vld [vmem:[#allocation17_spill] sm:$0xff] }
 0x6c9   :  { %4908 = vmatprep.subr.bf16.mxu0 %v8700_v57  ;;  %v8711_v57 = vld [vmem:[#allocation30_spill] sm:$0xff] }
 0x6ca   :  { %4970 = vmatpush1.bf16.msra.mxu1 %v8701_v3  ;;  %v8712_v3 = vld [vmem:[#allocation31_spill] sm:$0xff] }
 0x6cb   :  { %4972 = vmatprep.subr.bf16.mxu1 %v8702_v35  ;;  %v8713_v35 = vld [vmem:[#allocation35_spill] sm:$0xff] }
 0x6cc   :  { %4910 = vmatpush1.bf16.msra.mxu0 %v8703_v60  ;;  %v8714_v60 = vld [vmem:[#allocation37_spill] sm:$0xff] }
 0x6cd   :  { %4912 = vmatprep.subr.bf16.mxu0 %v8704_v23  ;;  %v8715_v23 = vld [vmem:[#allocation34_spill] sm:$0xff] }
 0x6ce   :  { %4974 = vmatpush1.bf16.msra.mxu1 %v8705_v39  ;;  %v8725_v39 = vld [vmem:[#allocation47_spill] sm:$0xff] }
 0x6cf   :  { %4976 = vmatprep.subr.bf16.mxu1 %v8706_v48  ;;  %v8716_v48 = vld [vmem:[#allocation36_spill] sm:$0xff] }
 0x6d0   :  { %4914 = vmatpush1.bf16.msra.mxu0 %v8707_v45  ;;  %v3519_v45 = vld [vmem:[%s8003_s0 + $0x28] sm:$0xff] }
 0x6d1   :  { %4916 = vmatprep.subr.bf16.mxu0 %v8708_v0  ;;  %v8717_v0 = vld [vmem:[#allocation39_spill] sm:$0xff] }
 0x6d2   :  { %4978 = vmatpush1.bf16.msra.mxu1 %v8709_v41  ;;  %v8724_v41 = vld [vmem:[#allocation44_spill] sm:$0xff] }
 0x6d3   :  { %4980 = vmatprep.subr.bf16.mxu1 %v8710_v17  ;;  %v8718_v17 = vld [vmem:[#allocation41_spill] sm:$0xff] }
 0x6d4   :  { %4918 = vmatpush1.bf16.msra.mxu0 %v8711_v57  ;;  %v8719_v57 = vld [vmem:[#allocation38_spill] sm:$0xff] }
 0x6d5   :  { %4920 = vmatprep.subr.bf16.mxu0 %v8712_v3  ;;  %v8720_v3 = vld [vmem:[#allocation40_spill] sm:$0xff] }
 0x6d6   :  { %4982 = vmatpush1.bf16.msra.mxu1 %v8713_v35  ;;  %v8721_v35 = vld [vmem:[#allocation43_spill] sm:$0xff] }
 0x6d7   :  { %4984 = vmatprep.subr.bf16.mxu1 %v8714_v60  ;;  %v8722_v60 = vld [vmem:[#allocation45_spill] sm:$0xff] }
 0x6d8   :  { %4922 = vmatpush1.bf16.msra.mxu0 %v8715_v23  ;;  %v8723_v23 = vld [vmem:[#allocation42_spill] sm:$0xff] }
 0x6d9   :  { %4988 = vmatprep.subr.bf16.mxu0 %v8716_v48  ;;  %v8726_v48 = vld [vmem:[#allocation49_spill] sm:$0xff] }
 0x6da   :  { %4986 = vmatpush1.bf16.msra.mxu1 %v8717_v0  ;;  %v8727_v0 = vld [vmem:[#allocation46_spill] sm:$0xff] }
 0x6db   :  { %2228 = vmatmul.mubr.f32.vlgmr.msra.gmra.mrb[20].mxu0 %v3519_v45  ;;  %5052 = vmatprep.subr.bf16.mxu1 %v8718_v17  ;;  %v8728_v17 = vld [vmem:[#allocation48_spill] sm:$0xff] }
 0x6dc   :  { %4990 = vmatpush1.bf16.msra.mxu0 %v8719_v57  ;;  %v8729_v57 = vld [vmem:[#allocation51_spill] sm:$0xff] }
 0x6dd   :  { %2299 = vmatmul.mubr.f32.vlgmr.msra.gmra.mrb[20].mxu1 %v3519_v45  ;;  %4992 = vmatprep.subr.bf16.mxu0 %v8720_v3  ;;  %v8730_v45 = vld [vmem:[#allocation53_spill] sm:$0xff]  ;;  %v8731_v3 = vld [vmem:[#allocation50_spill] sm:$0xff] }
 0x6de   :  { %5054 = vmatpush1.bf16.msra.mxu1 %v8721_v35  ;;  %v8732_v35 = vld [vmem:[#allocation52_spill] sm:$0xff] }
 0x6df   :  { %5056 = vmatprep.subr.bf16.mxu1 %v8722_v60  ;;  %v8733_v60 = vld [vmem:[#allocation55_spill] sm:$0xff] }
 0x6e0   :  { %4994 = vmatpush1.bf16.msra.mxu0 %v8723_v23  ;;  %v8734_v23 = vld [vmem:[#allocation56_spill] sm:$0xff] }
 0x6e1   :  { %4996 = vmatprep.subr.bf16.mxu0 %v8724_v41  ;;  %v8735_v41 = vld [vmem:[#allocation54_spill] sm:$0xff] }
 0x6e2   :  { %5058 = vmatpush1.bf16.msra.mxu1 %v8725_v39  ;;  %v8736_v39 = vld [vmem:[#allocation58_spill] sm:$0xff] }
 0x6e3   :  { %5060 = vmatprep.subr.bf16.mxu1 %v8726_v48  ;;  %v8737_v48 = vld [vmem:[#allocation57_spill] sm:$0xff] }
 0x6e4   :  { %4998 = vmatpush1.bf16.msra.mxu0 %v8727_v0  ;;  %v8738_v0 = vld [vmem:[#allocation60_spill] sm:$0xff] }
 0x6e5   :  { %5000 = vmatprep.subr.bf16.mxu0 %v8728_v17  ;;  %v8739_v17 = vld [vmem:[#allocation59_spill] sm:$0xff] }
 0x6e6   :  { %5062 = vmatpush1.bf16.msra.mxu1 %v8729_v57  ;;  %v8740_v57 = vld [vmem:[#allocation62_spill] sm:$0xff] }
 0x6e7   :  { %5064 = vmatprep.subr.bf16.mxu1 %v8730_v45  ;;  %v8741_v45 = vld [vmem:[#allocation61_spill] sm:$0xff] }
 0x6e8   :  { %5002 = vmatpush1.bf16.msra.mxu0 %v8731_v3  ;;  %v8742_v3 = vld [vmem:[#allocation64_spill] sm:$0xff] }
 0x6e9   :  { %5004 = vmatprep.subr.bf16.mxu0 %v8732_v35  ;;  %v8743_v35 = vld [vmem:[#allocation63_spill] sm:$0xff] }
 0x6ea   :  { %5066 = vmatpush1.bf16.msra.mxu1 %v8733_v60  ;;  %v8744_v60 = vld [vmem:[#allocation66_spill] sm:$0xff] }
 0x6eb   :  { %5068 = vmatprep.subr.bf16.mxu1 %v8734_v23  ;;  %v8745_v23 = vld [vmem:[#allocation65_spill] sm:$0xff] }
 0x6ec   :  { %5006 = vmatpush1.bf16.msra.mxu0 %v8735_v41  ;;  %v8746_v41 = vld [vmem:[#allocation68_spill] sm:$0xff] }
 0x6ed   :  { %5008 = vmatprep.subr.bf16.mxu0 %v8736_v39  ;;  %v8747_v39 = vld [vmem:[#allocation67_spill] sm:$0xff] }
 0x6ee   :  { %5070 = vmatpush1.bf16.msra.mxu1 %v8737_v48  ;;  %v8748_v48 = vld [vmem:[#allocation70_spill] sm:$0xff] }
 0x6ef   :  { %5072 = vmatprep.subr.bf16.mxu1 %v8738_v0  ;;  %v8749_v0 = vld [vmem:[#allocation69_spill] sm:$0xff] }
 0x6f0   :  { %5010 = vmatpush1.bf16.msra.mxu0 %v8739_v17  ;;  %v8750_v17 = vld [vmem:[#allocation72_spill] sm:$0xff] }
 0x6f1   :  { %5012 = vmatprep.subr.bf16.mxu0 %v8740_v57  ;;  %v8751_v57 = vld [vmem:[#allocation71_spill] sm:$0xff] }
 0x6f2   :  { %5074 = vmatpush1.bf16.msra.mxu1 %v8741_v45  ;;  %v8752_v45 = vld [vmem:[#allocation74_spill] sm:$0xff] }
 0x6f3   :  { %5076 = vmatprep.subr.bf16.mxu1 %v8742_v3  ;;  %v8753_v3 = vld [vmem:[#allocation73_spill] sm:$0xff] }
 0x6f4   :  { %5014 = vmatpush1.bf16.msra.mxu0 %v8743_v35  ;;  %v8754_v35 = vld [vmem:[#allocation76_spill] sm:$0xff] }
 0x6f5   :  { %5016 = vmatprep.subr.bf16.mxu0 %v8744_v60  ;;  %v8755_v60 = vld [vmem:[#allocation75_spill] sm:$0xff] }
 0x6f6   :  { %5078 = vmatpush1.bf16.msra.mxu1 %v8745_v23  ;;  %v8756_v23 = vld [vmem:[#allocation78_spill] sm:$0xff] }
 0x6f7   :  { %5080 = vmatprep.subr.bf16.mxu1 %v8746_v41  ;;  %v8757_v41 = vld [vmem:[#allocation77_spill] sm:$0xff] }
 0x6f8   :  { %5018 = vmatpush1.bf16.msra.mxu0 %v8747_v39  ;;  %v8758_v39 = vld [vmem:[#allocation80_spill] sm:$0xff] }
 0x6f9   :  { %5020 = vmatprep.subr.bf16.mxu0 %v8748_v48  ;;  %v8759_v48 = vld [vmem:[#allocation79_spill] sm:$0xff] }
 0x6fa   :  { %5082 = vmatpush1.bf16.msra.mxu1 %v8749_v0  ;;  %v8760_v0 = vld [vmem:[#allocation82_spill] sm:$0xff] }
 0x6fb   :  { %5084 = vmatprep.subr.bf16.mxu1 %v8750_v17  ;;  %v8761_v17 = vld [vmem:[#allocation81_spill] sm:$0xff] }
 0x6fc   :  { %5022 = vmatpush1.bf16.msra.mxu0 %v8751_v57  ;;  %v8762_v57 = vld [vmem:[#allocation84_spill] sm:$0xff] }
 0x6fd   :  { %5024 = vmatprep.subr.bf16.mxu0 %v8752_v45  ;;  %v8763_v45 = vld [vmem:[#allocation83_spill] sm:$0xff] }
 0x6fe   :  { %5086 = vmatpush1.bf16.msra.mxu1 %v8753_v3  ;;  %v8764_v3 = vld [vmem:[#allocation86_spill] sm:$0xff] }
 0x6ff   :  { %5088 = vmatprep.subr.bf16.mxu1 %v8754_v35  ;;  %v8765_v35 = vld [vmem:[#allocation85_spill] sm:$0xff] }
 0x700   :  { %5026 = vmatpush1.bf16.msra.mxu0 %v8755_v60  ;;  %v8766_v60 = vld [vmem:[#allocation88_spill] sm:$0xff] }
 0x701   :  { %5028 = vmatprep.subr.bf16.mxu0 %v8756_v23  ;;  %v8767_v23 = vld [vmem:[#allocation87_spill] sm:$0xff] }
 0x702   :  { %5090 = vmatpush1.bf16.msra.mxu1 %v8757_v41  ;;  %v8768_v41 = vld [vmem:[#allocation90_spill] sm:$0xff] }
 0x703   :  { %5092 = vmatprep.subr.bf16.mxu1 %v8758_v39  ;;  %v8769_v39 = vld [vmem:[#allocation89_spill] sm:$0xff] }
 0x704   :  { %5030 = vmatpush1.bf16.msra.mxu0 %v8759_v48  ;;  %v8770_v48 = vld [vmem:[#allocation92_spill] sm:$0xff] }
 0x705   :  { %5032 = vmatprep.subr.bf16.mxu0 %v8760_v0  ;;  %v8771_v0 = vld [vmem:[#allocation91_spill] sm:$0xff] }
 0x706   :  { %5094 = vmatpush1.bf16.msra.mxu1 %v8761_v17  ;;  %v8772_v17 = vld [vmem:[#allocation94_spill] sm:$0xff] }
 0x707   :  { %5096 = vmatprep.subr.bf16.mxu1 %v8762_v57  ;;  %v8773_v57 = vld [vmem:[#allocation93_spill] sm:$0xff] }
 0x708   :  { %5034 = vmatpush1.bf16.msra.mxu0 %v8763_v45  ;;  %v8774_v45 = vld [vmem:[#allocation96_spill] sm:$0xff] }
 0x709   :  { %5036 = vmatprep.subr.bf16.mxu0 %v8764_v3  ;;  %v8775_v3 = vld [vmem:[#allocation95_spill] sm:$0xff] }
 0x70a   :  { %5098 = vmatpush1.bf16.msra.mxu1 %v8765_v35  ;;  %v8776_v35 = vld [vmem:[#allocation98_spill] sm:$0xff] }
 0x70b   :  { %5100 = vmatprep.subr.bf16.mxu1 %v8766_v60  ;;  %v8777_v60 = vld [vmem:[#allocation97_spill] sm:$0xff] }
 0x70c   :  { %5038 = vmatpush1.bf16.msra.mxu0 %v8767_v23  ;;  %v8778_v23 = vld [vmem:[#allocation100_spill] sm:$0xff] }
 0x70d   :  { %5040 = vmatprep.subr.bf16.mxu0 %v8768_v41  ;;  %v8779_v41 = vld [vmem:[#allocation99_spill] sm:$0xff] }
 0x70e   :  { %5102 = vmatpush1.bf16.msra.mxu1 %v8769_v39  ;;  %v8780_v39 = vld [vmem:[#allocation13_spill] sm:$0xff] }
 0x70f   :  { %5104 = vmatprep.subr.bf16.mxu1 %v8770_v48  ;;  %v8781_v48 = vld [vmem:[#allocation101_spill] sm:$0xff] }
 0x710   :  { %5042 = vmatpush1.bf16.msra.mxu0 %v8771_v0  ;;  %v8782_v0 = vld [vmem:[#allocation14_spill] sm:$0xff] }
 0x711   :  { %5044 = vmatprep.subr.bf16.mxu0 %v8772_v17 }
 0x712   :  { %5106 = vmatpush1.bf16.msra.mxu1 %v8773_v57 }
 0x713   :  { %5108 = vmatprep.subr.bf16.mxu1 %v8774_v45 }
 0x714   :  { %5046 = vmatpush1.bf16.msra.mxu0 %v8775_v3 }
 0x715   :  { %5048 = vmatprep.subr.bf16.mxu0 %v8776_v35 }
 0x716   :  { %5110 = vmatpush1.bf16.msra.mxu1 %v8777_v60 }
 0x717   :  { %5112 = vmatprep.subr.bf16.mxu1 %v8778_v23 }
 0x718   :  { %5050 = vmatpush1.bf16.msra.mxu0 %v8779_v41 }
 0x719   :  { %5116 = vmatprep.subr.bf16.mxu0 %v8780_v39 }
 0x71a   :  { %5114 = vmatpush1.bf16.msra.mxu1 %v8781_v48 }
 0x71b   :  { %5180 = vmatprep.subr.bf16.mxu1 %v8782_v0 }
 0x76e   :  { %v2044_v17 = vpop.f32.mrb[18].mxu0  ;;  %v2115_v57 = vpop.f32.mrb[18].mxu1 }
 0x76f   :  { %v2045_v45 = vadd.f32 %v2044_v17, %v8783_v7  ;;  %v2046_v24 = vpop.f32.mrb[19].mxu0  ;;  %v2117_v3 = vpop.f32.mrb[19].mxu1  ;;  %v2116_v39 = vadd.f32 %v2115_v57, %v8507_v30 }
 0x770   :  { %v2047_v35 = vadd.f32 %v2046_v24, %v8600_v55  ;;  %v2118_v41 = vadd.f32 %v2117_v3, %v8506_v20 }
 0x771   :  { %v3515_v4 = vmul.f32 -1.442695, %v2045_v45 }
 0x772   :  { %v3516_v60 = vmul.f32 -1.442695, %v2047_v35  ;;  %v3517_v23 = vmul.f32 -1.442695, %v2118_v41 }
 0x773   :  { %5879 = vpow2.f32 %v3515_v4 }
 0x774   :  { %5881 = vpow2.f32 %v3516_v60 }
 0x775   :  { %5883 = vpow2.f32 %v3517_v23 }
 0x776   :  { %5885 = vtanh.f32 %v2116_v39 }
 0x77d   :  { %v5880_v48 = vpop.eup %5879 }
 0x77e   :  { %v5882_v5 = vpop.eup %5881  ;;  %v2123_v0 = vadd.f32 1.0, %v5880_v48 }
 0x77f   :  { %v2129_v1 = vadd.f32 1.0, %v5882_v5  ;;  %v5884_v17 = vpop.eup %5883 }
 0x780   :  { %5887 = vrcp.f32 %v2123_v0  ;;  %v5886_v7 = vpop.eup %5885  ;;  %v2136_v4 = vadd.f32 1.0, %v5884_v17  ;;  %v8786_v0 = vld [vmem:[#allocation106_spill] sm:$0xff] }
 0x781   :  { %5889 = vrcp.f32 %v2129_v1 }
 0x782   :  { %5891 = vrcp.f32 %v2136_v4 }
 0x78a   :  { %v5888_v24 = vpop.eup %5887 }
 0x78b   :  { %v5890_v45 = vpop.eup %5889  ;;  %v2140_v35 = vmul.f32 %v5888_v24, %v5886_v7  ;;  %v8785_v7 = vld [vmem:[#allocation105_spill] sm:$0xff] }
 0x78c   :  { %v2139_v60 = vmul.f32 %v5890_v45, %v7298_v50  ;;  %v5892_v57 = vpop.eup %5891 }
 0x78e   :  { %v7453_v3 = vadd.f32 %v2140_v35, %v2139_v60 }
 0x790   :  { %5893 = vtanh.f32 %v7453_v3 }
 0x79a   :  { %v5894_v48 = vpop.eup %5893 }
 0x79b   :  { %v7456_v23 = vmul.f32 %v5894_v48, %v5892_v57 }
 0x79d   :  { %8784 = vst [vmem:[#allocation110_spill] sm:$0xff] %v7456_v23  ;;  %2393 = vmatprep.mubr.f32.mxu0 %v7456_v23  ;;  %2464 = vmatprep.mubr.f32.mxu1 %v7456_v23  ;;  %v2144_v1 = vmul.f32 %v7305_v29, %v7456_v23 }
 0x79f   :  { %2145 = vadd.xlane.f32.xlu0 %v2144_v1 }
 0x7ae   :  { %v2229_v5 = vpop.f32.mrb[20].mxu0 }
 0x7af   :  { %v2230_v50 = vadd.f32 %v2229_v5, %v8785_v7  ;;  %v2231_v39 = vpop.f32.mrb[21].mxu0 }
 0x7b0   :  { %v2232_v41 = vadd.f32 %v2231_v39, %v8786_v0  ;;  %v2300_v17 = vpop.f32.mrb[20].mxu1 }
 0x7b1   :  { %v3520_v24 = vmul.f32 -1.442695, %v2230_v50  ;;  %v2302_v45 = vpop.f32.mrb[21].mxu1  ;;  %v2301_v57 = vadd.f32 %v2300_v17, %v6679_v14 }
 0x7b2   :  { %v3521_v35 = vmul.f32 -1.442695, %v2232_v41  ;;  %v2303_v4 = vadd.f32 %v2302_v45, %v8419_v13 }
 0x7b3   :  { %5895 = vpow2.f32 %v3520_v24 }
 0x7b4   :  { %5897 = vpow2.f32 %v3521_v35  ;;  %v3522_v60 = vmul.f32 -1.442695, %v2303_v4 }
 0x7b6   :  { %5899 = vpow2.f32 %v3522_v60 }
 0x7b7   :  { %5901 = vtanh.f32 %v2301_v57  ;;  %v8791_v57 = vld [vmem:[#allocation18_spill] sm:$0xff] }
 0x7bd   :  { %v5896_v48 = vpop.eup %5895 }
 0x7be   :  { %v5898_v1 = vpop.eup %5897  ;;  %v2308_v23 = vadd.f32 1.0, %v5896_v48  ;;  %v8792_v48 = vld [vmem:[#allocation19_spill] sm:$0xff] }
 0x7bf   :  { %v2314_v5 = vadd.f32 1.0, %v5898_v1  ;;  %v8793_v1 = vld [vmem:[#allocation24_spill] sm:$0xff] }
 0x7c0   :  { %5903 = vrcp.f32 %v2308_v23  ;;  %v5900_v39 = vpop.eup %5899  ;;  %v8788_v23 = vld [vmem:[#allocation16_spill] sm:$0xff] }
 0x7c1   :  { %5905 = vrcp.f32 %v2314_v5  ;;  %v5902_v0 = vpop.eup %5901  ;;  %v2321_v7 = vadd.f32 1.0, %v5900_v39  ;;  %v8794_v5 = vld [vmem:[#allocation25_spill] sm:$0xff]  ;;  %v8795_v39 = vld [vmem:[#allocation22_spill] sm:$0xff] }
 0x7c3   :  { %5907 = vrcp.f32 %v2321_v7  ;;  %v8789_v7 = vld [vmem:[#allocation20_spill] sm:$0xff] }
 0x7ca   :  { %v5904_v50 = vpop.eup %5903 }
 0x7cb   :  { %v5906_v41 = vpop.eup %5905  ;;  %v2325_v24 = vmul.f32 %v5904_v50, %v5902_v0  ;;  %v8790_v0 = vld [vmem:[#allocation21_spill] sm:$0xff]  ;;  %v8796_v50 = vld [vmem:[#allocation23_spill] sm:$0xff] }
 0x7cc   :  { %v2324_v35 = vmul.f32 %v5906_v41, %v7314_v52  ;;  %v8787_v52 = vld [vmem:[#allocation15_spill] sm:$0xff]  ;;  %v8797_v41 = vld [vmem:[#allocation28_spill] sm:$0xff] }
 0x7cd   :  { %v5908_v17 = vpop.eup %5907 }
 0x7ce   :  { %v7467_v45 = vadd.f32 %v2325_v24, %v2324_v35  ;;  %v8798_v24 = vld [vmem:[#allocation29_spill] sm:$0xff]  ;;  %v8799_v35 = vld [vmem:[#allocation26_spill] sm:$0xff] }
 0x7d0   :  { %5909 = vtanh.f32 %v7467_v45 }
 0x7da   :  { %v5910_v4 = vpop.eup %5909 }
 0x7db   :  { %v2328_v60 = vmul.f32 %v5910_v4, %v5908_v17  ;;  %v8800_v17 = vld [vmem:[#allocation27_spill] sm:$0xff]  ;;  %v8801_v4 = vld [vmem:[#allocation32_spill] sm:$0xff] }
 0x7dd   :  { %2394 = vmatmul.mubr.f32.vlgmr.msra.gmra.mrb[22].mxu0 %v2328_v60  ;;  %2465 = vmatmul.mubr.f32.vlgmr.msra.gmra.mrb[22].mxu1 %v2328_v60 }
 0x7de   :  { %5118 = vmatpush1.bf16.msra.mxu0 %v6262_v9  ;;  %2578 = vmatprep.mubr.f32.mxu0 %v2328_v60 }
 0x7df   :  { %2649 = vmatprep.mubr.f32.mxu1 %v2328_v60  ;;  %5120 = vmatprep.subr.bf16.mxu0 %v6264_v10  ;;  %v8802_v60 = vld [vmem:[#allocation33_spill] sm:$0xff] }
 0x7e0   :  { %5182 = vmatpush1.bf16.msra.mxu1 %v6275_v26 }
 0x7e1   :  { %5184 = vmatprep.subr.bf16.mxu1 %v6285_v34 }
 0x7e2   :  { %5122 = vmatpush1.bf16.msra.mxu0 %v6268_v15 }
 0x7e3   :  { %5124 = vmatprep.subr.bf16.mxu0 %v6271_v18 }
 0x7e4   :  { %5186 = vmatpush1.bf16.msra.mxu1 %v6287_v38 }
 0x7e5   :  { %5188 = vmatprep.subr.bf16.mxu1 %v6293_v46 }
 0x7e6   :  { %5126 = vmatpush1.bf16.msra.mxu0 %v6278_v27 }
 0x7e7   :  { %5128 = vmatprep.subr.bf16.mxu0 %v6282_v31 }
 0x7e8   :  { %5190 = vmatpush1.bf16.msra.mxu1 %v6299_v49 }
 0x7e9   :  { %5192 = vmatprep.subr.bf16.mxu1 %v6302_v53 }
 0x7ea   :  { %5130 = vmatpush1.bf16.msra.mxu0 %v6291_v43 }
 0x7eb   :  { %5132 = vmatprep.subr.bf16.mxu0 %v6296_v47 }
 0x7ec   :  { %5194 = vmatpush1.bf16.msra.mxu1 %v6311_v63 }
 0x7ed   :  { %5196 = vmatprep.subr.bf16.mxu1 %v6314_v2 }
 0x7ee   :  { %5134 = vmatpush1.bf16.msra.mxu0 %v6305_v56 }
 0x7ef   :  { %5136 = vmatprep.subr.bf16.mxu0 %v6308_v59 }
 0x7f0   :  { %5198 = vmatpush1.bf16.msra.mxu1 %v6323_v16 }
 0x7f1   :  { %5200 = vmatprep.subr.bf16.mxu1 %v6326_v19 }
 0x7f2   :  { %5138 = vmatpush1.bf16.msra.mxu0 %v6317_v8 }
 0x7f3   :  { %5140 = vmatprep.subr.bf16.mxu0 %v6320_v11 }
 0x7f4   :  { %5202 = vmatpush1.bf16.msra.mxu1 %v6335_v33 }
 0x7f5   :  { %5204 = vmatprep.subr.bf16.mxu1 %v6338_v36 }
 0x7f6   :  { %5142 = vmatpush1.bf16.msra.mxu0 %v6329_v25 }
 0x7f7   :  { %5144 = vmatprep.subr.bf16.mxu0 %v6332_v28 }
 0x7f8   :  { %5206 = vmatpush1.bf16.msra.mxu1 %v6347_v51 }
 0x7f9   :  { %5208 = vmatprep.subr.bf16.mxu1 %v6350_v54 }
 0x7fa   :  { %5146 = vmatpush1.bf16.msra.mxu0 %v6341_v42 }
 0x7fb   :  { %5148 = vmatprep.subr.bf16.mxu0 %v6344_v44 }
 0x7fc   :  { %5210 = vmatpush1.bf16.msra.mxu1 %v6359_v6 }
 0x7fd   :  { %5212 = vmatprep.subr.bf16.mxu1 %v6362_v12 }
 0x7fe   :  { %5150 = vmatpush1.bf16.msra.mxu0 %v6353_v61 }
 0x7ff   :  { %5152 = vmatprep.subr.bf16.mxu0 %v6356_v62 }
 0x800   :  { %5214 = vmatpush1.bf16.msra.mxu1 %v6371_v32 }
 0x801   :  { %5216 = vmatprep.subr.bf16.mxu1 %v6374_v37 }
 0x802   :  { %5154 = vmatpush1.bf16.msra.mxu0 %v6365_v21 }
 0x803   :  { %5156 = vmatprep.subr.bf16.mxu0 %v6368_v22 }
 0x804   :  { %5218 = vmatpush1.bf16.msra.mxu1 %v6383_v58 }
 0x805   :  { %5220 = vmatprep.subr.bf16.mxu1 %v8324_v40 }
 0x806   :  { %5158 = vmatpush1.bf16.msra.mxu0 %v8787_v52 }
 0x807   :  { %5160 = vmatprep.subr.bf16.mxu0 %v8788_v23 }
 0x808   :  { %5222 = vmatpush1.bf16.msra.mxu1 %v8789_v7 }
 0x809   :  { %5224 = vmatprep.subr.bf16.mxu1 %v8790_v0 }
 0x80a   :  { %5162 = vmatpush1.bf16.msra.mxu0 %v8791_v57  ;;  %v8875_v57 = vld [vmem:[#allocation17_spill] sm:$0xff] }
 0x80b   :  { %5164 = vmatprep.subr.bf16.mxu0 %v8792_v48  ;;  %v8803_v48 = vld [vmem:[#allocation30_spill] sm:$0xff] }
 0x80c   :  { %5226 = vmatpush1.bf16.msra.mxu1 %v8793_v1  ;;  %v8804_v1 = vld [vmem:[#allocation31_spill] sm:$0xff] }
 0x80d   :  { %5228 = vmatprep.subr.bf16.mxu1 %v8794_v5  ;;  %v8805_v5 = vld [vmem:[#allocation35_spill] sm:$0xff] }
 0x80e   :  { %5166 = vmatpush1.bf16.msra.mxu0 %v8795_v39  ;;  %v8806_v39 = vld [vmem:[#allocation37_spill] sm:$0xff] }
 0x80f   :  { %5168 = vmatprep.subr.bf16.mxu0 %v8796_v50  ;;  %v8807_v50 = vld [vmem:[#allocation34_spill] sm:$0xff] }
 0x810   :  { %5230 = vmatpush1.bf16.msra.mxu1 %v8797_v41  ;;  %v8817_v41 = vld [vmem:[#allocation47_spill] sm:$0xff] }
 0x811   :  { %5232 = vmatprep.subr.bf16.mxu1 %v8798_v24  ;;  %v8808_v24 = vld [vmem:[#allocation36_spill] sm:$0xff] }
 0x812   :  { %5170 = vmatpush1.bf16.msra.mxu0 %v8799_v35  ;;  %v3527_v35 = vld [vmem:[%s8003_s0 + $0x30] sm:$0xff] }
 0x813   :  { %5172 = vmatprep.subr.bf16.mxu0 %v8800_v17  ;;  %v8809_v17 = vld [vmem:[#allocation39_spill] sm:$0xff] }
 0x814   :  { %5234 = vmatpush1.bf16.msra.mxu1 %v8801_v4  ;;  %v8816_v4 = vld [vmem:[#allocation44_spill] sm:$0xff] }
 0x815   :  { %5236 = vmatprep.subr.bf16.mxu1 %v8802_v60  ;;  %v8810_v60 = vld [vmem:[#allocation41_spill] sm:$0xff] }
 0x816   :  { %5174 = vmatpush1.bf16.msra.mxu0 %v8803_v48  ;;  %v8811_v48 = vld [vmem:[#allocation38_spill] sm:$0xff] }
 0x817   :  { %5176 = vmatprep.subr.bf16.mxu0 %v8804_v1  ;;  %v8812_v1 = vld [vmem:[#allocation40_spill] sm:$0xff] }
 0x818   :  { %5238 = vmatpush1.bf16.msra.mxu1 %v8805_v5  ;;  %v8813_v5 = vld [vmem:[#allocation43_spill] sm:$0xff] }
 0x819   :  { %5240 = vmatprep.subr.bf16.mxu1 %v8806_v39  ;;  %v8814_v39 = vld [vmem:[#allocation45_spill] sm:$0xff] }
 0x81a   :  { %5178 = vmatpush1.bf16.msra.mxu0 %v8807_v50  ;;  %v8815_v50 = vld [vmem:[#allocation42_spill] sm:$0xff] }
 0x81b   :  { %5244 = vmatprep.subr.bf16.mxu0 %v8808_v24  ;;  %v8818_v24 = vld [vmem:[#allocation49_spill] sm:$0xff] }
 0x81c   :  { %5242 = vmatpush1.bf16.msra.mxu1 %v8809_v17  ;;  %v8819_v17 = vld [vmem:[#allocation46_spill] sm:$0xff] }
 0x81d   :  { %2579 = vmatmul.mubr.f32.vlgmr.msra.gmra.mrb[24].mxu0 %v3527_v35  ;;  %5308 = vmatprep.subr.bf16.mxu1 %v8810_v60  ;;  %v8820_v60 = vld [vmem:[#allocation48_spill] sm:$0xff] }
 0x81e   :  { %5246 = vmatpush1.bf16.msra.mxu0 %v8811_v48  ;;  %v8821_v48 = vld [vmem:[#allocation51_spill] sm:$0xff] }
 0x81f   :  { %2650 = vmatmul.mubr.f32.vlgmr.msra.gmra.mrb[24].mxu1 %v3527_v35  ;;  %5248 = vmatprep.subr.bf16.mxu0 %v8812_v1  ;;  %v8822_v35 = vld [vmem:[#allocation53_spill] sm:$0xff]  ;;  %v8823_v1 = vld [vmem:[#allocation50_spill] sm:$0xff] }
 0x820   :  { %5310 = vmatpush1.bf16.msra.mxu1 %v8813_v5  ;;  %v8824_v5 = vld [vmem:[#allocation52_spill] sm:$0xff] }
 0x821   :  { %5312 = vmatprep.subr.bf16.mxu1 %v8814_v39  ;;  %v8825_v39 = vld [vmem:[#allocation55_spill] sm:$0xff] }
 0x822   :  { %5250 = vmatpush1.bf16.msra.mxu0 %v8815_v50  ;;  %v8826_v50 = vld [vmem:[#allocation56_spill] sm:$0xff] }
 0x823   :  { %5252 = vmatprep.subr.bf16.mxu0 %v8816_v4  ;;  %v8827_v4 = vld [vmem:[#allocation54_spill] sm:$0xff] }
 0x824   :  { %5314 = vmatpush1.bf16.msra.mxu1 %v8817_v41  ;;  %v8828_v41 = vld [vmem:[#allocation58_spill] sm:$0xff] }
 0x825   :  { %5316 = vmatprep.subr.bf16.mxu1 %v8818_v24  ;;  %v8829_v24 = vld [vmem:[#allocation57_spill] sm:$0xff] }
 0x826   :  { %5254 = vmatpush1.bf16.msra.mxu0 %v8819_v17  ;;  %v8830_v17 = vld [vmem:[#allocation60_spill] sm:$0xff] }
 0x827   :  { %5256 = vmatprep.subr.bf16.mxu0 %v8820_v60  ;;  %v8831_v60 = vld [vmem:[#allocation59_spill] sm:$0xff] }
 0x828   :  { %5318 = vmatpush1.bf16.msra.mxu1 %v8821_v48  ;;  %v8832_v48 = vld [vmem:[#allocation62_spill] sm:$0xff] }
 0x829   :  { %5320 = vmatprep.subr.bf16.mxu1 %v8822_v35  ;;  %v8833_v35 = vld [vmem:[#allocation61_spill] sm:$0xff] }
 0x82a   :  { %5258 = vmatpush1.bf16.msra.mxu0 %v8823_v1  ;;  %v8834_v1 = vld [vmem:[#allocation64_spill] sm:$0xff] }
 0x82b   :  { %5260 = vmatprep.subr.bf16.mxu0 %v8824_v5  ;;  %v8835_v5 = vld [vmem:[#allocation63_spill] sm:$0xff] }
 0x82c   :  { %5322 = vmatpush1.bf16.msra.mxu1 %v8825_v39  ;;  %v8836_v39 = vld [vmem:[#allocation66_spill] sm:$0xff] }
 0x82d   :  { %5324 = vmatprep.subr.bf16.mxu1 %v8826_v50  ;;  %v8837_v50 = vld [vmem:[#allocation65_spill] sm:$0xff] }
 0x82e   :  { %5262 = vmatpush1.bf16.msra.mxu0 %v8827_v4  ;;  %v8838_v4 = vld [vmem:[#allocation68_spill] sm:$0xff] }
 0x82f   :  { %5264 = vmatprep.subr.bf16.mxu0 %v8828_v41  ;;  %v8839_v41 = vld [vmem:[#allocation67_spill] sm:$0xff] }
 0x830   :  { %5326 = vmatpush1.bf16.msra.mxu1 %v8829_v24  ;;  %v8840_v24 = vld [vmem:[#allocation70_spill] sm:$0xff] }
 0x831   :  { %5328 = vmatprep.subr.bf16.mxu1 %v8830_v17  ;;  %v8841_v17 = vld [vmem:[#allocation69_spill] sm:$0xff] }
 0x832   :  { %5266 = vmatpush1.bf16.msra.mxu0 %v8831_v60  ;;  %v8842_v60 = vld [vmem:[#allocation72_spill] sm:$0xff] }
 0x833   :  { %5268 = vmatprep.subr.bf16.mxu0 %v8832_v48  ;;  %v8843_v48 = vld [vmem:[#allocation71_spill] sm:$0xff] }
 0x834   :  { %5330 = vmatpush1.bf16.msra.mxu1 %v8833_v35  ;;  %v8844_v35 = vld [vmem:[#allocation74_spill] sm:$0xff] }
 0x835   :  { %5332 = vmatprep.subr.bf16.mxu1 %v8834_v1  ;;  %v8845_v1 = vld [vmem:[#allocation73_spill] sm:$0xff] }
 0x836   :  { %5270 = vmatpush1.bf16.msra.mxu0 %v8835_v5  ;;  %v8846_v5 = vld [vmem:[#allocation76_spill] sm:$0xff] }
 0x837   :  { %5272 = vmatprep.subr.bf16.mxu0 %v8836_v39  ;;  %v8847_v39 = vld [vmem:[#allocation75_spill] sm:$0xff] }
 0x838   :  { %5334 = vmatpush1.bf16.msra.mxu1 %v8837_v50  ;;  %v8848_v50 = vld [vmem:[#allocation78_spill] sm:$0xff] }
 0x839   :  { %5336 = vmatprep.subr.bf16.mxu1 %v8838_v4  ;;  %v8849_v4 = vld [vmem:[#allocation77_spill] sm:$0xff] }
 0x83a   :  { %5274 = vmatpush1.bf16.msra.mxu0 %v8839_v41  ;;  %v8850_v41 = vld [vmem:[#allocation80_spill] sm:$0xff] }
 0x83b   :  { %5276 = vmatprep.subr.bf16.mxu0 %v8840_v24  ;;  %v8851_v24 = vld [vmem:[#allocation79_spill] sm:$0xff] }
 0x83c   :  { %5338 = vmatpush1.bf16.msra.mxu1 %v8841_v17  ;;  %v8852_v17 = vld [vmem:[#allocation82_spill] sm:$0xff] }
 0x83d   :  { %5340 = vmatprep.subr.bf16.mxu1 %v8842_v60  ;;  %v8853_v60 = vld [vmem:[#allocation81_spill] sm:$0xff] }
 0x83e   :  { %5278 = vmatpush1.bf16.msra.mxu0 %v8843_v48  ;;  %v8854_v48 = vld [vmem:[#allocation84_spill] sm:$0xff] }
 0x83f   :  { %5280 = vmatprep.subr.bf16.mxu0 %v8844_v35  ;;  %v8855_v35 = vld [vmem:[#allocation83_spill] sm:$0xff] }
 0x840   :  { %5342 = vmatpush1.bf16.msra.mxu1 %v8845_v1  ;;  %v8856_v1 = vld [vmem:[#allocation86_spill] sm:$0xff] }
 0x841   :  { %5344 = vmatprep.subr.bf16.mxu1 %v8846_v5  ;;  %v8857_v5 = vld [vmem:[#allocation85_spill] sm:$0xff] }
 0x842   :  { %5282 = vmatpush1.bf16.msra.mxu0 %v8847_v39  ;;  %v8858_v39 = vld [vmem:[#allocation88_spill] sm:$0xff] }
 0x843   :  { %5284 = vmatprep.subr.bf16.mxu0 %v8848_v50  ;;  %v8859_v50 = vld [vmem:[#allocation87_spill] sm:$0xff] }
 0x844   :  { %5346 = vmatpush1.bf16.msra.mxu1 %v8849_v4  ;;  %v8860_v4 = vld [vmem:[#allocation90_spill] sm:$0xff] }
 0x845   :  { %5348 = vmatprep.subr.bf16.mxu1 %v8850_v41  ;;  %v8861_v41 = vld [vmem:[#allocation89_spill] sm:$0xff] }
 0x846   :  { %5286 = vmatpush1.bf16.msra.mxu0 %v8851_v24  ;;  %v8862_v24 = vld [vmem:[#allocation92_spill] sm:$0xff] }
 0x847   :  { %5288 = vmatprep.subr.bf16.mxu0 %v8852_v17  ;;  %v8863_v17 = vld [vmem:[#allocation91_spill] sm:$0xff] }
 0x848   :  { %5350 = vmatpush1.bf16.msra.mxu1 %v8853_v60  ;;  %v8864_v60 = vld [vmem:[#allocation94_spill] sm:$0xff] }
 0x849   :  { %5352 = vmatprep.subr.bf16.mxu1 %v8854_v48  ;;  %v8865_v48 = vld [vmem:[#allocation93_spill] sm:$0xff] }
 0x84a   :  { %5290 = vmatpush1.bf16.msra.mxu0 %v8855_v35  ;;  %v8866_v35 = vld [vmem:[#allocation96_spill] sm:$0xff] }
 0x84b   :  { %5292 = vmatprep.subr.bf16.mxu0 %v8856_v1  ;;  %v8867_v1 = vld [vmem:[#allocation95_spill] sm:$0xff] }
 0x84c   :  { %5354 = vmatpush1.bf16.msra.mxu1 %v8857_v5  ;;  %v8868_v5 = vld [vmem:[#allocation98_spill] sm:$0xff] }
 0x84d   :  { %5356 = vmatprep.subr.bf16.mxu1 %v8858_v39  ;;  %v8869_v39 = vld [vmem:[#allocation97_spill] sm:$0xff] }
 0x84e   :  { %5294 = vmatpush1.bf16.msra.mxu0 %v8859_v50  ;;  %v8870_v50 = vld [vmem:[#allocation100_spill] sm:$0xff] }
 0x84f   :  { %5296 = vmatprep.subr.bf16.mxu0 %v8860_v4  ;;  %v8871_v4 = vld [vmem:[#allocation99_spill] sm:$0xff] }
 0x850   :  { %5358 = vmatpush1.bf16.msra.mxu1 %v8861_v41  ;;  %v8872_v41 = vld [vmem:[#allocation13_spill] sm:$0xff] }
 0x851   :  { %5360 = vmatprep.subr.bf16.mxu1 %v8862_v24  ;;  %v8873_v24 = vld [vmem:[#allocation101_spill] sm:$0xff] }
 0x852   :  { %5298 = vmatpush1.bf16.msra.mxu0 %v8863_v17  ;;  %v8874_v17 = vld [vmem:[#allocation14_spill] sm:$0xff] }
 0x853   :  { %5300 = vmatprep.subr.bf16.mxu0 %v8864_v60 }
 0x854   :  { %5362 = vmatpush1.bf16.msra.mxu1 %v8865_v48 }
 0x855   :  { %5364 = vmatprep.subr.bf16.mxu1 %v8866_v35 }
 0x856   :  { %5302 = vmatpush1.bf16.msra.mxu0 %v8867_v1 }
 0x857   :  { %5304 = vmatprep.subr.bf16.mxu0 %v8868_v5 }
 0x858   :  { %5366 = vmatpush1.bf16.msra.mxu1 %v8869_v39 }
 0x859   :  { %5368 = vmatprep.subr.bf16.mxu1 %v8870_v50 }
 0x85a   :  { %5306 = vmatpush1.bf16.msra.mxu0 %v8871_v4 }
 0x85b   :  { %5372 = vmatprep.subr.bf16.mxu0 %v8872_v41 }
 0x85c   :  { %5370 = vmatpush1.bf16.msra.mxu1 %v8873_v24 }
 0x85d   :  { %5436 = vmatprep.subr.bf16.mxu1 %v8874_v17 }
 0x8b0   :  { %v2395_v60 = vpop.f32.mrb[22].mxu0  ;;  %v2466_v48 = vpop.f32.mrb[22].mxu1 }
 0x8b1   :  { %v2396_v35 = vadd.f32 %v2395_v60, %v8875_v57  ;;  %v2397_v0 = vpop.f32.mrb[23].mxu0  ;;  %v2468_v1 = vpop.f32.mrb[23].mxu1  ;;  %v2467_v41 = vadd.f32 %v2466_v48, %v8507_v30 }
 0x8b2   :  { %v2398_v5 = vadd.f32 %v2397_v0, %v8600_v55  ;;  %v2469_v4 = vadd.f32 %v2468_v1, %v8506_v20 }
 0x8b3   :  { %v3523_v7 = vmul.f32 -1.442695, %v2396_v35 }
 0x8b4   :  { %v3524_v39 = vmul.f32 -1.442695, %v2398_v5  ;;  %v3525_v50 = vmul.f32 -1.442695, %v2469_v4 }
 0x8b5   :  { %5911 = vpow2.f32 %v3523_v7 }
 0x8b6   :  { %5913 = vpow2.f32 %v3524_v39 }
 0x8b7   :  { %5915 = vpow2.f32 %v3525_v50 }
 0x8b8   :  { %5917 = vtanh.f32 %v2467_v41  ;;  %v8878_v41 = vld [vmem:[#allocation106_spill] sm:$0xff] }
 0x8bf   :  { %v5912_v24 = vpop.eup %5911 }
 0x8c0   :  { %v5914_v23 = vpop.eup %5913  ;;  %v2474_v17 = vadd.f32 1.0, %v5912_v24 }
 0x8c1   :  { %v2480_v52 = vadd.f32 1.0, %v5914_v23  ;;  %v5916_v60 = vpop.eup %5915 }
 0x8c2   :  { %5919 = vrcp.f32 %v2474_v17  ;;  %v5918_v57 = vpop.eup %5917  ;;  %v2487_v7 = vadd.f32 1.0, %v5916_v60 }
 0x8c3   :  { %5921 = vrcp.f32 %v2480_v52 }
 0x8c4   :  { %5923 = vrcp.f32 %v2487_v7 }
 0x8cc   :  { %v5920_v0 = vpop.eup %5919 }
 0x8cd   :  { %v5922_v35 = vpop.eup %5921  ;;  %v2491_v5 = vmul.f32 %v5920_v0, %v5918_v57  ;;  %v8877_v57 = vld [vmem:[#allocation105_spill] sm:$0xff] }
 0x8ce   :  { %v2490_v39 = vmul.f32 %v5922_v35, %v7453_v3  ;;  %v5924_v48 = vpop.eup %5923 }
 0x8d0   :  { %v7606_v1 = vadd.f32 %v2491_v5, %v2490_v39 }
 0x8d2   :  { %5925 = vtanh.f32 %v7606_v1 }
 0x8dc   :  { %v5926_v24 = vpop.eup %5925 }
 0x8dd   :  { %v7609_v50 = vmul.f32 %v5926_v24, %v5924_v48 }
 0x8df   :  { %8876 = vst [vmem:[#allocation108_spill] sm:$0xff] %v7609_v50  ;;  %2744 = vmatprep.mubr.f32.mxu0 %v7609_v50  ;;  %2815 = vmatprep.mubr.f32.mxu1 %v7609_v50  ;;  %v2495_v52 = vmul.f32 %v7305_v29, %v7609_v50 }
 0x8e1   :  { %2496 = vadd.xlane.f32.xlu1 %v2495_v52 }
 0x8f0   :  { %v2580_v23 = vpop.f32.mrb[24].mxu0 }
 0x8f1   :  { %v2581_v3 = vadd.f32 %v2580_v23, %v8877_v57  ;;  %v2582_v4 = vpop.f32.mrb[25].mxu0 }
 0x8f2   :  { %v2583_v17 = vadd.f32 %v2582_v4, %v8878_v41  ;;  %v2651_v60 = vpop.f32.mrb[24].mxu1 }
 0x8f3   :  { %v3528_v0 = vmul.f32 -1.442695, %v2581_v3  ;;  %v2653_v35 = vpop.f32.mrb[25].mxu1  ;;  %v2652_v48 = vadd.f32 %v2651_v60, %v6679_v14 }
 0x8f4   :  { %v3529_v5 = vmul.f32 -1.442695, %v2583_v17  ;;  %v2654_v7 = vadd.f32 %v2653_v35, %v8419_v13 }
 0x8f5   :  { %5927 = vpow2.f32 %v3528_v0 }
 0x8f6   :  { %5929 = vpow2.f32 %v3529_v5  ;;  %v3530_v39 = vmul.f32 -1.442695, %v2654_v7 }
 0x8f8   :  { %5931 = vpow2.f32 %v3530_v39 }
 0x8f9   :  { %5933 = vtanh.f32 %v2652_v48  ;;  %v8921_v48 = vld [vmem:[#allocation57_spill] sm:$0xff] }
 0x8ff   :  { %v5928_v24 = vpop.eup %5927 }
 0x900   :  { %v5930_v29 = vpop.eup %5929  ;;  %v2659_v52 = vadd.f32 1.0, %v5928_v24  ;;  %v8922_v24 = vld [vmem:[#allocation60_spill] sm:$0xff] }
 0x901   :  { %v2665_v23 = vadd.f32 1.0, %v5930_v29  ;;  %v8923_v29 = vld [vmem:[#allocation59_spill] sm:$0xff] }
 0x902   :  { %5935 = vrcp.f32 %v2659_v52  ;;  %v5932_v4 = vpop.eup %5931  ;;  %v8924_v52 = vld [vmem:[#allocation62_spill] sm:$0xff] }
 0x903   :  { %5937 = vrcp.f32 %v2665_v23  ;;  %v5934_v50 = vpop.eup %5933  ;;  %v2672_v41 = vadd.f32 1.0, %v5932_v4  ;;  %v8925_v23 = vld [vmem:[#allocation61_spill] sm:$0xff]  ;;  %v8926_v4 = vld [vmem:[#allocation64_spill] sm:$0xff] }
 0x905   :  { %5939 = vrcp.f32 %v2672_v41  ;;  %v8920_v41 = vld [vmem:[#allocation58_spill] sm:$0xff] }
 0x90c   :  { %v5936_v3 = vpop.eup %5935 }
 0x90d   :  { %v5938_v17 = vpop.eup %5937  ;;  %v2676_v0 = vmul.f32 %v5936_v3, %v5934_v50  ;;  %v8919_v50 = vld [vmem:[#allocation54_spill] sm:$0xff]  ;;  %v8927_v3 = vld [vmem:[#allocation63_spill] sm:$0xff] }
 0x90e   :  { %v2675_v5 = vmul.f32 %v5938_v17, %v7467_v45  ;;  %v8918_v45 = vld [vmem:[#allocation56_spill] sm:$0xff]  ;;  %v8928_v17 = vld [vmem:[#allocation66_spill] sm:$0xff] }
 0x90f   :  { %v5940_v60 = vpop.eup %5939 }
 0x910   :  { %v7620_v35 = vadd.f32 %v2676_v0, %v2675_v5  ;;  %v8929_v0 = vld [vmem:[#allocation65_spill] sm:$0xff]  ;;  %v8930_v5 = vld [vmem:[#allocation68_spill] sm:$0xff] }
 0x912   :  { %5941 = vtanh.f32 %v7620_v35 }
 0x91c   :  { %v5942_v7 = vpop.eup %5941 }
 0x91d   :  { %v2679_v39 = vmul.f32 %v5942_v7, %v5940_v60  ;;  %v8931_v60 = vld [vmem:[#allocation67_spill] sm:$0xff]  ;;  %v8932_v7 = vld [vmem:[#allocation70_spill] sm:$0xff] }
 0x91f   :  { %2745 = vmatmul.mubr.f32.vlgmr.msra.gmra.mrb[26].mxu0 %v2679_v39  ;;  %2816 = vmatmul.mubr.f32.vlgmr.msra.gmra.mrb[26].mxu1 %v2679_v39 }
 0x920   :  { %5374 = vmatpush1.bf16.msra.mxu0 %v6262_v9  ;;  %2929 = vmatprep.mubr.f32.mxu0 %v2679_v39  ;;  %v8879_v9 = vld [vmem:[#allocation15_spill] sm:$0xff] }
 0x921   :  { %3000 = vmatprep.mubr.f32.mxu1 %v2679_v39  ;;  %5376 = vmatprep.subr.bf16.mxu0 %v6264_v10  ;;  %v8880_v10 = vld [vmem:[#allocation16_spill] sm:$0xff]  ;;  %v8933_v39 = vld [vmem:[#allocation69_spill] sm:$0xff] }
 0x922   :  { %5438 = vmatpush1.bf16.msra.mxu1 %v6275_v26  ;;  %v8883_v26 = vld [vmem:[#allocation18_spill] sm:$0xff] }
 0x923   :  { %5440 = vmatprep.subr.bf16.mxu1 %v6285_v34  ;;  %v8886_v34 = vld [vmem:[#allocation25_spill] sm:$0xff] }
 0x924   :  { %5378 = vmatpush1.bf16.msra.mxu0 %v6268_v15  ;;  %v8881_v15 = vld [vmem:[#allocation20_spill] sm:$0xff] }
 0x925   :  { %5380 = vmatprep.subr.bf16.mxu0 %v6271_v18  ;;  %v8882_v18 = vld [vmem:[#allocation21_spill] sm:$0xff] }
 0x926   :  { %5442 = vmatpush1.bf16.msra.mxu1 %v6287_v38  ;;  %v8887_v38 = vld [vmem:[#allocation22_spill] sm:$0xff] }
 0x927   :  { %5444 = vmatprep.subr.bf16.mxu1 %v6293_v46  ;;  %v8889_v46 = vld [vmem:[#allocation28_spill] sm:$0xff] }
 0x928   :  { %5382 = vmatpush1.bf16.msra.mxu0 %v6278_v27  ;;  %v8884_v27 = vld [vmem:[#allocation19_spill] sm:$0xff] }
 0x929   :  { %5384 = vmatprep.subr.bf16.mxu0 %v6282_v31  ;;  %v8885_v31 = vld [vmem:[#allocation24_spill] sm:$0xff] }
 0x92a   :  { %5446 = vmatpush1.bf16.msra.mxu1 %v6299_v49  ;;  %v8891_v49 = vld [vmem:[#allocation26_spill] sm:$0xff] }
 0x92b   :  { %5448 = vmatprep.subr.bf16.mxu1 %v6302_v53  ;;  %v8892_v53 = vld [vmem:[#allocation27_spill] sm:$0xff] }
 0x92c   :  { %5386 = vmatpush1.bf16.msra.mxu0 %v6291_v43  ;;  %v8888_v43 = vld [vmem:[#allocation23_spill] sm:$0xff] }
 0x92d   :  { %5388 = vmatprep.subr.bf16.mxu0 %v6296_v47  ;;  %v8890_v47 = vld [vmem:[#allocation29_spill] sm:$0xff] }
 0x92e   :  { %5450 = vmatpush1.bf16.msra.mxu1 %v6311_v63  ;;  %v8895_v63 = vld [vmem:[#allocation30_spill] sm:$0xff] }
 0x92f   :  { %5452 = vmatprep.subr.bf16.mxu1 %v6314_v2  ;;  %v8896_v2 = vld [vmem:[#allocation31_spill] sm:$0xff] }
 0x930   :  { %5390 = vmatpush1.bf16.msra.mxu0 %v6305_v56  ;;  %v8893_v56 = vld [vmem:[#allocation32_spill] sm:$0xff] }
 0x931   :  { %5392 = vmatprep.subr.bf16.mxu0 %v6308_v59  ;;  %v8894_v59 = vld [vmem:[#allocation33_spill] sm:$0xff] }
 0x932   :  { %5454 = vmatpush1.bf16.msra.mxu1 %v6323_v16  ;;  %v8899_v16 = vld [vmem:[#allocation34_spill] sm:$0xff] }
 0x933   :  { %5456 = vmatprep.subr.bf16.mxu1 %v6326_v19  ;;  %v3535_v19 = vld [vmem:[%s8003_s0 + $0x38] sm:$0xff] }
 0x934   :  { %5394 = vmatpush1.bf16.msra.mxu0 %v6317_v8  ;;  %v8897_v8 = vld [vmem:[#allocation35_spill] sm:$0xff] }
 0x935   :  { %5396 = vmatprep.subr.bf16.mxu0 %v6320_v11  ;;  %v8898_v11 = vld [vmem:[#allocation37_spill] sm:$0xff] }
 0x936   :  { %5458 = vmatpush1.bf16.msra.mxu1 %v6335_v33  ;;  %v8902_v33 = vld [vmem:[#allocation41_spill] sm:$0xff] }
 0x937   :  { %5460 = vmatprep.subr.bf16.mxu1 %v6338_v36  ;;  %v8903_v36 = vld [vmem:[#allocation38_spill] sm:$0xff] }
 0x938   :  { %5398 = vmatpush1.bf16.msra.mxu0 %v6329_v25  ;;  %v8900_v25 = vld [vmem:[#allocation36_spill] sm:$0xff] }
 0x939   :  { %5400 = vmatprep.subr.bf16.mxu0 %v6332_v28  ;;  %v8901_v28 = vld [vmem:[#allocation39_spill] sm:$0xff] }
 0x93a   :  { %5462 = vmatpush1.bf16.msra.mxu1 %v6347_v51  ;;  %v8906_v51 = vld [vmem:[#allocation45_spill] sm:$0xff] }
 0x93b   :  { %5464 = vmatprep.subr.bf16.mxu1 %v6350_v54  ;;  %v8907_v54 = vld [vmem:[#allocation42_spill] sm:$0xff] }
 0x93c   :  { %5402 = vmatpush1.bf16.msra.mxu0 %v6341_v42  ;;  %v8904_v42 = vld [vmem:[#allocation40_spill] sm:$0xff] }
 0x93d   :  { %5404 = vmatprep.subr.bf16.mxu0 %v6344_v44  ;;  %v8905_v44 = vld [vmem:[#allocation43_spill] sm:$0xff] }
 0x93e   :  { %5466 = vmatpush1.bf16.msra.mxu1 %v6359_v6  ;;  %v8910_v6 = vld [vmem:[#allocation49_spill] sm:$0xff] }
 0x93f   :  { %5468 = vmatprep.subr.bf16.mxu1 %v6362_v12  ;;  %v8911_v12 = vld [vmem:[#allocation46_spill] sm:$0xff] }
 0x940   :  { %5406 = vmatpush1.bf16.msra.mxu0 %v6353_v61  ;;  %v8908_v61 = vld [vmem:[#allocation44_spill] sm:$0xff] }
 0x941   :  { %5408 = vmatprep.subr.bf16.mxu0 %v6356_v62  ;;  %v8909_v62 = vld [vmem:[#allocation47_spill] sm:$0xff] }
 0x942   :  { %5470 = vmatpush1.bf16.msra.mxu1 %v6371_v32  ;;  %v8914_v32 = vld [vmem:[#allocation53_spill] sm:$0xff] }
 0x943   :  { %5472 = vmatprep.subr.bf16.mxu1 %v6374_v37  ;;  %v8915_v37 = vld [vmem:[#allocation50_spill] sm:$0xff] }
 0x944   :  { %5410 = vmatpush1.bf16.msra.mxu0 %v6365_v21  ;;  %v8912_v21 = vld [vmem:[#allocation48_spill] sm:$0xff] }
 0x945   :  { %5412 = vmatprep.subr.bf16.mxu0 %v6368_v22  ;;  %v8913_v22 = vld [vmem:[#allocation51_spill] sm:$0xff] }
 0x946   :  { %5474 = vmatpush1.bf16.msra.mxu1 %v6383_v58  ;;  %v8916_v58 = vld [vmem:[#allocation52_spill] sm:$0xff] }
 0x947   :  { %5476 = vmatprep.subr.bf16.mxu1 %v8324_v40  ;;  %v8917_v40 = vld [vmem:[#allocation55_spill] sm:$0xff] }
 0x948   :  { %5414 = vmatpush1.bf16.msra.mxu0 %v8879_v9  ;;  %v8934_v9 = vld [vmem:[#allocation72_spill] sm:$0xff] }
 0x949   :  { %5416 = vmatprep.subr.bf16.mxu0 %v8880_v10  ;;  %v8935_v10 = vld [vmem:[#allocation71_spill] sm:$0xff] }
 0x94a   :  { %5478 = vmatpush1.bf16.msra.mxu1 %v8881_v15  ;;  %v8936_v15 = vld [vmem:[#allocation74_spill] sm:$0xff] }
 0x94b   :  { %5480 = vmatprep.subr.bf16.mxu1 %v8882_v18  ;;  %v8937_v18 = vld [vmem:[#allocation73_spill] sm:$0xff] }
 0x94c   :  { %5418 = vmatpush1.bf16.msra.mxu0 %v8883_v26  ;;  %v8938_v26 = vld [vmem:[#allocation76_spill] sm:$0xff] }
 0x94d   :  { %5420 = vmatprep.subr.bf16.mxu0 %v8884_v27  ;;  %v8939_v27 = vld [vmem:[#allocation75_spill] sm:$0xff] }
 0x94e   :  { %5482 = vmatpush1.bf16.msra.mxu1 %v8885_v31  ;;  %v8940_v31 = vld [vmem:[#allocation78_spill] sm:$0xff] }
 0x94f   :  { %5484 = vmatprep.subr.bf16.mxu1 %v8886_v34  ;;  %v8941_v34 = vld [vmem:[#allocation77_spill] sm:$0xff] }
 0x950   :  { %5422 = vmatpush1.bf16.msra.mxu0 %v8887_v38  ;;  %v8942_v38 = vld [vmem:[#allocation80_spill] sm:$0xff] }
 0x951   :  { %5424 = vmatprep.subr.bf16.mxu0 %v8888_v43  ;;  %v8943_v43 = vld [vmem:[#allocation79_spill] sm:$0xff] }
 0x952   :  { %5486 = vmatpush1.bf16.msra.mxu1 %v8889_v46  ;;  %v8944_v46 = vld [vmem:[#allocation82_spill] sm:$0xff] }
 0x953   :  { %5488 = vmatprep.subr.bf16.mxu1 %v8890_v47  ;;  %v8945_v47 = vld [vmem:[#allocation81_spill] sm:$0xff] }
 0x954   :  { %5426 = vmatpush1.bf16.msra.mxu0 %v8891_v49  ;;  %v8946_v49 = vld [vmem:[#allocation84_spill] sm:$0xff] }
 0x955   :  { %5428 = vmatprep.subr.bf16.mxu0 %v8892_v53  ;;  %v8947_v53 = vld [vmem:[#allocation83_spill] sm:$0xff] }
 0x956   :  { %5490 = vmatpush1.bf16.msra.mxu1 %v8893_v56  ;;  %v8948_v56 = vld [vmem:[#allocation86_spill] sm:$0xff] }
 0x957   :  { %5492 = vmatprep.subr.bf16.mxu1 %v8894_v59  ;;  %v8949_v59 = vld [vmem:[#allocation85_spill] sm:$0xff] }
 0x958   :  { %5430 = vmatpush1.bf16.msra.mxu0 %v8895_v63  ;;  %v8950_v63 = vld [vmem:[#allocation88_spill] sm:$0xff] }
 0x959   :  { %5432 = vmatprep.subr.bf16.mxu0 %v8896_v2  ;;  %v8951_v2 = vld [vmem:[#allocation87_spill] sm:$0xff] }
 0x95a   :  { %5494 = vmatpush1.bf16.msra.mxu1 %v8897_v8  ;;  %v8952_v8 = vld [vmem:[#allocation90_spill] sm:$0xff] }
 0x95b   :  { %5496 = vmatprep.subr.bf16.mxu1 %v8898_v11  ;;  %v8953_v11 = vld [vmem:[#allocation89_spill] sm:$0xff] }
 0x95c   :  { %5434 = vmatpush1.bf16.msra.mxu0 %v8899_v16  ;;  %v8954_v16 = vld [vmem:[#allocation92_spill] sm:$0xff] }
 0x95d   :  { %5500 = vmatprep.subr.bf16.mxu0 %v8900_v25  ;;  %v8956_v25 = vld [vmem:[#allocation94_spill] sm:$0xff] }
 0x95e   :  { %5498 = vmatpush1.bf16.msra.mxu1 %v8901_v28  ;;  %v8957_v28 = vld [vmem:[#allocation93_spill] sm:$0xff] }
 0x95f   :  { %2930 = vmatmul.mubr.f32.vlgmr.msra.gmra.mrb[28].mxu0 %v3535_v19  ;;  %5564 = vmatprep.subr.bf16.mxu1 %v8902_v33  ;;  %v8958_v33 = vld [vmem:[#allocation96_spill] sm:$0xff] }
 0x960   :  { %5502 = vmatpush1.bf16.msra.mxu0 %v8903_v36  ;;  %v8959_v36 = vld [vmem:[#allocation95_spill] sm:$0xff] }
 0x961   :  { %3001 = vmatmul.mubr.f32.vlgmr.msra.gmra.mrb[28].mxu1 %v3535_v19  ;;  %5504 = vmatprep.subr.bf16.mxu0 %v8904_v42  ;;  %v8955_v19 = vld [vmem:[#allocation91_spill] sm:$0xff]  ;;  %v8960_v42 = vld [vmem:[#allocation98_spill] sm:$0xff] }
 0x962   :  { %5566 = vmatpush1.bf16.msra.mxu1 %v8905_v44  ;;  %v8961_v44 = vld [vmem:[#allocation97_spill] sm:$0xff] }
 0x963   :  { %5568 = vmatprep.subr.bf16.mxu1 %v8906_v51  ;;  %v8962_v51 = vld [vmem:[#allocation100_spill] sm:$0xff] }
 0x964   :  { %5506 = vmatpush1.bf16.msra.mxu0 %v8907_v54  ;;  %v8963_v54 = vld [vmem:[#allocation99_spill] sm:$0xff] }
 0x965   :  { %5508 = vmatprep.subr.bf16.mxu0 %v8908_v61  ;;  %v8964_v61 = vld [vmem:[#allocation101_spill] sm:$0xff] }
 0x966   :  { %5570 = vmatpush1.bf16.msra.mxu1 %v8909_v62  ;;  %v6132_v62 = vmov 0  }
 0x967   :  { %5572 = vmatprep.subr.bf16.mxu1 %v8910_v6  ;;  %5733 = vset.pattern.permute.xlu0 %v6132_v62 }
 0x968   :  { %5510 = vmatpush1.bf16.msra.mxu0 %v8911_v12  ;;  %5734 = vset.pattern.permute.xlu1 %v6132_v62 }
 0x969   :  { %5512 = vmatprep.subr.bf16.mxu0 %v8912_v21  ;;  %v8965_v21 = vld [vmem:[#allocation17_spill] sm:$0xff] }
 0x96a   :  { %5574 = vmatpush1.bf16.msra.mxu1 %v8913_v22 }
 0x96b   :  { %5576 = vmatprep.subr.bf16.mxu1 %v8914_v32 }
 0x96c   :  { %5514 = vmatpush1.bf16.msra.mxu0 %v8915_v37 }
 0x96d   :  { %5516 = vmatprep.subr.bf16.mxu0 %v8916_v58 }
 0x96e   :  { %5578 = vmatpush1.bf16.msra.mxu1 %v8917_v40 }
 0x96f   :  { %5580 = vmatprep.subr.bf16.mxu1 %v8918_v45 }
 0x970   :  { %5518 = vmatpush1.bf16.msra.mxu0 %v8919_v50 }
 0x971   :  { %5520 = vmatprep.subr.bf16.mxu0 %v8920_v41 }
 0x972   :  { %5582 = vmatpush1.bf16.msra.mxu1 %v8921_v48 }
 0x973   :  { %5584 = vmatprep.subr.bf16.mxu1 %v8922_v24 }
 0x974   :  { %5522 = vmatpush1.bf16.msra.mxu0 %v8923_v29 }
 0x975   :  { %5524 = vmatprep.subr.bf16.mxu0 %v8924_v52 }
 0x976   :  { %5586 = vmatpush1.bf16.msra.mxu1 %v8925_v23 }
 0x977   :  { %5588 = vmatprep.subr.bf16.mxu1 %v8926_v4 }
 0x978   :  { %5526 = vmatpush1.bf16.msra.mxu0 %v8927_v3 }
 0x979   :  { %5528 = vmatprep.subr.bf16.mxu0 %v8928_v17 }
 0x97a   :  { %5590 = vmatpush1.bf16.msra.mxu1 %v8929_v0 }
 0x97b   :  { %5592 = vmatprep.subr.bf16.mxu1 %v8930_v5 }
 0x97c   :  { %5530 = vmatpush1.bf16.msra.mxu0 %v8931_v60 }
 0x97d   :  { %5532 = vmatprep.subr.bf16.mxu0 %v8932_v7 }
 0x97e   :  { %5594 = vmatpush1.bf16.msra.mxu1 %v8933_v39  ;;  %v7757_v39 = vld [vmem:[#allocation2] ss:$0 sm:$0xff] }
 0x97f   :  { %5596 = vmatprep.subr.bf16.mxu1 %v8934_v9  ;;  %v736_v9 = vpop.xlane.xlu0 %735 }
 0x980   :  { %5534 = vmatpush1.bf16.msra.mxu0 %v8935_v10 }
 0x981   :  { %5536 = vmatprep.subr.bf16.mxu0 %v8936_v15  ;;  %v743_v15 = vadd.f32 %v7757_v39, %v736_v9 }
 0x982   :  { %5598 = vmatpush1.bf16.msra.mxu1 %v8937_v18 }
 0x983   :  { %5600 = vmatprep.subr.bf16.mxu1 %v8938_v26  ;;  %v3486_v18 = vmul.f32 -1.442695, %v743_v15 }
 0x984   :  { %5538 = vmatpush1.bf16.msra.mxu0 %v8939_v27 }
 0x985   :  { %5540 = vmatprep.subr.bf16.mxu0 %v8940_v31 }
 0x986   :  { %5602 = vmatpush1.bf16.msra.mxu1 %v8941_v34 }
 0x987   :  { %5604 = vmatprep.subr.bf16.mxu1 %v8942_v38 }
 0x988   :  { %5542 = vmatpush1.bf16.msra.mxu0 %v8943_v43 }
 0x989   :  { %5544 = vmatprep.subr.bf16.mxu0 %v8944_v46 }
 0x98a   :  { %5606 = vmatpush1.bf16.msra.mxu1 %v8945_v47 }
 0x98b   :  { %5608 = vmatprep.subr.bf16.mxu1 %v8946_v49 }
 0x98c   :  { %5546 = vmatpush1.bf16.msra.mxu0 %v8947_v53  ;;  %v8966_v53 = vld [vmem:[#allocation106_spill] sm:$0xff] }
 0x98d   :  { %5548 = vmatprep.subr.bf16.mxu0 %v8948_v56 }
 0x98e   :  { %5610 = vmatpush1.bf16.msra.mxu1 %v8949_v59 }
 0x98f   :  { %5612 = vmatprep.subr.bf16.mxu1 %v8950_v63 }
 0x990   :  { %5550 = vmatpush1.bf16.msra.mxu0 %v8951_v2 }
 0x991   :  { %5552 = vmatprep.subr.bf16.mxu0 %v8952_v8 }
 0x992   :  { %5614 = vmatpush1.bf16.msra.mxu1 %v8953_v11 }
 0x993   :  { %5616 = vmatprep.subr.bf16.mxu1 %v8954_v16 }
 0x994   :  { %5554 = vmatpush1.bf16.msra.mxu0 %v8955_v19 }
 0x995   :  { %5556 = vmatprep.subr.bf16.mxu0 %v8956_v25 }
 0x996   :  { %5618 = vmatpush1.bf16.msra.mxu1 %v8957_v28 }
 0x997   :  { %5620 = vmatprep.subr.bf16.mxu1 %v8958_v33 }
 0x998   :  { %5558 = vmatpush1.bf16.msra.mxu0 %v8959_v36 }
 0x999   :  { %5560 = vmatprep.subr.bf16.mxu0 %v8960_v42 }
 0x99a   :  { %5622 = vmatpush1.bf16.msra.mxu1 %v8961_v44 }
 0x99b   :  { %5624 = vmatprep.subr.bf16.mxu1 %v8962_v51 }
 0x99c   :  { %5562 = vmatpush1.bf16.msra.mxu0 %v8963_v54 }
 0x99e   :  { %5626 = vmatpush1.bf16.msra.mxu1 %v8964_v61 }
 0x9f2   :  { %v2746_v6 = vpop.f32.mrb[26].mxu0  ;;  %v2817_v12 = vpop.f32.mrb[26].mxu1 }
 0x9f3   :  { %v2747_v22 = vadd.f32 %v2746_v6, %v8965_v21  ;;  %v2748_v32 = vpop.f32.mrb[27].mxu0  ;;  %v2819_v37 = vpop.f32.mrb[27].mxu1  ;;  %v2818_v48 = vadd.f32 %v2817_v12, %v8507_v30 }
 0x9f4   :  { %v2749_v58 = vadd.f32 %v2748_v32, %v8600_v55  ;;  %v2820_v50 = vadd.f32 %v2819_v37, %v8506_v20 }
 0x9f5   :  { %v3531_v40 = vmul.f32 -1.442695, %v2747_v22 }
 0x9f6   :  { %v3532_v45 = vmul.f32 -1.442695, %v2749_v58  ;;  %v3533_v41 = vmul.f32 -1.442695, %v2820_v50 }
 0x9f7   :  { %5943 = vpow2.f32 %v3531_v40 }
 0x9f8   :  { %5945 = vpow2.f32 %v3532_v45 }
 0x9f9   :  { %5947 = vpow2.f32 %v3533_v41 }
 0x9fa   :  { %5949 = vtanh.f32 %v2818_v48 }
 0xa01   :  { %v5944_v24 = vpop.eup %5943 }
 0xa02   :  { %v5946_v29 = vpop.eup %5945  ;;  %v2825_v52 = vadd.f32 1.0, %v5944_v24 }
 0xa03   :  { %v2831_v23 = vadd.f32 1.0, %v5946_v29  ;;  %v5948_v4 = vpop.eup %5947 }
 0xa04   :  { %5951 = vrcp.f32 %v2825_v52  ;;  %v5950_v3 = vpop.eup %5949  ;;  %v2838_v60 = vadd.f32 1.0, %v5948_v4 }
 0xa05   :  { %5953 = vrcp.f32 %v2831_v23 }
 0xa06   :  { %5955 = vrcp.f32 %v2838_v60 }
 0xa0e   :  { %v5952_v17 = vpop.eup %5951 }
 0xa0f   :  { %v5954_v0 = vpop.eup %5953  ;;  %v2842_v5 = vmul.f32 %v5952_v17, %v5950_v3 }
 0xa10   :  { %v2841_v7 = vmul.f32 %v5954_v0, %v7606_v1  ;;  %v5956_v26 = vpop.eup %5955  ;;  %v7767_v1 = vld [vmem:[#allocation7] ss:$0 sm:$0xff] }
 0xa12   :  { %v7759_v10 = vadd.f32 %v2842_v5, %v2841_v7 }
 0xa14   :  { %5957 = vtanh.f32 %v7759_v10 }
 0xa15   :  { %5959 = vpow2.f32 %v3486_v18 }
 0xa1e   :  { %v5958_v27 = vpop.eup %5957 }
 0xa1f   :  { %v7763_v31 = vmul.f32 %v5958_v27, %v5956_v26  ;;  %v5960_v38 = vpop.eup %5959 }
 0xa20   :  { %v747_v43 = vadd.f32 1.0, %v5960_v38 }
 0xa21   :  { %3095 = vmatprep.mubr.f32.mxu0 %v7763_v31  ;;  %3166 = vmatprep.mubr.f32.mxu1 %v7763_v31  ;;  %v2846_v34 = vmul.f32 %v7767_v1, %v7763_v31 }
 0xa22   :  { %5961 = vrcp.f32 %v747_v43 }
 0xa23   :  { %2847 = vadd.xlane.f32.xlu0 %v2846_v34 }
 0xa2c   :  { %v5962_v11 = vpop.eup %5961 }
 0xa32   :  { %v2931_v46 = vpop.f32.mrb[28].mxu0 }
 0xa33   :  { %v2932_v47 = vadd.f32 %v2931_v46, %v8877_v57  ;;  %v2933_v49 = vpop.f32.mrb[29].mxu0 }
 0xa34   :  { %v2934_v56 = vadd.f32 %v2933_v49, %v8966_v53  ;;  %v3002_v59 = vpop.f32.mrb[28].mxu1 }
 0xa35   :  { %v3536_v63 = vmul.f32 -1.442695, %v2932_v47  ;;  %v3004_v2 = vpop.f32.mrb[29].mxu1  ;;  %v3003_v25 = vadd.f32 %v3002_v59, %v6679_v14 }
 0xa36   :  { %v3537_v8 = vmul.f32 -1.442695, %v2934_v56  ;;  %v3005_v16 = vadd.f32 %v3004_v2, %v8419_v13 }
 0xa37   :  { %5963 = vpow2.f32 %v3536_v63 }
 0xa38   :  { %5965 = vpow2.f32 %v3537_v8  ;;  %v3538_v19 = vmul.f32 -1.442695, %v3005_v16 }
 0xa39   :  { %752 = vperm.xlu0 %5733, %v5962_v11  }
 0xa3a   :  { %5967 = vpow2.f32 %v3538_v19 }
 0xa3b   :  { %5969 = vtanh.f32 %v3003_v25 }
 0xa41   :  { %v5964_v28 = vpop.eup %5963 }
 0xa42   :  { %v5966_v33 = vpop.eup %5965  ;;  %v3010_v57 = vadd.f32 1.0, %v5964_v28 }
 0xa43   :  { %v3016_v36 = vadd.f32 1.0, %v5966_v33 }
 0xa44   :  { %5971 = vrcp.f32 %v3010_v57  ;;  %v5968_v42 = vpop.eup %5967 }
 0xa45   :  { %5973 = vrcp.f32 %v3016_v36  ;;  %v5970_v44 = vpop.eup %5969  ;;  %v3023_v54 = vadd.f32 1.0, %v5968_v42 }
 0xa47   :  { %5975 = vrcp.f32 %v3023_v54 }
 0xa4e   :  { %v5972_v51 = vpop.eup %5971 }
 0xa4f   :  { %v5974_v61 = vpop.eup %5973  ;;  %v3027_v62 = vmul.f32 %v5972_v51, %v5970_v44 }
 0xa50   :  { %v3026_v6 = vmul.f32 %v5974_v61, %v7620_v35 }
 0xa51   :  { %v5976_v14 = vpop.eup %5975 }
 0xa52   :  { %v3028_v13 = vadd.f32 %v3027_v62, %v3026_v6 }
 0xa54   :  { %5977 = vtanh.f32 %v3028_v13 }
 0xa5e   :  { %v5978_v12 = vpop.eup %5977 }
 0xa5f   :  { %v3030_v22 = vmul.f32 %v5978_v12, %v5976_v14 }
 0xa61   :  { %3096 = vmatmul.mubr.f32.vlgmr.msra.gmra.mrb[30].mxu0 %v3030_v22  ;;  %3167 = vmatmul.mubr.f32.vlgmr.msra.gmra.mrb[30].mxu1 %v3030_v22 }
 0xb34   :  { %v3097_v32 = vpop.f32.mrb[30].mxu0  ;;  %v3168_v37 = vpop.f32.mrb[30].mxu1 }
 0xb35   :  { %v3098_v58 = vadd.f32 %v3097_v32, %v8965_v21  ;;  %v3099_v40 = vpop.f32.mrb[31].mxu0  ;;  %v3170_v45 = vpop.f32.mrb[31].mxu1  ;;  %v3169_v29 = vadd.f32 %v3168_v37, %v8507_v30  ;;  %v3216_v37 = vld [vmem:[%s8011_s8 + $0x8] sm:$0xff] }
 0xb36   :  { %v3100_v50 = vadd.f32 %v3099_v40, %v8600_v55  ;;  %v3171_v35 = vadd.f32 %v3170_v45, %v8506_v20  ;;  %v1093_v55 = vpop.xlane.xlu0 %1092  ;;  %v1444_v30 = vpop.xlane.xlu1 %1443  ;;  %v3215_v40 = vld [vmem:[%s8011_s8] sm:$0xff] }
 0xb37   :  { %v3539_v41 = vmul.f32 -1.442695, %v3098_v58  ;;  %v1094_v20 = vadd.f32 %v7757_v39, %v1093_v55  ;;  %v1445_v26 = vadd.f32 %v7757_v39, %v1444_v30  ;;  %v3218_v58 = vld [vmem:[%s8011_s8 + $0x18] sm:$0xff]  ;;  %v3225_v55 = vld [vmem:[%s8011_s8 + $0x50] sm:$0xff]  ;;  %v3232_v30 = vld [vmem:[%s8011_s8 + $0x88] sm:$0xff] }
 0xb38   :  { %v3540_v48 = vmul.f32 -1.442695, %v3100_v50  ;;  %v3541_v24 = vmul.f32 -1.442695, %v3171_v35  ;;  %v5627_v45 = vpack.c.bf16 %v3218_v58, %v3216_v37  ;;  %v3217_v50 = vld [vmem:[%s8011_s8 + $0x10] sm:$0xff] }
 0xb39   :  { %5979 = vpow2.f32 %v3539_v41  ;;  %v3494_v18 = vmul.f32 -1.442695, %v1094_v20  ;;  %v3502_v34 = vmul.f32 -1.442695, %v1445_v26  ;;  %v3220_v41 = vld [vmem:[%s8011_s8 + $0x28] sm:$0xff]  ;;  %v5629_v35 = vpack.c.bf16 %v3217_v50, %v3215_v40  ;;  %v3227_v20 = vld [vmem:[%s8011_s8 + $0x60] sm:$0xff] }
 0xb3a   :  { %5981 = vpow2.f32 %v3540_v48  ;;  %v1795_v27 = vpop.xlane.xlu1 %1794  ;;  %v2146_v43 = vpop.xlane.xlu0 %2145  ;;  %v3222_v48 = vld [vmem:[%s8011_s8 + $0x38] sm:$0xff]  ;;  %5628 = vmatprep.subr.bf16.mxu0 %v5627_v45  ;;  %v3255_v40 = vld [vmem:[%s8011_s8 + $0x140] sm:$0xff]  ;;  %v3257_v45 = vld [vmem:[%s8011_s8 + $0x150] sm:$0xff] }
 0xb3b   :  { %5983 = vpow2.f32 %v3541_v24  ;;  %v1796_v38 = vadd.f32 %v7757_v39, %v1795_v27  ;;  %v2147_v47 = vadd.f32 %v7757_v39, %v2146_v43  ;;  %v5631_v24 = vpack.c.bf16 %v3222_v48, %v3220_v41  ;;  %5630 = vmatpush1.bf16.msra.mxu0 %v5629_v35  ;;  %v3231_v27 = vld [vmem:[%s8011_s8 + $0x80] sm:$0xff]  ;;  %v3238_v43 = vld [vmem:[%s8011_s8 + $0xb8] sm:$0xff]  ;;  %v3260_v50 = vld [vmem:[%s8011_s8 + $0x168] sm:$0xff] }
 0xb3c   :  { %5985 = vtanh.f32 %v3169_v29  ;;  %v3219_v29 = vld [vmem:[%s8011_s8 + $0x20] sm:$0xff]  ;;  %v3262_v41 = vld [vmem:[%s8011_s8 + $0x178] sm:$0xff]  ;;  %v5669_v48 = vpack.c.bf16 %v3257_v45, %v3255_v40 }
 0xb3d   :  { %v3510_v46 = vmul.f32 -1.442695, %v1796_v38  ;;  %v3518_v59 = vmul.f32 -1.442695, %v2147_v47  ;;  %5632 = vmatprep.subr.bf16.mxu0 %v5631_v24  ;;  %v3236_v38 = vld [vmem:[%s8011_s8 + $0xa8] sm:$0xff]  ;;  %v5671_v35 = vpack.c.bf16 %v3262_v41, %v3260_v50  ;;  %v3259_v24 = vld [vmem:[%s8011_s8 + $0x160] sm:$0xff] }
 0xb3e   :  { %v2497_v53 = vpop.xlane.xlu1 %2496  ;;  %v2848_v2 = vpop.xlane.xlu0 %2847  ;;  %v5647_v47 = vpack.c.bf16 %v3238_v43, %v3236_v38  ;;  %v3369_v40 = vld [vmem:[#allocation8 + $0x38] sm:$0xff]  ;;  %v3386_v45 = vld [vmem:[#allocation8 + $0xc0] sm:$0xff]  ;;  %v3387_v50 = vld [vmem:[#allocation8 + $0xc8] sm:$0xff] }
 0xb3f   :  { %v2498_v63 = vadd.f32 %v7757_v39, %v2497_v53  ;;  %v2849_v19 = vadd.f32 %v7757_v39, %v2848_v2  ;;  %v3237_v53 = vld [vmem:[%s8011_s8 + $0xb0] sm:$0xff] }
 0xb41   :  { %v3526_v16 = vmul.f32 -1.442695, %v2498_v63  ;;  %v3534_v33 = vmul.f32 -1.442695, %v2849_v19  ;;  %v3246_v19 = vld [vmem:[%s8011_s8 + $0xf8] sm:$0xff] }
 0xb43   :  { %v5980_v52 = vpop.eup %5979 }
 0xb44   :  { %v5982_v23 = vpop.eup %5981  ;;  %v3176_v4 = vadd.f32 1.0, %v5980_v52  ;;  %v3221_v52 = vld [vmem:[%s8011_s8 + $0x30] sm:$0xff] }
 0xb45   :  { %v3182_v3 = vadd.f32 1.0, %v5982_v23  ;;  %v5984_v21 = vpop.eup %5983  ;;  %v3224_v23 = vld [vmem:[%s8011_s8 + $0x48] sm:$0xff] }
 0xb46   :  { %5987 = vrcp.f32 %v3176_v4  ;;  %v5986_v17 = vpop.eup %5985  ;;  %v3189_v7 = vadd.f32 1.0, %v5984_v21  ;;  %v3226_v4 = vld [vmem:[%s8011_s8 + $0x58] sm:$0xff] }
 0xb47   :  { %5989 = vrcp.f32 %v3182_v3  ;;  %v5633_v3 = vpack.c.bf16 %v3221_v52, %v3219_v29  ;;  %v5635_v21 = vpack.c.bf16 %v3226_v4, %v3224_v23  ;;  %v3261_v29 = vld [vmem:[%s8011_s8 + $0x170] sm:$0xff]  ;;  %v3264_v52 = vld [vmem:[%s8011_s8 + $0x188] sm:$0xff]  ;;  %v3266_v23 = vld [vmem:[%s8011_s8 + $0x198] sm:$0xff] }
 0xb48   :  { %5991 = vrcp.f32 %v3189_v7  ;;  %v5673_v4 = vpack.c.bf16 %v3261_v29, %v3259_v24  ;;  %v3371_v24 = vld [vmem:[#allocation8 + $0x48] sm:$0xff]  ;;  %v3388_v29 = vld [vmem:[#allocation8 + $0xd0] sm:$0xff] }
 0xb49   :  { %5634 = vmatpush1.bf16.msra.mxu0 %v5633_v3  ;;  %v5675_v3 = vpack.c.bf16 %v3266_v23, %v3264_v52  ;;  %v3389_v52 = vld [vmem:[#allocation8 + $0xd8] sm:$0xff] }
 0xb4a   :  { %5636 = vmatprep.subr.bf16.mxu0 %v5635_v21  ;;  %v3263_v21 = vld [vmem:[%s8011_s8 + $0x180] sm:$0xff] }
 0xb50   :  { %v5988_v0 = vpop.eup %5987 }
 0xb51   :  { %v5990_v5 = vpop.eup %5989  ;;  %v3193_v60 = vmul.f32 %v5988_v0, %v5986_v17  ;;  %v3223_v17 = vld [vmem:[%s8011_s8 + $0x40] sm:$0xff]  ;;  %v3228_v0 = vld [vmem:[%s8011_s8 + $0x68] sm:$0xff] }
 0xb52   :  { %v3192_v9 = vmul.f32 %v5990_v5, %v7759_v10  ;;  %v5992_v49 = vpop.eup %5991  ;;  %v3230_v5 = vld [vmem:[%s8011_s8 + $0x78] sm:$0xff] }
 0xb53   :  { %v5639_v7 = vpack.c.bf16 %v3230_v5, %v3228_v0  ;;  %v3270_v0 = vld [vmem:[%s8011_s8 + $0x1b8] sm:$0xff] }
 0xb54   :  { %v3194_v15 = vadd.f32 %v3193_v60, %v3192_v9  ;;  %v5637_v60 = vpack.c.bf16 %v3225_v55, %v3223_v17  ;;  %v3229_v9 = vld [vmem:[%s8011_s8 + $0x70] sm:$0xff]  ;;  %v3268_v55 = vld [vmem:[%s8011_s8 + $0x1a8] sm:$0xff] }
 0xb55   :  { %v3265_v17 = vld [vmem:[%s8011_s8 + $0x190] sm:$0xff] }
 0xb56   :  { %5993 = vtanh.f32 %v3194_v15  ;;  %v3234_v15 = vld [vmem:[%s8011_s8 + $0x98] sm:$0xff]  ;;  %5638 = vmatpush1.bf16.msra.mxu0 %v5637_v60  ;;  %v5677_v5 = vpack.c.bf16 %v3265_v17, %v3263_v21  ;;  %v5679_v60 = vpack.c.bf16 %v3270_v0, %v3268_v55  ;;  %v3390_v17 = vld [vmem:[#allocation8 + $0xe0] sm:$0xff]  ;;  %v3391_v55 = vld [vmem:[#allocation8 + $0xe8] sm:$0xff] }
 0xb57   :  { %5995 = vpow2.f32 %v3494_v18  ;;  %v5641_v18 = vpack.c.bf16 %v3229_v9, %v3227_v20  ;;  %5640 = vmatprep.subr.bf16.mxu0 %v5639_v7  ;;  %v5643_v26 = vpack.c.bf16 %v3234_v15, %v3232_v30  ;;  %v3267_v7 = vld [vmem:[%s8011_s8 + $0x1a0] sm:$0xff]  ;;  %v3269_v20 = vld [vmem:[%s8011_s8 + $0x1b0] sm:$0xff]  ;;  %v3272_v9 = vld [vmem:[%s8011_s8 + $0x1c8] sm:$0xff] }
 0xb58   :  { %5997 = vpow2.f32 %v3502_v34  ;;  %v3233_v34 = vld [vmem:[%s8011_s8 + $0x90] sm:$0xff]  ;;  %v3274_v30 = vld [vmem:[%s8011_s8 + $0x1d8] sm:$0xff]  ;;  %v5681_v15 = vpack.c.bf16 %v3269_v20, %v3267_v7 }
 0xb59   :  { %5999 = vpow2.f32 %v3510_v46  ;;  %v5645_v46 = vpack.c.bf16 %v3233_v34, %v3231_v27  ;;  %v3273_v27 = vld [vmem:[%s8011_s8 + $0x1d0] sm:$0xff]  ;;  %v3373_v21 = vld [vmem:[#allocation8 + $0x58] sm:$0xff] }
 0xb5a   :  { %6001 = vpow2.f32 %v3518_v59  ;;  %5642 = vmatpush1.bf16.msra.mxu0 %v5641_v18  ;;  %v3242_v59 = vld [vmem:[%s8011_s8 + $0xd8] sm:$0xff]  ;;  %v5683_v18 = vpack.c.bf16 %v3274_v30, %v3272_v9  ;;  %v3375_v7 = vld [vmem:[#allocation8 + $0x68] sm:$0xff] }
 0xb5b   :  { %6003 = vpow2.f32 %v3526_v16  ;;  %5644 = vmatprep.subr.bf16.mxu0 %v5643_v26  ;;  %v3244_v16 = vld [vmem:[%s8011_s8 + $0xe8] sm:$0xff]  ;;  %v3271_v26 = vld [vmem:[%s8011_s8 + $0x1c0] sm:$0xff] }
 0xb5c   :  { %v5685_v34 = vpack.c.bf16 %v3273_v27, %v3271_v26  ;;  %v753_v26 = vpop.permute.xlu0 %752  ;;  %v8967_v27 = vld [vmem:[#allocation107_spill] sm:$0xff] }
 0xb5e   :  { %5646 = vmatpush1.bf16.msra.mxu0 %v5645_v46 }
 0xb5f   :  { %5648 = vmatprep.subr.bf16.mxu0 %v5647_v47 }
 0xb60   :  { %v5994_v10 = vpop.eup %5993 }
 0xb61   :  { %v7785_v56 = vmul.f32 %v5994_v10, %v5992_v49  ;;  %v5996_v11 = vpop.eup %5995  ;;  %v3235_v49 = vld [vmem:[%s8011_s8 + $0xa0] sm:$0xff]  ;;  %v3240_v10 = vld [vmem:[%s8011_s8 + $0xc8] sm:$0xff] }
 0xb62   :  { %v1098_v25 = vadd.f32 1.0, %v5996_v11  ;;  %v5998_v28 = vpop.eup %5997  ;;  %v5649_v63 = vpack.c.bf16 %v3237_v53, %v3235_v49  ;;  %v5651_v2 = vpack.c.bf16 %v3242_v59, %v3240_v10  ;;  %v3241_v11 = vld [vmem:[%s8011_s8 + $0xd0] sm:$0xff]  ;;  %v3276_v53 = vld [vmem:[%s8011_s8 + $0x1e8] sm:$0xff]  ;;  %v3278_v10 = vld [vmem:[%s8011_s8 + $0x1f8] sm:$0xff] }
 0xb63   :  { %v3197_v8 = vmul.f32 %v7767_v1, %v7785_v56  ;;  %v1449_v57 = vadd.f32 1.0, %v5998_v28  ;;  %v6000_v36 = vpop.eup %5999  ;;  %v5655_v28 = vpack.c.bf16 %v3246_v19, %v3244_v16  ;;  %v3378_v16 = vld [vmem:[#allocation8 + $0x80] sm:$0xff]  ;;  %v3379_v19 = vld [vmem:[#allocation8 + $0x88] sm:$0xff] }
 0xb64   :  { %6005 = vrcp.f32 %v1098_v25  ;;  %v1800_v42 = vadd.f32 1.0, %v6000_v36  ;;  %v6002_v44 = vpop.eup %6001  ;;  %5650 = vmatpush1.bf16.msra.mxu0 %v5649_v63  ;;  %v3248_v36 = vld [vmem:[%s8011_s8 + $0x108] sm:$0xff]  ;;  %v5687_v63 = vpack.c.bf16 %v3278_v10, %v3276_v53 }
 0xb65   :  { %3198 = vadd.xlane.f32.xlu1 %v3197_v8  ;;  %6007 = vpow2.f32 %v3534_v33  ;;  %v2151_v51 = vadd.f32 1.0, %v6002_v44  ;;  %v6004_v1 = vpop.eup %6003  ;;  %v3239_v8 = vld [vmem:[%s8011_s8 + $0xc0] sm:$0xff]  ;;  %5652 = vmatprep.subr.bf16.mxu0 %v5651_v2 }
 0xb66   :  { %6009 = vrcp.f32 %v1449_v57  ;;  %v2502_v61 = vadd.f32 1.0, %v6004_v1  ;;  %v5653_v25 = vpack.c.bf16 %v3241_v11, %v3239_v8  ;;  %v3243_v33 = vld [vmem:[%s8011_s8 + $0xe0] sm:$0xff]  ;;  %v3245_v57 = vld [vmem:[%s8011_s8 + $0xf0] sm:$0xff] }
 0xb67   :  { %6011 = vrcp.f32 %v1800_v42  ;;  %v3250_v42 = vld [vmem:[%s8011_s8 + $0x118] sm:$0xff]  ;;  %v5657_v44 = vpack.c.bf16 %v3245_v57, %v3243_v33  ;;  %v3247_v1 = vld [vmem:[%s8011_s8 + $0x100] sm:$0xff]  ;;  %v3363_v33 = vld [vmem:[#allocation8 + $0x8] sm:$0xff] }
 0xb68   :  { %6013 = vrcp.f32 %v2151_v51  ;;  %5654 = vmatpush1.bf16.msra.mxu0 %v5653_v25  ;;  %v5659_v51 = vpack.c.bf16 %v3250_v42, %v3248_v36  ;;  %v3275_v2 = vld [vmem:[%s8011_s8 + $0x1e0] sm:$0xff]  ;;  %v3380_v57 = vld [vmem:[#allocation8 + $0x90] sm:$0xff] }
 0xb69   :  { %6015 = vrcp.f32 %v2502_v61  ;;  %5656 = vmatprep.subr.bf16.mxu0 %v5655_v28  ;;  %v3252_v61 = vld [vmem:[%s8011_s8 + $0x128] sm:$0xff]  ;;  %v3214_v11 = vld [vmem:[%s8004_s1] sm:$0xff]  ;;  %v5691_v28 = vpack.c.bf16 %v3379_v19, %v3378_v16 }
 0xb6a   :  { %3355 = vmatprep.mubr.f32.mxu0 %v3214_v11  ;;  %v3362_v25 = vld [vmem:[#allocation8] sm:$0xff]  ;;  %v3381_v36 = vld [vmem:[#allocation8 + $0x98] sm:$0xff] }
 0xb6b   :  { %v5693_v42 = vpack.c.bf16 %v3363_v33, %v3362_v25  ;;  %5692 = vmatprep.subr.bf16.mxu1 %v5691_v28  ;;  %v8970_v10 = vld [vmem:[#allocation109_spill] sm:$0xff]  ;;  %v8972_v16 = vld [vmem:[#allocation108_spill] sm:$0xff] }
 0xb6c   :  { %5658 = vmatpush1.bf16.msra.mxu0 %v5657_v44  ;;  %v5695_v44 = vpack.c.bf16 %v3381_v36, %v3380_v57 }
 0xb6d   :  { %5660 = vmatprep.subr.bf16.mxu0 %v5659_v51  ;;  %v3364_v51 = vld [vmem:[#allocation8 + $0x10] sm:$0xff]  ;;  %5694 = vmatpush3.bf16.msra.mxu1 %v5693_v42 }
 0xb6e   :  { %v6006_v54 = vpop.eup %6005  ;;  %5696 = vmatprep.subr.bf16.mxu1 %v5695_v44 }
 0xb6f   :  { %v6008_v62 = vpop.eup %6007 }
 0xb70   :  { %v6010_v6 = vpop.eup %6009  ;;  %v2853_v13 = vadd.f32 1.0, %v6008_v62  ;;  %v3254_v62 = vld [vmem:[%s8011_s8 + $0x138] sm:$0xff] }
 0xb71   :  { %v6012_v14 = vpop.eup %6011 }
 0xb72   :  { %6017 = vrcp.f32 %v2853_v13  ;;  %v6014_v12 = vpop.eup %6013  ;;  %v5663_v13 = vpack.c.bf16 %v3254_v62, %v3252_v61  ;;  %v3383_v61 = vld [vmem:[#allocation8 + $0xa8] sm:$0xff] }
 0xb73   :  { %v6016_v22 = vpop.eup %6015 }
 0xb76   :  { %1103 = vperm.xlu1 %5734, %v6006_v54   ;;  %v3249_v54 = vld [vmem:[%s8011_s8 + $0x110] sm:$0xff] }
 0xb7a   :  { %1454 = vperm.xlu1 %5734, %v6010_v6   ;;  %v5661_v6 = vpack.c.bf16 %v3249_v54, %v3247_v1  ;;  %v3365_v1 = vld [vmem:[#allocation8 + $0x18] sm:$0xff]  ;;  %v3382_v54 = vld [vmem:[#allocation8 + $0xa0] sm:$0xff] }
 0xb7b   :  { %v5697_v62 = vpack.c.bf16 %v3365_v1, %v3364_v51  ;;  %v3392_v51 = vld [vmem:[#allocation8 + $0xf0] sm:$0xff]  ;;  %v3393_v1 = vld [vmem:[#allocation8 + $0xf8] sm:$0xff] }
 0xb7c   :  { %v6018_v32 = vpop.eup %6017  ;;  %5662 = vmatpush1.bf16.msra.mxu0 %v5661_v6  ;;  %v5699_v6 = vpack.c.bf16 %v3383_v61, %v3382_v54  ;;  %v5719_v54 = vpack.c.bf16 %v3393_v1, %v3392_v51  ;;  %v3376_v61 = vld [vmem:[#allocation8 + $0x70] sm:$0xff] }
 0xb7d   :  { %5664 = vmatprep.subr.bf16.mxu0 %v5663_v13  ;;  %v3366_v13 = vld [vmem:[#allocation8 + $0x20] sm:$0xff]  ;;  %5698 = vmatpush3.bf16.msra.mxu1 %v5697_v62  ;;  %v3377_v62 = vld [vmem:[#allocation8 + $0x78] sm:$0xff] }
 0xb7e   :  { %1805 = vperm.xlu1 %5734, %v6012_v14   ;;  %v3251_v14 = vld [vmem:[%s8011_s8 + $0x120] sm:$0xff]  ;;  %5700 = vmatprep.subr.bf16.mxu1 %v5699_v6  ;;  %v5721_v6 = vpack.c.bf16 %v3377_v62, %v3376_v61 }
 0xb82   :  { %2156 = vperm.xlu1 %5734, %v6014_v12   ;;  %v3253_v12 = vld [vmem:[%s8011_s8 + $0x130] sm:$0xff] }
 0xb83   :  { %v5665_v37 = vpack.c.bf16 %v3253_v12, %v3251_v14  ;;  %v3367_v14 = vld [vmem:[#allocation8 + $0x28] sm:$0xff]  ;;  %v3384_v12 = vld [vmem:[#allocation8 + $0xb0] sm:$0xff] }
 0xb85   :  { %5666 = vmatpush1.bf16.msra.mxu0 %v5665_v37 }
 0xb86   :  { %2507 = vperm.xlu1 %5734, %v6016_v22   ;;  %v3256_v22 = vld [vmem:[%s8011_s8 + $0x148] sm:$0xff] }
 0xb8a   :  { %2858 = vperm.xlu1 %5734, %v6018_v32   ;;  %v3258_v32 = vld [vmem:[%s8011_s8 + $0x158] sm:$0xff] }
 0xb8b   :  { %v5667_v58 = vpack.c.bf16 %v3258_v32, %v3256_v22  ;;  %v3385_v22 = vld [vmem:[#allocation8 + $0xb8] sm:$0xff]  ;;  %v5701_v32 = vpack.c.bf16 %v3367_v14, %v3366_v13 }
 0xb8c   :  { %v5703_v37 = vpack.c.bf16 %v3385_v22, %v3384_v12  ;;  %v3279_v13 = vld [vmem:[%s8012_s9] sm:$0x3]  ;;  %v8974_v12 = vld [vmem:[#allocation103_spill] sm:$0xff] }
 0xb8d   :  { %5668 = vmatprep.subr.bf16.mxu0 %v5667_v58  ;;  %v3368_v58 = vld [vmem:[#allocation8 + $0x30] sm:$0xff]  ;;  %5702 = vmatpush3.bf16.msra.mxu1 %v5701_v32  ;;  %v3284_v22 = vrot.slane %v3279_v13, %v8974_v12 }
 0xb8e   :  { %5670 = vmatpush1.bf16.msra.mxu0 %v5669_v48  ;;  %v5705_v41 = vpack.c.bf16 %v3369_v40, %v3368_v58  ;;  %5704 = vmatprep.subr.bf16.mxu1 %v5703_v37  ;;  %v5707_v48 = vpack.c.bf16 %v3387_v50, %v3386_v45 }
 0xb8f   :  { %5672 = vmatprep.subr.bf16.mxu0 %v5671_v35  ;;  %v3370_v35 = vld [vmem:[#allocation8 + $0x40] sm:$0xff] }
 0xb90   :  { %v5709_v23 = vpack.c.bf16 %v3371_v24, %v3370_v35 }
 0xb91   :  { %5706 = vmatpush3.bf16.msra.mxu1 %v5705_v41 }
 0xb92   :  { %5674 = vmatpush1.bf16.msra.mxu0 %v5673_v4  ;;  %5708 = vmatprep.subr.bf16.mxu1 %v5707_v48  ;;  %v5711_v4 = vpack.c.bf16 %v3389_v52, %v3388_v29 }
 0xb93   :  { %5676 = vmatprep.subr.bf16.mxu0 %v5675_v3  ;;  %v3372_v3 = vld [vmem:[#allocation8 + $0x50] sm:$0xff] }
 0xb94   :  { %v5713_v0 = vpack.c.bf16 %v3373_v21, %v3372_v3 }
 0xb95   :  { %5710 = vmatpush3.bf16.msra.mxu1 %v5709_v23 }
 0xb96   :  { %5678 = vmatpush1.bf16.msra.mxu0 %v5677_v5  ;;  %5712 = vmatprep.subr.bf16.mxu1 %v5711_v4  ;;  %v5715_v5 = vpack.c.bf16 %v3391_v55, %v3390_v17 }
 0xb97   :  { %5680 = vmatprep.subr.bf16.mxu0 %v5679_v60  ;;  %v3374_v60 = vld [vmem:[#allocation8 + $0x60] sm:$0xff] }
 0xb98   :  { %v5717_v20 = vpack.c.bf16 %v3375_v7, %v3374_v60 }
 0xb99   :  { %5714 = vmatpush3.bf16.msra.mxu1 %v5713_v0 }
 0xb9a   :  { %5682 = vmatpush1.bf16.msra.mxu0 %v5681_v15  ;;  %5716 = vmatprep.subr.bf16.mxu1 %v5715_v5 }
 0xb9b   :  { %5684 = vmatprep.subr.bf16.mxu0 %v5683_v18 }
 0xb9d   :  { %5718 = vmatpush3.bf16.msra.mxu1 %v5717_v20 }
 0xb9e   :  { %5686 = vmatpush1.bf16.msra.mxu0 %v5685_v34  ;;  %5720 = vmatprep.subr.bf16.mxu1 %v5719_v54 }
 0xb9f   :  { %5688 = vmatprep.subr.bf16.mxu0 %v5687_v63 }
 0xba1   :  { %5722 = vmatpush3.bf16.msra.mxu1 %v5721_v6 }
 0xbf2   :  { %v3199_v38 = vpop.xlane.xlu1 %3198 }
 0xbf3   :  { %v3200_v43 = vadd.f32 %v7757_v39, %v3199_v38  ;;  %v3277_v39 = vld [vmem:[%s8011_s8 + $0x1f0] sm:$0xff] }
 0xbf4   :  { %v5689_v8 = vpack.c.bf16 %v3277_v39, %v3275_v2  ;;  %v8971_v2 = vld [vmem:[#allocation110_spill] sm:$0xff] }
 0xbf5   :  { %v3542_v46 = vmul.f32 -1.442695, %v3200_v43  ;;  %v8968_v43 = vld [vmem:[#allocation111_spill] sm:$0xff] }
 0xbf6   :  { %5690 = vmatpush1.bf16.msra.mxu0 %v5689_v8  ;;  %v1104_v9 = vpop.permute.xlu1 %1103 }
 0xbf7   :  { %6019 = vpow2.f32 %v3542_v46  ;;  %v1106_v34 = vmul.f32 %v1104_v9, %v8967_v27  ;;  %v755_v46 = vmul.f32 %v753_v26, %v8968_v43 }
 0xbf9   :  { %v1107_v53 = vadd.f32 %v1106_v34, %v755_v46 }
 0xbfa   :  { %v1455_v30 = vpop.permute.xlu1 %1454 }
 0xbfe   :  { %v1806_v15 = vpop.permute.xlu1 %1805 }
 0xc01   :  { %v6020_v47 = vpop.eup %6019 }
 0xc02   :  { %v3204_v49 = vadd.f32 1.0, %v6020_v47  ;;  %v2157_v18 = vpop.permute.xlu1 %2156  ;;  %v8969_v47 = vld [vmem:[#allocation102_spill] sm:$0xff] }
 0xc03   :  { %v2159_v39 = vmul.f32 %v2157_v18, %v8971_v2 }
 0xc04   :  { %6021 = vrcp.f32 %v3204_v49  ;;  %v1457_v49 = vmul.f32 %v1455_v30, %v8969_v47 }
 0xc06   :  { %v2508_v38 = vpop.permute.xlu1 %2507  ;;  %v1458_v63 = vadd.f32 %v1457_v49, %v1107_v53 }
 0xc07   :  { %v2510_v19 = vmul.f32 %v2508_v38, %v8972_v16 }
 0xc0a   :  { %v2859_v8 = vpop.permute.xlu1 %2858 }
 0xc0b   :  { %v2861_v28 = vmul.f32 %v2859_v8, %v7763_v31  ;;  %v8973_v31 = vld [vmem:[#allocation104_spill] sm:$0xff] }
 0xc0c   :  { %v3288_v14 = vrot.slane %v3279_v13, %v8973_v31 }
 0xc0e   :  { %v6022_v59 = vpop.eup %6021 }
 0xc0f   :  { %3209 = vperm.xlu1 %5734, %v6022_v59   ;;  %v1808_v59 = vmul.f32 %v1806_v15, %v8970_v10 }
 0xc11   :  { %v1809_v11 = vadd.f32 %v1808_v59, %v1458_v63 }
 0xc13   :  { %v2160_v25 = vadd.f32 %v2159_v39, %v1809_v11 }
 0xc15   :  { %v2511_v33 = vadd.f32 %v2510_v19, %v2160_v25 }
 0xc17   :  { %v2862_v36 = vadd.f32 %v2861_v28, %v2511_v33 }
 0xc8e   :  { %v3210_v57 = vpop.permute.xlu1 %3209 }
 0xc8f   :  { %v3212_v42 = vmul.f32 %v3210_v57, %v7785_v56 }
 0xc91   :  { %v3213_v44 = vadd.f32 %v3212_v42, %v2862_v36 }
 0xc93   :  { %3356 = vmatmul.mubr.f32.vlgmr.msra.gmra.mrb[32].mxu0 %v3213_v44 }
 0xd66   :  { %v3357_v32 = vpop.f32.mrb[32].mxu0 }
 0xd67   :  { %v3359_v56 = vpop.f32.mrb[33].mxu0  ;;  %v3358_v58 = vadd.f32 %v3357_v32, %v3284_v22 }
 0xd68   :  { %v3360_v37 = vadd.f32 %v3359_v56, %v3288_v14 }
 0xd6a   :  { %3458 = vmatprep.mubr.f32.mxu1 %v3360_v37 }
 0xd6b   :  { %3459 = vmatmul.mubr.f32.vlgmr.msra.gmra.mrb[32].mxu1 %v3358_v58 }
 0xe3e   :  { %v3576_v40 = vpop.f32.mrb[32].mxu1 }
 0xe3f   :  { %v3577_v45 = vpop.f32.mrb[33].mxu1 }
 0xe40   :  { %v3578_v50 = vadd.f32 %v3577_v45, %v3576_v40 }
 0xe42   :  { %v3543_v41 = vmul.f32 -1.442695, %v3578_v50 }
 0xe44   :  { %6023 = vpow2.f32 %v3543_v41 }
 0xe4e   :  { %v6024_v48 = vpop.eup %6023 }
 0xe4f   :  { %v3467_v35 = vadd.f32 1.0, %v6024_v48 }
 0xe51   :  { %6025 = vrcp.f32 %v3467_v35 }
 0xe5b   :  { %v6026_v24 = vpop.eup %6025 }
 0xe5c   :  { %3470 = vst [vmem:[%s8014_s11] sm:$0xff] %v6026_v24 }
 0xe5d   :  { %3475 = vsyncpa [#allocation4], 1 }
 0xe5e   :  { %3476 = vsyncpa [#allocation6], 1 }
 0xe5f   :  { %3477 = vsyncpa [#allocation9], 1 }

</bundles_post_ra>
